<compile_context>
chip_gen: v6e
topology: v6e:2x2x1
jax: 0.10.0
libtpu: 0.0.40
codegen_flags: <defaults>
</compile_context>

<pallas_src>
import numpy as np
import jax
import jax.numpy as jnp
from jax.experimental import pallas as pl
from jax.experimental.pallas import tpu as pltpu

LANE = 128
SUBLANE = 8


def _round_up(x, m):
    return -(-x // m) * m


def _partial_gemv_kernel(x_ref, w_ref, o_ref):
    """One independent grid step of the Linear(F -> 1) GEMV.

    x_ref: (TB, TKR, 128) VMEM  input slab (native dtype, cast here)
    w_ref: (TKR, 128)     VMEM  matching weight slab
    o_ref: (1, TB, 1)     VMEM  partial dot-products for this (k, batch) tile
    """
    x = x_ref[...].astype(jnp.float32)                     # (TB, TKR, 128)
    w = w_ref[...].astype(jnp.float32)                     # (TKR, 128)
    xw = x * w[None, :, :]                                 # VPU multiply
    # VALU vreg-group accumulation, then a single XLU sublane reduce per tile.
    part = jnp.sum(xw, axis=1)                             # (TB, 128)
    # One cross-lane (XLU) reduce + one tiny (TB, 1) store per grid step.
    row = jnp.sum(part, axis=1, keepdims=True)             # (TB, 1)
    o_ref[...] = row[None, :, :].astype(o_ref.dtype)


def toynetwork_forward(x, weight, bias):
    """relu(x @ weight^T + bias) with a single output unit (Toynetwork.forward).

    x:      (B, F) or (B, C, H, W) array (any float dtype; streamed natively)
    weight: (F,) or (1, F) array (Toynetwork stores all-zeros at init)
    bias:   scalar
    returns (B, 1) float32
    """
    if x.ndim > 2:
        x = x.reshape(x.shape[0], -1)
    weight = jnp.asarray(weight).reshape(-1)
    B, F = x.shape
    assert weight.shape == (F,), (weight.shape, F)

    itemsize = jnp.dtype(x.dtype).itemsize
    base = 16 if itemsize < 4 else 8        # k-tile sublane multiple (bf16-safe)

    # --- batch tiling --------------------------------------------------------
    tb = min(_round_up(B, SUBLANE), 128)    # 128 cap keeps large-B slabs VMEM-safe on v7x
    b_pad = _round_up(B, tb)

    # --- reduction tiling ----------------------------------------------------
    kcols = -(-F // LANE)                   # 128-lane groups covering F
    bytes_per_group = tb * LANE * itemsize
    SLAB_TARGET = 2 * 1024 * 1024           # ~2 MiB x-slab/step: >=85% of HBM roofline,
                                            # yields 3 even k-tiles for F = 3*224*224
    tkr = max(base, (SLAB_TARGET // bytes_per_group) // base * base)
    tkr = min(tkr, _round_up(kcols, base))
    n_ktiles = -(-kcols // tkr)
    tkr = _round_up(-(-kcols // n_ktiles), base)   # even k-tiles; exact (no pad) for F=150528
    kcols_pad = n_ktiles * tkr
    f_pad = kcols_pad * LANE

    # --- pad (no-op for the module's F) & lane-aligned views ------------------
    # TODO(synk): handle a ragged last k-tile in-kernel to avoid this full-copy
    # jnp.pad when F does not tile evenly (it does for F = 3*224*224).
    if (b_pad, f_pad) != (B, F):
        x = jnp.pad(x, ((0, b_pad - B), (0, f_pad - F)))
    w = weight
    if f_pad != F:
        w = jnp.pad(w, (0, f_pad - F))

    x3 = x.reshape(b_pad, kcols_pad, LANE)   # metadata-only reshape of row-major HBM
    w2 = w.reshape(kcols_pad, LANE)

    # k-tiles outer, batch inner: the weight slab's block index only changes
    # with k, so it is fetched once per k-tile even when batch_tiles > 1.
    grid = (n_ktiles, b_pad // tb)

    partials = pl.pallas_call(
        _partial_gemv_kernel,
        out_shape=jax.ShapeDtypeStruct((n_ktiles, b_pad, 1), jnp.float32),
        grid=grid,
        in_specs=[
            pl.BlockSpec((tb, tkr, LANE), lambda k, i: (i, k, 0)),   # x slab
            pl.BlockSpec((tkr, LANE), lambda k, i: (k, 0)),          # weight slab
        ],
        out_specs=pl.BlockSpec((1, tb, 1), lambda k, i: (k, i, 0)),
        compiler_params=pltpu.CompilerParams(
            # Every grid step is independent -> fully parallel; on v7x the
            # second TensorCore takes a share of the k-tiles.
            dimension_semantics=("parallel", "parallel"),
        ),
    )(x3, w2)

    # Tiny epilogue: combine per-k-tile partials, add bias, ReLU, drop padding.
    out = jnp.maximum(jnp.sum(partials, axis=0) + jnp.asarray(bias, jnp.float32), 0.0)
    return out[:B]


if __name__ == "__main__":
    image_dim = 224                    # fixed by Toynetwork's fc1 in_features
    F = 3 * image_dim * image_dim
    batch = 8

    key = jax.random.PRNGKey(0)
    kx, kb, kw = jax.random.split(key, 3)

    # Input as the NCHW image batch the module's Linear expects once flattened.
    x = jax.random.normal(kx, (batch, 3, image_dim, image_dim), dtype=jnp.float32)

    # Module parameters: Toynetwork.__init__ overwrites fc1.weight with zeros;
    # the bias keeps nn.Linear's U(-1/sqrt(F), 1/sqrt(F)) init, drawn
    # deterministically from the same key.
    weight = jnp.zeros((F,), dtype=jnp.float32)
    bound = float(F) ** -0.5
    bias = jax.random.uniform(kb, (), minval=-bound, maxval=bound, dtype=jnp.float32)

    out = jax.block_until_ready(toynetwork_forward(x, weight, bias))
    assert out.shape == (batch, 1)

    # Reference (float64 on host): relu(x_flat @ W^T + b).  With the zero
    # weight this is relu(bias) broadcast, matching the freshly-init'd module.
    x64 = np.asarray(x, np.float64).reshape(batch, F)
    ref = np.maximum(x64 @ np.zeros((F, 1)) + float(bias), 0.0)
    assert np.allclose(np.asarray(out), ref, rtol=1e-4, atol=1e-4)

    # Silent extra check with a non-zero weight so the reduction path is
    # actually exercised (the kernel is a general Linear(F->1)+ReLU).
    w_test = jax.random.normal(kw, (F,), dtype=jnp.float32) * bound
    out2 = jax.block_until_ready(toynetwork_forward(x, w_test, bias))
    ref2 = np.maximum(x64 @ np.asarray(w_test, np.float64)[:, None] + float(bias), 0.0)
    assert np.allclose(np.asarray(out2), ref2, rtol=2e-3, atol=2e-3)

    print("KERNEL_OK")
</pallas_src>

<mosaic_0001>
module attributes {stable_mosaic.version = 11 : i64} {
  func.func @_partial_gemv_kernel(%arg0: i32, %arg1: i32, %arg2: memref<8x392x128xf32, #tpu.memory_space<vmem>>, %arg3: memref<392x128xf32, #tpu.memory_space<vmem>>, %arg4: memref<1x8x1xf32, #tpu.memory_space<vmem>>) attributes {dimension_semantics = [#tpu.dimension_semantics<parallel>, #tpu.dimension_semantics<parallel>], iteration_bounds = array<i64: 3, 1>, scalar_prefetch = 0 : i64, scratch_operands = 0 : i64, tpu.core_type = #tpu.core_type<tc>, window_params = [{transform_indices = @transform_0, window_bounds = array<i64: 8, 392, 128>}, {transform_indices = @transform_1, window_bounds = array<i64: 392, 128>}, {transform_indices = @transform_2, window_bounds = array<i64: 1, 8, 1>}]} {
    %c0 = arith.constant 0 : index
    %c0_0 = arith.constant 0 : index
    %c0_1 = arith.constant 0 : index
    %0 = vector.load %arg2[%c0, %c0_0, %c0_1] : memref<8x392x128xf32, #tpu.memory_space<vmem>>, vector<8x392x128xf32>
    %c0_2 = arith.constant 0 : index
    %c0_3 = arith.constant 0 : index
    %1 = vector.load %arg3[%c0_2, %c0_3] : memref<392x128xf32, #tpu.memory_space<vmem>>, vector<392x128xf32>
    %2 = vector.shape_cast %1 : vector<392x128xf32> to vector<1x392x128xf32>
    %3 = vector.broadcast %2 : vector<1x392x128xf32> to vector<8x392x128xf32>
    %4 = arith.mulf %0, %3 : vector<8x392x128xf32>
    %cst = arith.constant dense<0.000000e+00> : vector<8x128xf32>
    %5 = vector.multi_reduction <add>, %4, %cst [1] : vector<8x392x128xf32> to vector<8x128xf32>
    %cst_4 = arith.constant dense<0.000000e+00> : vector<8xf32>
    %6 = vector.multi_reduction <add>, %5, %cst_4 [1] : vector<8x128xf32> to vector<8xf32>
    %7 = vector.shape_cast %6 : vector<8xf32> to vector<8x1xf32>
    %8 = vector.shape_cast %7 : vector<8x1xf32> to vector<1x8x1xf32>
    %c0_5 = arith.constant 0 : index
    %c0_6 = arith.constant 0 : index
    %c0_7 = arith.constant 0 : index
    %9 = vector.load %arg4[%c0_5, %c0_6, %c0_7] : memref<1x8x1xf32, #tpu.memory_space<vmem>>, vector<1x8x1xf32>
    tpu.vector_store %arg4[%c0_5, %c0_6, %c0_7], %8 {strides = array<i32>} : memref<1x8x1xf32, #tpu.memory_space<vmem>>, vector<1x8x1xf32>,
    return
  }
  func.func @transform_0(%arg0: i32, %arg1: i32) -> (i32, i32, i32) {
    %c0_i32 = arith.constant 0 : i32
    %c0_i32_0 = arith.constant 0 : i32
    return %arg1, %arg0, %c0_i32 : i32, i32, i32
  }
  func.func @transform_1(%arg0: i32, %arg1: i32) -> (i32, i32) {
    %c0_i32 = arith.constant 0 : i32
    %c0_i32_0 = arith.constant 0 : i32
    return %arg0, %c0_i32 : i32, i32
  }
  func.func @transform_2(%arg0: i32, %arg1: i32) -> (i32, i32, i32) {
    %c0_i32 = arith.constant 0 : i32
    %c0_i32_0 = arith.constant 0 : i32
    return %arg0, %arg1, %c0_i32 : i32, i32, i32
  }
}

</mosaic_0001>

<bundles_post_ra>
// kernel: tpu_custom_call.1
= control target key start
LH: loop header
LB: loop body
LE: loop exit
PB: predicated region body
PF: predicated region fallthrough
CT: control target
= control target key end

     0   :  { %7 = vsyncpa [#allocation3], 0  ;;  %s4339_s0 = inlined_call_operand.hbm [shape: f32[8,1176,128], index: 0, kind: input, shape index: {}]   ;;  %s4340_s1 = inlined_call_operand.hbm [shape: f32[1176,128], index: 1, kind: input, shape index: {}]   ;;  %s4341_s2 = inlined_call_operand.vmem [shape: f32[3,8,1], index: 2, kind: output, shape index: {}]  }
   0x1   :  { %9 = vsyncpa [#allocation3 + $0x1], 0 }
   0x2   :  { %10 = vsyncpa [#allocation5], 0 }
   0x3   :  { %12 = vsyncpa [#allocation5 + $0x1], 0  ;;  %s1896_s9 = smov 0   ;;  %s1898_s10 = smov 0  }
   0x4   :  { %s1900_s11 = smov 0   ;;  %s1902_s12 = smov 0  }
   0x5   :  { %s1904_s13 = smov 0   ;;  %s1906_s14 = smov 0  }
   0x6 LB: > { %s1656_s15 = sadd.s32 4294967295, %s1870_s14   ;;  %s30_s16 = sadd.s32 1, %s1866_s13  ;;  %s1870_s14 = sphi %s1906_s14, %s18_s14   ;;  %s1866_s13 = sphi %s1904_s13, %s5329_s13   ;;  %s1862_s12 = sphi %s1902_s12, %s5328_s12   ;;  %s1858_s11 = sphi %s1900_s11, %s5327_s11   ;;  %s1854_s10 = sphi %s1898_s10, %s5326_s10   ;;  %s1850_s9 = sphi %s1896_s9, %s5325_s9  }
   0x7   : > { %p32_p0 = scmp.ge.s32.totalorder %s30_s16, 3  ;;  %s39_s17 = sadd.s32 1, %s1858_s11 }
   0x8   : > { %p46_p1 = scmp.ne.s32.totalorder %s1858_s11, %s1854_s10  ;;  %p47_p2 = scmp.eq.s32.totalorder %s1870_s14, 0 }
   0x9   : > { %s5331_s16 = smov (%p32_p0, %s30_s16), 0  ;;  %p52_p4 = scmp.ne.s32.totalorder %s1854_s10, %s1850_s9 }
   0xa   : > { %p1932_p3 = por %p47_p2, %p46_p1  ;;  %s35_s19 = ssub.s32 %s1866_s13, %s5331_s16 }
   0xb   : > { %p53_p5 = scmp.eq.s32.totalorder %s1656_s15, 0  ;;  %p37_p6 = scmp.eq.s32.totalorder %s35_s19, 0 }
   0xc   : > { %p1659_p8 = scmp.ge.s32.totalorder %s1870_s14, 3 }
   0xd   : > { %p1939_p7 = por %p53_p5, %p52_p4 }
   0xe   : > { %s1944_s21 = scalar_select %p37_p6, %s1858_s11, %s39_s17  }
   0xf   : > { %126 = sbr.rel (%p1659_p8) target bundleno = 48 (0x30), region = 16 }
  0x14   : > { %s1948_s22 = sand.u32 1, %s1858_s11   ;;  %s1668_s23 = smul.u32 6272, %s1866_s13 }
  0x15   : > { %s1670_s24 = smul.u32 3136, %s1948_s22  ;;  %s1872_s25 = smov 18816  }
  0x16   : > { %1675 = sst [smem:[#allocation7]] (%p1932_p3), %s1872_s25  ;;  %s143_s29 = scalar_lea.hbm %s4339_s0, %s1668_s23 }
  0x17   : > { %s1674_s26 = scalar_select %p1932_p3, [#allocation0], [#allocation8] }
  0x18   : > { %s134_s3 = scalar_lea.vmem [#allocation2], %s1670_s24  ;;  %s1873_s5 = smov 6272  }
  0x19   : > { %s148_s30 = sld [smem:[%s1674_s26]]   ;;  %s156_s4 = sshll.u32 %s134_s3, 4  ;;  %s157_s4 = int_to_ptr.vmem [resolvable:$true] %s156_s4 }
  0x1a   : > { %1676 = sst [smem:[#allocation7 + $0x1]] (%p1932_p3), %s1873_s5  ;;  %s1874_s6 = smov 49  }
  0x1b   : > { %1677 = sst [smem:[#allocation7 + $0x2]] (%p1932_p3), %s1874_s6  ;;  %s1875_s7 = smov 128  }
  0x1c   : > { %1678 = sst [smem:[#allocation7 + $0x3]] (%p1932_p3), %s1875_s7  ;;  %s1876_s8 = smov 8  }
  0x1d   : > { %1679 = sst [smem:[#allocation7 + $0x4]] (%p1932_p3), %s1875_s7  ;;  %s131_s17 = scalar_lea.sflag [#allocation3], %s1948_s22 }
  0x1e   : > { %1680 = sst [smem:[#allocation7 + $0x5]] (%p1932_p3), %s1876_s8  ;;  %s1877_s19 = smov 131072  }
  0x1f   : > { %s1661_s9 = sshll.u32 %s148_s30, 26  ;;  %s1671_s24 = smul.u32 392, %s1948_s22 }
  0x20   : > { %s1662_s15 = sadd.s32 134217728, %s1661_s9  ;;  %s189_s27 = scalar_lea.hbm %s4340_s1, %s1668_s23 }
  0x21   : > { %1681 = dma.general (%p1932_p3), %s143_s29, 50176, %s157_s4, %s131_s17, %s1877_s19, [#allocation7], %s1662_s15, 0  }
  0x22   : > { %s183_s28 = scalar_lea.vmem [#allocation4], %s1671_s24  ;;  %s180_s5 = scalar_lea.sflag [#allocation5], %s1948_s22 }
  0x23   : > { %s190_s3 = sshll.u32 %s183_s28, 4  ;;  %s1878_s30 = smov [#allocation4]   ;;  %s191_s3 = int_to_ptr.vmem [resolvable:$true] %s190_s3 }
  0x24   : > { %s1802_s6 = scalar_lea.vmem %s191_s3, 6272  ;;  %s1806_s7 = sshll.u32 %s1878_s30, 4  ;;  %s1807_s7 = int_to_ptr.vmem [resolvable:$false] %s1806_s7 }
  0x25   : > { %p1803_p9 = scmp.ne.s32.totalorder %s191_s3, %s1802_s6  ;;  %s1808_s29 = scalar_lea.vmem %s1807_s7, 12544 }
  0x26   : > { %p1809_p12 = scmp.lt.s32.totalorder %s191_s3, %s1807_s7  ;;  %p1810_p13 = scmp.lt.s32.totalorder %s1808_s29, %s1802_s6 }
  0x27   : > { %p1804_p10 = pnand %p1803_p9, %p1932_p3 }
  0x28   : > { %p1811_p0 = por %p1810_p13, %p1809_p12 }
  0x29   : > { %p1805_p11 = pneg %p1804_p10 }
  0x2b   : > { %p1812_p1 = pnand %p1811_p0, %p1805_p11 }
  0x2d   : > { %1815 = shalt.err (!%p1812_p1)
}
  0x2e   : > { %s1879_s4 = smov 128   ;;  %s1880_s23 = smov 8  }
  0x2f   : > { %1682 = dma.hbm_to_vmem [thread:$0]  (%p1932_p3), %s189_s27, 6272, %s191_s3, %s180_s5, %s1879_s4, %s1879_s4, %s1880_s23  }
  0x30 PF: > { %p1664_p2 = scmp.ge.s32.totalorder %s1870_s14, 1  ;;  %p198_p4 = scmp.lt.s32.totalorder %s1870_s14, 4 }
  0x32   : > { %p199_p5 = pnand %p1664_p2, %p198_p4 }
  0x34   : > { %202 = sbr.rel (%p199_p5) target bundleno = 605 (0x25d), region = 28 }
  0x39   : > { %s204_s22 = sand.u32 1, %s1854_s10  }
  0x3a   : > { %s1672_s8 = smul.u32 3136, %s204_s22  ;;  %s205_s9 = scalar_lea.sflag [#allocation3], %s204_s22 }
  0x3c   : > { %s1984_s15 = scalar_lea.vmem [#allocation2], %s1672_s8 }
  0x3d   : > { %1841 = dma.done.wait (%p1939_p7), %s205_s9, 50176  }
  0x3e   : > { %1843 = vsyncadd (%p1939_p7), %s205_s9, 4294917120  ;;  %s1673_s18 = smul.u32 392, %s204_s22  ;;  %s214_s17 = scalar_lea.sflag [#allocation5], %s204_s22 }
  0x40   : > { %s1990_s19 = scalar_lea.vmem [#allocation4], %s1673_s18 }
  0x41   : > { %1845 = dma.done.wait (%p1939_p7), %s214_s17, 6272  }
  0x42   : > { %1847 = vsyncadd (%p1939_p7), %s214_s17, 4294961024  ;;  %v255_v0 = vld [vmem:[%s1984_s15] sm:$0xff]  ;;  %v256_v1 = vld [vmem:[%s1984_s15 + $0x8] sm:$0xff]  ;;  %vm1528_vm0 = vcmask 1041409   ;;  %vm1530_vm1 = vcmask 1042434   ;;  %vm1532_vm2 = vcmask 1043459  }
  0x43   : > { %v257_v2 = vld [vmem:[%s1984_s15 + $0x10] sm:$0xff]  ;;  %v258_v3 = vld [vmem:[%s1984_s15 + $0x18] sm:$0xff]  ;;  %v259_v4 = vld [vmem:[%s1984_s15 + $0x20] sm:$0xff]  ;;  %vm1534_vm3 = vcmask 1044484   ;;  %vm1536_vm4 = vcmask 1045509   ;;  %vm1538_vm5 = vcmask 1046534  }
  0x44   : > { %v260_v5 = vld [vmem:[%s1984_s15 + $0x28] sm:$0xff]  ;;  %v261_v6 = vld [vmem:[%s1984_s15 + $0x30] sm:$0xff]  ;;  %v402_v9 = vld [vmem:[%s1984_s15 + $0x498] sm:$0xff]  ;;  %vm1540_vm6 = vcmask 1047559   ;;  %p248_p3 = scmp.lt.s32.totalorder %s1862_s12, 2  ;;  %vm1545_vm7 = vcmask 7168  }
  0x45   : > { %v304_v7 = vld [vmem:[%s1984_s15 + $0x188] sm:$0xff]  ;;  %v353_v8 = vld [vmem:[%s1984_s15 + $0x310] sm:$0xff]  ;;  %v262_v10 = vld [vmem:[%s1984_s15 + $0x38] sm:$0xff] }
  0x46   : > { %v263_v11 = vld [vmem:[%s1984_s15 + $0x40] sm:$0xff]  ;;  %v264_v12 = vld [vmem:[%s1984_s15 + $0x48] sm:$0xff]  ;;  %v305_v13 = vld [vmem:[%s1984_s15 + $0x190] sm:$0xff]  ;;  %s5333_s12 = smov (!%p248_p3, %s1862_s12), 2 }
  0x47   : > { %v306_v14 = vld [vmem:[%s1984_s15 + $0x198] sm:$0xff]  ;;  %v265_v15 = vld [vmem:[%s1984_s15 + $0x50] sm:$0xff]  ;;  %v267_v17 = vld [vmem:[%s1984_s15 + $0x60] sm:$0xff]  ;;  %s1665_s20 = sshll.u32 %s5333_s12, 3 }
  0x48   : > { %v266_v16 = vld [vmem:[%s1984_s15 + $0x58] sm:$0xff]  ;;  %v307_v18 = vld [vmem:[%s1984_s15 + $0x1a0] sm:$0xff]  ;;  %v308_v19 = vld [vmem:[%s1984_s15 + $0x1a8] sm:$0xff]  ;;  %s254_s26 = scalar_lea.vmem %s4341_s2, %s1665_s20 }
  0x49   : > { %v2017_v20 = vld [vmem:[%s1990_s19] sm:$0xff]  ;;  %v269_v22 = vld [vmem:[%s1984_s15 + $0x70] sm:$0xff]  ;;  %v270_v23 = vld [vmem:[%s1984_s15 + $0x78] sm:$0xff] }
  0x4a   : > { %4456 = vst [vmem:[#allocation11_spill] sm:$0xff] %v2017_v20  ;;  %v268_v21 = vld [vmem:[%s1984_s15 + $0x68] sm:$0xff]  ;;  %v309_v24 = vld [vmem:[%s1984_s15 + $0x1b0] sm:$0xff]  ;;  %v2030_v27 = vld [vmem:[%s1990_s19 + $0x18] sm:$0xff]  ;;  %v2033_v28 = vmul.f32 %v2017_v20, %v255_v0  ;;  %v2036_v29 = vmul.f32 %v2017_v20, %v304_v7  ;;  %v2039_v30 = vmul.f32 %v2017_v20, %v353_v8  ;;  %v2042_v31 = vmul.f32 %v2017_v20, %v402_v9 }
  0x4b   : > { %v2024_v25 = vld [vmem:[%s1990_s19 + $0x8] sm:$0xff]  ;;  %v2027_v26 = vld [vmem:[%s1990_s19 + $0x10] sm:$0xff]  ;;  %4459 = vst [vmem:[#allocation14_spill] sm:$0xff] %v2030_v27  ;;  %v271_v32 = vld [vmem:[%s1984_s15 + $0x80] sm:$0xff]  ;;  %v2064_v41 = vmul.f32 %v2030_v27, %v258_v3  ;;  %v2117_v0 = vmul.f32 %v2030_v27, %v307_v18 }
  0x4c   : > { %4457 = vst [vmem:[#allocation12_spill] sm:$0xff] %v2024_v25  ;;  %4458 = vst [vmem:[#allocation13_spill] sm:$0xff] %v2027_v26  ;;  %v272_v33 = vld [vmem:[%s1984_s15 + $0x88] sm:$0xff]  ;;  %v273_v34 = vld [vmem:[%s1984_s15 + $0x90] sm:$0xff]  ;;  %v2058_v39 = vmul.f32 %v2024_v25, %v256_v1  ;;  %v2061_v40 = vmul.f32 %v2027_v26, %v257_v2  ;;  %v2067_v42 = vmul.f32 %v2024_v25, %v305_v13 }
  0x4d   : > { %4460 = vst [vmem:[#allocation15_spill] sm:$0xff] %v2033_v28  ;;  %4461 = vst [vmem:[#allocation16_spill] sm:$0xff] %v2036_v29  ;;  %v310_v35 = vld [vmem:[%s1984_s15 + $0x1b8] sm:$0xff]  ;;  %v2049_v36 = vld [vmem:[%s1990_s19 + $0x20] sm:$0xff]  ;;  %v2092_v53 = vmul.f32 %v2027_v26, %v306_v14 }
  0x4e   : > { %4462 = vst [vmem:[#allocation17_spill] sm:$0xff] %v2039_v30  ;;  %4463 = vst [vmem:[#allocation18_spill] sm:$0xff] %v2042_v31  ;;  %v2052_v37 = vld [vmem:[%s1990_s19 + $0x28] sm:$0xff]  ;;  %v2055_v38 = vld [vmem:[%s1990_s19 + $0x30] sm:$0xff]  ;;  %v2083_v50 = vmul.f32 %v2049_v36, %v259_v4 }
  0x4f   : > { %4464 = vst [vmem:[#allocation19_spill] sm:$0xff] %v2049_v36  ;;  %4465 = vst [vmem:[#allocation20_spill] sm:$0xff] %v2052_v37  ;;  %v274_v43 = vld [vmem:[%s1984_s15 + $0x98] sm:$0xff]  ;;  %v275_v44 = vld [vmem:[%s1984_s15 + $0xa0] sm:$0xff]  ;;  %v2086_v51 = vmul.f32 %v2052_v37, %v260_v5  ;;  %v2089_v52 = vmul.f32 %v2055_v38, %v261_v6 }
  0x50   : > { %4466 = vst [vmem:[#allocation21_spill] sm:$0xff] %v2055_v38  ;;  %4467 = vst [vmem:[#allocation22_spill] sm:$0xff] %v2058_v39  ;;  %v276_v45 = vld [vmem:[%s1984_s15 + $0xa8] sm:$0xff]  ;;  %v311_v46 = vld [vmem:[%s1984_s15 + $0x1c0] sm:$0xff] }
  0x51   : > { %4468 = vst [vmem:[#allocation23_spill] sm:$0xff] %v2061_v40  ;;  %4469 = vst [vmem:[#allocation24_spill] sm:$0xff] %v2064_v41  ;;  %v2074_v47 = vld [vmem:[%s1990_s19 + $0x38] sm:$0xff]  ;;  %v2077_v48 = vld [vmem:[%s1990_s19 + $0x40] sm:$0xff] }
  0x52   : > { %4470 = vst [vmem:[#allocation25_spill] sm:$0xff] %v2067_v42  ;;  %4471 = vst [vmem:[#allocation26_spill] sm:$0xff] %v2074_v47  ;;  %v2080_v49 = vld [vmem:[%s1990_s19 + $0x48] sm:$0xff]  ;;  %v278_v55 = vld [vmem:[%s1984_s15 + $0xb8] sm:$0xff]  ;;  %v2108_v61 = vmul.f32 %v2074_v47, %v262_v10  ;;  %v2111_v62 = vmul.f32 %v2077_v48, %v263_v11  ;;  %v2142_v11 = vmul.f32 %v2049_v36, %v308_v19 }
  0x53   : > { %4472 = vst [vmem:[#allocation27_spill] sm:$0xff] %v2077_v48  ;;  %4473 = vst [vmem:[#allocation28_spill] sm:$0xff] %v2080_v49  ;;  %v277_v54 = vld [vmem:[%s1984_s15 + $0xb0] sm:$0xff]  ;;  %v279_v56 = vld [vmem:[%s1984_s15 + $0xc0] sm:$0xff]  ;;  %v2114_v63 = vmul.f32 %v2080_v49, %v264_v12 }
  0x54   : > { %4474 = vst [vmem:[#allocation29_spill] sm:$0xff] %v2083_v50  ;;  %4475 = vst [vmem:[#allocation30_spill] sm:$0xff] %v2086_v51  ;;  %v312_v57 = vld [vmem:[%s1984_s15 + $0x1c8] sm:$0xff]  ;;  %v2099_v58 = vld [vmem:[%s1990_s19 + $0x50] sm:$0xff] }
  0x55   : > { %4476 = vst [vmem:[#allocation31_spill] sm:$0xff] %v2089_v52  ;;  %4477 = vst [vmem:[#allocation32_spill] sm:$0xff] %v2092_v53  ;;  %v2102_v59 = vld [vmem:[%s1990_s19 + $0x58] sm:$0xff]  ;;  %v2105_v60 = vld [vmem:[%s1990_s19 + $0x60] sm:$0xff]  ;;  %v2133_v8 = vmul.f32 %v2099_v58, %v265_v15 }
  0x56   : > { %4478 = vst [vmem:[#allocation33_spill] sm:$0xff] %v2099_v58  ;;  %4479 = vst [vmem:[#allocation34_spill] sm:$0xff] %v2102_v59  ;;  %v280_v1 = vld [vmem:[%s1984_s15 + $0xc8] sm:$0xff]  ;;  %v281_v2 = vld [vmem:[%s1984_s15 + $0xd0] sm:$0xff]  ;;  %v2136_v9 = vmul.f32 %v2102_v59, %v266_v16  ;;  %v2139_v10 = vmul.f32 %v2105_v60, %v267_v17 }
  0x57   : > { %4480 = vst [vmem:[#allocation35_spill] sm:$0xff] %v2105_v60  ;;  %4481 = vst [vmem:[#allocation36_spill] sm:$0xff] %v2108_v61  ;;  %v282_v3 = vld [vmem:[%s1984_s15 + $0xd8] sm:$0xff]  ;;  %v313_v4 = vld [vmem:[%s1984_s15 + $0x1d0] sm:$0xff] }
  0x58   : > { %4482 = vst [vmem:[#allocation37_spill] sm:$0xff] %v2111_v62  ;;  %4483 = vst [vmem:[#allocation38_spill] sm:$0xff] %v2114_v63  ;;  %v2124_v5 = vld [vmem:[%s1990_s19 + $0x68] sm:$0xff]  ;;  %v2127_v6 = vld [vmem:[%s1990_s19 + $0x70] sm:$0xff] }
  0x59   : > { %4484 = vst [vmem:[#allocation39_spill] sm:$0xff] %v2117_v0  ;;  %4485 = vst [vmem:[#allocation40_spill] sm:$0xff] %v2124_v5  ;;  %v2130_v7 = vld [vmem:[%s1990_s19 + $0x78] sm:$0xff]  ;;  %v284_v13 = vld [vmem:[%s1984_s15 + $0xe8] sm:$0xff]  ;;  %v2158_v17 = vmul.f32 %v2124_v5, %v268_v21  ;;  %v2161_v19 = vmul.f32 %v2127_v6, %v269_v22 }
  0x5a   : > { %4486 = vst [vmem:[#allocation41_spill] sm:$0xff] %v2127_v6  ;;  %4487 = vst [vmem:[#allocation42_spill] sm:$0xff] %v2133_v8  ;;  %v283_v12 = vld [vmem:[%s1984_s15 + $0xe0] sm:$0xff]  ;;  %v285_v14 = vld [vmem:[%s1984_s15 + $0xf0] sm:$0xff] }
  0x5b   : > { %4488 = vst [vmem:[#allocation43_spill] sm:$0xff] %v2136_v9  ;;  %4489 = vst [vmem:[#allocation44_spill] sm:$0xff] %v2139_v10  ;;  %v314_v15 = vld [vmem:[%s1984_s15 + $0x1d8] sm:$0xff]  ;;  %v2149_v18 = vld [vmem:[%s1990_s19 + $0x80] sm:$0xff]  ;;  %v2164_v10 = vmul.f32 %v2130_v7, %v270_v23  ;;  %v2167_v9 = vmul.f32 %v2052_v37, %v309_v24 }
  0x5c   : > { %4490 = vst [vmem:[#allocation45_spill] sm:$0xff] %v2142_v11  ;;  %v2152_v8 = vld [vmem:[%s1990_s19 + $0x88] sm:$0xff]  ;;  %v2155_v16 = vld [vmem:[%s1990_s19 + $0x90] sm:$0xff]  ;;  %4491 = vst [vmem:[#allocation46_spill] sm:$0xff] %v2158_v17  ;;  %v2183_v23 = vmul.f32 %v2149_v18, %v271_v32 }
  0x5d   : > { %4492 = vst [vmem:[#allocation47_spill] sm:$0xff] %v2161_v19  ;;  %4493 = vst [vmem:[#allocation48_spill] sm:$0xff] %v2164_v10  ;;  %v286_v63 = vld [vmem:[%s1984_s15 + $0xf8] sm:$0xff]  ;;  %v287_v62 = vld [vmem:[%s1984_s15 + $0x100] sm:$0xff]  ;;  %v2186_v24 = vmul.f32 %v2152_v8, %v272_v33  ;;  %v2189_v10 = vmul.f32 %v2155_v16, %v273_v34  ;;  %v2192_v19 = vmul.f32 %v2055_v38, %v310_v35 }
  0x5e   : > { %4494 = vst [vmem:[#allocation49_spill] sm:$0xff] %v2167_v9  ;;  %v288_v61 = vld [vmem:[%s1984_s15 + $0x108] sm:$0xff]  ;;  %v315_v21 = vld [vmem:[%s1984_s15 + $0x1e0] sm:$0xff]  ;;  %4495 = vst [vmem:[#allocation50_spill] sm:$0xff] %v2183_v23 }
  0x5f   : > { %v2174_v17 = vld [vmem:[%s1990_s19 + $0x98] sm:$0xff]  ;;  %v2177_v52 = vld [vmem:[%s1990_s19 + $0xa0] sm:$0xff]  ;;  %v2180_v22 = vld [vmem:[%s1990_s19 + $0xa8] sm:$0xff]  ;;  %4496 = vst [vmem:[#allocation51_spill] sm:$0xff] %v2186_v24  ;;  %v2217_v24 = vmul.f32 %v2074_v47, %v311_v46 }
  0x60   : > { %4497 = vst [vmem:[#allocation52_spill] sm:$0xff] %v2189_v10  ;;  %4498 = vst [vmem:[#allocation53_spill] sm:$0xff] %v2192_v19  ;;  %v289_v9 = vld [vmem:[%s1984_s15 + $0x110] sm:$0xff]  ;;  %v290_v51 = vld [vmem:[%s1984_s15 + $0x118] sm:$0xff]  ;;  %v2208_v34 = vmul.f32 %v2174_v17, %v274_v43  ;;  %v2211_v35 = vmul.f32 %v2177_v52, %v275_v44  ;;  %v2214_v10 = vmul.f32 %v2180_v22, %v276_v45 }
  0x61   : > { %v291_v11 = vld [vmem:[%s1984_s15 + $0x120] sm:$0xff]  ;;  %v316_v32 = vld [vmem:[%s1984_s15 + $0x1e8] sm:$0xff]  ;;  %v2199_v23 = vld [vmem:[%s1990_s19 + $0xb0] sm:$0xff]  ;;  %4502 = vst [vmem:[#allocation57_spill] sm:$0xff] %v2217_v24 }
  0x62   : > { %v2202_v50 = vld [vmem:[%s1990_s19 + $0xb8] sm:$0xff]  ;;  %v2205_v33 = vld [vmem:[%s1990_s19 + $0xc0] sm:$0xff]  ;;  %4499 = vst [vmem:[#allocation54_spill] sm:$0xff] %v2208_v34  ;;  %4500 = vst [vmem:[#allocation55_spill] sm:$0xff] %v2211_v35  ;;  %v2233_v45 = vmul.f32 %v2199_v23, %v277_v54  ;;  %v2242_v35 = vmul.f32 %v2077_v48, %v312_v57 }
  0x63   : > { %4501 = vst [vmem:[#allocation56_spill] sm:$0xff] %v2214_v10  ;;  %v292_v19 = vld [vmem:[%s1984_s15 + $0x128] sm:$0xff]  ;;  %v293_v0 = vld [vmem:[%s1984_s15 + $0x130] sm:$0xff]  ;;  %v294_v41 = vld [vmem:[%s1984_s15 + $0x138] sm:$0xff]  ;;  %v2236_v46 = vmul.f32 %v2202_v50, %v278_v55  ;;  %v2239_v10 = vmul.f32 %v2205_v33, %v279_v56 }
  0x64   : > { %v317_v43 = vld [vmem:[%s1984_s15 + $0x1f0] sm:$0xff]  ;;  %v2230_v44 = vld [vmem:[%s1990_s19 + $0xd8] sm:$0xff]  ;;  %4503 = vst [vmem:[#allocation58_spill] sm:$0xff] %v2233_v45  ;;  %4506 = vst [vmem:[#allocation61_spill] sm:$0xff] %v2242_v35 }
  0x65   : > { %v2224_v34 = vld [vmem:[%s1990_s19 + $0xc8] sm:$0xff]  ;;  %v2227_v53 = vld [vmem:[%s1990_s19 + $0xd0] sm:$0xff]  ;;  %4504 = vst [vmem:[#allocation59_spill] sm:$0xff] %v2236_v46  ;;  %4505 = vst [vmem:[#allocation60_spill] sm:$0xff] %v2239_v10  ;;  %v2264_v10 = vmul.f32 %v2230_v44, %v282_v3  ;;  %v2267_v46 = vmul.f32 %v2080_v49, %v313_v4 }
  0x66   : > { %v295_v24 = vld [vmem:[%s1984_s15 + $0x140] sm:$0xff]  ;;  %v296_v40 = vld [vmem:[%s1984_s15 + $0x148] sm:$0xff]  ;;  %v297_v31 = vld [vmem:[%s1984_s15 + $0x150] sm:$0xff]  ;;  %v2258_v56 = vmul.f32 %v2224_v34, %v280_v1  ;;  %v2261_v57 = vmul.f32 %v2227_v53, %v281_v2 }
  0x67   : > { %v318_v54 = vld [vmem:[%s1984_s15 + $0x1f8] sm:$0xff]  ;;  %v2249_v45 = vld [vmem:[%s1990_s19 + $0xe0] sm:$0xff]  ;;  %v2252_v30 = vld [vmem:[%s1990_s19 + $0xe8] sm:$0xff]  ;;  %4510 = vst [vmem:[#allocation65_spill] sm:$0xff] %v2264_v10 }
  0x68   : > { %4507 = vst [vmem:[#allocation62_spill] sm:$0xff] %v2249_v45  ;;  %v2255_v55 = vld [vmem:[%s1990_s19 + $0xf0] sm:$0xff]  ;;  %4508 = vst [vmem:[#allocation63_spill] sm:$0xff] %v2258_v56  ;;  %v299_v42 = vld [vmem:[%s1984_s15 + $0x160] sm:$0xff]  ;;  %v2283_v3 = vmul.f32 %v2249_v45, %v283_v12  ;;  %v2286_v4 = vmul.f32 %v2252_v30, %v284_v13 }
  0x69   : > { %4509 = vst [vmem:[#allocation64_spill] sm:$0xff] %v2261_v57  ;;  %4511 = vst [vmem:[#allocation66_spill] sm:$0xff] %v2267_v46  ;;  %v298_v35 = vld [vmem:[%s1984_s15 + $0x158] sm:$0xff]  ;;  %v300_v29 = vld [vmem:[%s1984_s15 + $0x168] sm:$0xff]  ;;  %v2289_v10 = vmul.f32 %v2255_v55, %v285_v14  ;;  %v2292_v57 = vmul.f32 %v2099_v58, %v314_v15 }
  0x6a   : > { %v319_v1 = vld [vmem:[%s1984_s15 + $0x200] sm:$0xff]  ;;  %v2280_v2 = vld [vmem:[%s1990_s19 + $0x108] sm:$0xff]  ;;  %4513 = vst [vmem:[#allocation68_spill] sm:$0xff] %v2283_v3  ;;  %4514 = vst [vmem:[#allocation69_spill] sm:$0xff] %v2286_v4  ;;  %v2317_v4 = vmul.f32 %v2102_v59, %v315_v21 }
  0x6b   : > { %v2274_v56 = vld [vmem:[%s1990_s19 + $0xf8] sm:$0xff]  ;;  %v2277_v39 = vld [vmem:[%s1990_s19 + $0x100] sm:$0xff]  ;;  %4515 = vst [vmem:[#allocation70_spill] sm:$0xff] %v2289_v10  ;;  %4516 = vst [vmem:[#allocation71_spill] sm:$0xff] %v2292_v57  ;;  %v2314_v10 = vmul.f32 %v2280_v2, %v288_v61 }
  0x6c   : > { %4512 = vst [vmem:[#allocation67_spill] sm:$0xff] %v2277_v39  ;;  %v301_v46 = vld [vmem:[%s1984_s15 + $0x170] sm:$0xff]  ;;  %v302_v28 = vld [vmem:[%s1984_s15 + $0x178] sm:$0xff]  ;;  %v303_v20 = vld [vmem:[%s1984_s15 + $0x180] sm:$0xff]  ;;  %v2308_v14 = vmul.f32 %v2274_v56, %v286_v63  ;;  %v2311_v15 = vmul.f32 %v2277_v39, %v287_v62 }
  0x6d   : > { %v320_v12 = vld [vmem:[%s1984_s15 + $0x208] sm:$0xff]  ;;  %v2299_v3 = vld [vmem:[%s1990_s19 + $0x110] sm:$0xff]  ;;  %v2302_v49 = vld [vmem:[%s1990_s19 + $0x118] sm:$0xff]  ;;  %4522 = vst [vmem:[#allocation77_spill] sm:$0xff] %v2314_v10 }
  0x6e   : > { %4517 = vst [vmem:[#allocation72_spill] sm:$0xff] %v2299_v3  ;;  %4518 = vst [vmem:[#allocation73_spill] sm:$0xff] %v2302_v49  ;;  %v2305_v13 = vld [vmem:[%s1990_s19 + $0x120] sm:$0xff]  ;;  %v321_v57 = vld [vmem:[%s1984_s15 + $0x210] sm:$0xff]  ;;  %v2333_v61 = vmul.f32 %v2299_v3, %v289_v9  ;;  %v2336_v21 = vmul.f32 %v2302_v49, %v290_v51 }
  0x6f   : > { %4519 = vst [vmem:[#allocation74_spill] sm:$0xff] %v2305_v13  ;;  %4520 = vst [vmem:[#allocation75_spill] sm:$0xff] %v2308_v14  ;;  %v322_v58 = vld [vmem:[%s1984_s15 + $0x218] sm:$0xff]  ;;  %v323_v48 = vld [vmem:[%s1984_s15 + $0x220] sm:$0xff]  ;;  %v2339_v10 = vmul.f32 %v2305_v13, %v291_v11 }
  0x70   : > { %4521 = vst [vmem:[#allocation76_spill] sm:$0xff] %v2311_v15  ;;  %4523 = vst [vmem:[#allocation78_spill] sm:$0xff] %v2317_v4  ;;  %v324_v63 = vld [vmem:[%s1984_s15 + $0x228] sm:$0xff]  ;;  %v2327_v47 = vld [vmem:[%s1990_s19 + $0x130] sm:$0xff]  ;;  %v2342_v15 = vmul.f32 %v2105_v60, %v316_v32 }
  0x71   : > { %v2324_v14 = vld [vmem:[%s1990_s19 + $0x128] sm:$0xff]  ;;  %4525 = vst [vmem:[#allocation80_spill] sm:$0xff] %v2327_v47  ;;  %v2330_v62 = vld [vmem:[%s1990_s19 + $0x138] sm:$0xff]  ;;  %4527 = vst [vmem:[#allocation82_spill] sm:$0xff] %v2333_v61  ;;  %v2361_v32 = vmul.f32 %v2327_v47, %v293_v0 }
  0x72   : > { %4524 = vst [vmem:[#allocation79_spill] sm:$0xff] %v2324_v14  ;;  %4526 = vst [vmem:[#allocation81_spill] sm:$0xff] %v2330_v62  ;;  %v325_v4 = vld [vmem:[%s1984_s15 + $0x230] sm:$0xff]  ;;  %v326_v59 = vld [vmem:[%s1984_s15 + $0x238] sm:$0xff]  ;;  %v2358_v11 = vmul.f32 %v2324_v14, %v292_v19 }
  0x73   : > { %4528 = vst [vmem:[#allocation83_spill] sm:$0xff] %v2336_v21  ;;  %4529 = vst [vmem:[#allocation84_spill] sm:$0xff] %v2339_v10  ;;  %v327_v38 = vld [vmem:[%s1984_s15 + $0x240] sm:$0xff]  ;;  %v328_v9 = vld [vmem:[%s1984_s15 + $0x248] sm:$0xff]  ;;  %v2364_v10 = vmul.f32 %v2330_v62, %v294_v41  ;;  %v2367_v21 = vmul.f32 %v2124_v5, %v317_v43 }
  0x74   : > { %4530 = vst [vmem:[#allocation85_spill] sm:$0xff] %v2342_v15  ;;  %v2349_v61 = vld [vmem:[%s1990_s19 + $0x140] sm:$0xff]  ;;  %v2352_v37 = vld [vmem:[%s1990_s19 + $0x148] sm:$0xff]  ;;  %v2355_v51 = vld [vmem:[%s1990_s19 + $0x150] sm:$0xff] }
  0x75   : > { %4531 = vst [vmem:[#allocation86_spill] sm:$0xff] %v2349_v61  ;;  %4532 = vst [vmem:[#allocation87_spill] sm:$0xff] %v2352_v37  ;;  %v329_v15 = vld [vmem:[%s1984_s15 + $0x250] sm:$0xff]  ;;  %v330_v60 = vld [vmem:[%s1984_s15 + $0x258] sm:$0xff]  ;;  %v2383_v41 = vmul.f32 %v2349_v61, %v295_v24  ;;  %v2386_v43 = vmul.f32 %v2352_v37, %v296_v40 }
  0x76   : > { %4533 = vst [vmem:[#allocation88_spill] sm:$0xff] %v2355_v51  ;;  %4534 = vst [vmem:[#allocation89_spill] sm:$0xff] %v2358_v11  ;;  %v331_v36 = vld [vmem:[%s1984_s15 + $0x260] sm:$0xff]  ;;  %v332_v19 = vld [vmem:[%s1984_s15 + $0x268] sm:$0xff] }
  0x77   : > { %4535 = vst [vmem:[#allocation90_spill] sm:$0xff] %v2361_v32  ;;  %4536 = vst [vmem:[#allocation91_spill] sm:$0xff] %v2364_v10  ;;  %v2374_v11 = vld [vmem:[%s1990_s19 + $0x158] sm:$0xff]  ;;  %v2377_v27 = vld [vmem:[%s1990_s19 + $0x160] sm:$0xff]  ;;  %v2389_v10 = vmul.f32 %v2355_v51, %v297_v31  ;;  %v2392_v32 = vmul.f32 %v2127_v6, %v318_v54 }
  0x78   : > { %4537 = vst [vmem:[#allocation92_spill] sm:$0xff] %v2367_v21  ;;  %4538 = vst [vmem:[#allocation93_spill] sm:$0xff] %v2374_v11  ;;  %v2380_v0 = vld [vmem:[%s1990_s19 + $0x168] sm:$0xff]  ;;  %v334_v5 = vld [vmem:[%s1984_s15 + $0x278] sm:$0xff]  ;;  %v2408_v31 = vmul.f32 %v2374_v11, %v298_v35  ;;  %v2411_v54 = vmul.f32 %v2377_v27, %v299_v42 }
  0x79   : > { %4539 = vst [vmem:[#allocation94_spill] sm:$0xff] %v2377_v27  ;;  %4540 = vst [vmem:[#allocation95_spill] sm:$0xff] %v2380_v0  ;;  %v333_v21 = vld [vmem:[%s1984_s15 + $0x270] sm:$0xff]  ;;  %v335_v26 = vld [vmem:[%s1984_s15 + $0x280] sm:$0xff] }
  0x7a   : > { %4541 = vst [vmem:[#allocation96_spill] sm:$0xff] %v2383_v41  ;;  %4542 = vst [vmem:[#allocation97_spill] sm:$0xff] %v2386_v43  ;;  %v336_v25 = vld [vmem:[%s1984_s15 + $0x288] sm:$0xff]  ;;  %v2399_v62 = vld [vmem:[%s1990_s19 + $0x170] sm:$0xff]  ;;  %v2417_v43 = vmul.f32 %v2130_v7, %v319_v1  ;;  %v2433_v1 = vmul.f32 %v2149_v18, %v320_v12  ;;  %v2449_v12 = vmul.f32 %v2177_v52, %v324_v63 }
  0x7b   : > { %4543 = vst [vmem:[#allocation98_spill] sm:$0xff] %v2389_v10  ;;  %4544 = vst [vmem:[#allocation99_spill] sm:$0xff] %v2392_v32  ;;  %v2402_v24 = vld [vmem:[%s1990_s19 + $0x178] sm:$0xff]  ;;  %v2405_v40 = vld [vmem:[%s1990_s19 + $0x180] sm:$0xff]  ;;  %v2414_v10 = vmul.f32 %v2380_v0, %v300_v29  ;;  %v2424_v35 = vmul.f32 %v2399_v62, %v301_v46  ;;  %v2440_v46 = vmul.f32 %v2152_v8, %v321_v57 }
  0x7c   : > { %4545 = vst [vmem:[#allocation100_spill] sm:$0xff] %v2399_v62  ;;  %4546 = vst [vmem:[#allocation101_spill] sm:$0xff] %v2402_v24  ;;  %v337_v41 = vld [vmem:[%s1984_s15 + $0x290] sm:$0xff]  ;;  %v338_v32 = vld [vmem:[%s1984_s15 + $0x298] sm:$0xff]  ;;  %v2427_v42 = vmul.f32 %v2402_v24, %v302_v28  ;;  %v2430_v29 = vmul.f32 %v2405_v40, %v303_v20  ;;  %v2443_v28 = vmul.f32 %v2155_v16, %v322_v58 }
  0x7d   : > { %4547 = vst [vmem:[#allocation102_spill] sm:$0xff] %v2405_v40  ;;  %4548 = vst [vmem:[#allocation103_spill] sm:$0xff] %v2408_v31  ;;  %v339_v6 = vld [vmem:[%s1984_s15 + $0x2a0] sm:$0xff]  ;;  %v340_v51 = vld [vmem:[%s1984_s15 + $0x2a8] sm:$0xff]  ;;  %v2446_v20 = vmul.f32 %v2174_v17, %v323_v48  ;;  %v2456_v57 = vmul.f32 %v2180_v22, %v325_v4  ;;  %v2459_v58 = vmul.f32 %v2199_v23, %v326_v59 }
  0x7e   : > { %4549 = vst [vmem:[#allocation104_spill] sm:$0xff] %v2411_v54  ;;  %4550 = vst [vmem:[#allocation105_spill] sm:$0xff] %v2414_v10  ;;  %v341_v10 = vld [vmem:[%s1984_s15 + $0x2b0] sm:$0xff]  ;;  %v342_v54 = vld [vmem:[%s1984_s15 + $0x2b8] sm:$0xff]  ;;  %v2462_v48 = vmul.f32 %v2202_v50, %v327_v38  ;;  %v2465_v63 = vmul.f32 %v2205_v33, %v328_v9  ;;  %v2472_v4 = vmul.f32 %v2224_v34, %v329_v15 }
  0x7f   : > { %4551 = vst [vmem:[#allocation106_spill] sm:$0xff] %v2417_v43  ;;  %4552 = vst [vmem:[#allocation107_spill] sm:$0xff] %v2424_v35  ;;  %v343_v31 = vld [vmem:[%s1984_s15 + $0x2c0] sm:$0xff]  ;;  %v344_v43 = vld [vmem:[%s1984_s15 + $0x2c8] sm:$0xff]  ;;  %v2475_v59 = vmul.f32 %v2227_v53, %v330_v60  ;;  %v2478_v38 = vmul.f32 %v2230_v44, %v331_v36  ;;  %v2481_v9 = vmul.f32 %v2249_v45, %v332_v19 }
  0x80   : > { %4553 = vst [vmem:[#allocation108_spill] sm:$0xff] %v2427_v42  ;;  %4554 = vst [vmem:[#allocation109_spill] sm:$0xff] %v2430_v29  ;;  %v345_v29 = vld [vmem:[%s1984_s15 + $0x2d0] sm:$0xff]  ;;  %v346_v42 = vld [vmem:[%s1984_s15 + $0x2d8] sm:$0xff]  ;;  %v2488_v15 = vmul.f32 %v2252_v30, %v333_v21  ;;  %v2491_v60 = vmul.f32 %v2255_v55, %v334_v5  ;;  %v2494_v36 = vmul.f32 %v2274_v56, %v335_v26 }
  0x81   : > { %4555 = vst [vmem:[#allocation110_spill] sm:$0xff] %v2433_v1  ;;  %4556 = vst [vmem:[#allocation111_spill] sm:$0xff] %v2440_v46  ;;  %v347_v35 = vld [vmem:[%s1984_s15 + $0x2e0] sm:$0xff]  ;;  %v348_v1 = vld [vmem:[%s1984_s15 + $0x2e8] sm:$0xff]  ;;  %v2497_v19 = vmul.f32 %v2277_v39, %v336_v25  ;;  %v2504_v21 = vmul.f32 %v2280_v2, %v337_v41  ;;  %v2507_v5 = vmul.f32 %v2299_v3, %v338_v32 }
  0x82   : > { %4557 = vst [vmem:[#allocation112_spill] sm:$0xff] %v2443_v28  ;;  %4558 = vst [vmem:[#allocation113_spill] sm:$0xff] %v2446_v20  ;;  %v350_v20 = vld [vmem:[%s1984_s15 + $0x2f8] sm:$0xff]  ;;  %v351_v28 = vld [vmem:[%s1984_s15 + $0x300] sm:$0xff]  ;;  %v2510_v26 = vmul.f32 %v2302_v49, %v339_v6  ;;  %v2513_v25 = vmul.f32 %v2305_v13, %v340_v51  ;;  %v2520_v41 = vmul.f32 %v2324_v14, %v341_v10 }
  0x83   : > { %4559 = vst [vmem:[#allocation114_spill] sm:$0xff] %v2449_v12  ;;  %4560 = vst [vmem:[#allocation115_spill] sm:$0xff] %v2456_v57  ;;  %v349_v12 = vld [vmem:[%s1984_s15 + $0x2f0] sm:$0xff]  ;;  %v352_v46 = vld [vmem:[%s1984_s15 + $0x308] sm:$0xff]  ;;  %v2523_v32 = vmul.f32 %v2327_v47, %v342_v54  ;;  %v2529_v51 = vmul.f32 %v2349_v61, %v344_v43  ;;  %v2536_v10 = vmul.f32 %v2352_v37, %v345_v29 }
  0x84   : > { %4561 = vst [vmem:[#allocation116_spill] sm:$0xff] %v2459_v58  ;;  %4562 = vst [vmem:[#allocation117_spill] sm:$0xff] %v2462_v48  ;;  %v355_v48 = vld [vmem:[%s1984_s15 + $0x320] sm:$0xff]  ;;  %v356_v58 = vld [vmem:[%s1984_s15 + $0x328] sm:$0xff]  ;;  %v2545_v43 = vmul.f32 %v2377_v27, %v348_v1  ;;  %v2552_v29 = vmul.f32 %v2380_v0, %v349_v12  ;;  %v2561_v1 = vmul.f32 %v2405_v40, %v352_v46 }
  0x85   : > { %4563 = vst [vmem:[#allocation118_spill] sm:$0xff] %v2465_v63  ;;  %4564 = vst [vmem:[#allocation119_spill] sm:$0xff] %v2472_v4  ;;  %v354_v63 = vld [vmem:[%s1984_s15 + $0x318] sm:$0xff]  ;;  %v357_v57 = vld [vmem:[%s1984_s15 + $0x330] sm:$0xff] }
  0x86   : > { %4565 = vst [vmem:[#allocation120_spill] sm:$0xff] %v2475_v59  ;;  %4566 = vst [vmem:[#allocation121_spill] sm:$0xff] %v2478_v38  ;;  %v359_v38 = vld [vmem:[%s1984_s15 + $0x340] sm:$0xff]  ;;  %v360_v59 = vld [vmem:[%s1984_s15 + $0x348] sm:$0xff] }
  0x87   : > { %4567 = vst [vmem:[#allocation122_spill] sm:$0xff] %v2481_v9  ;;  %4568 = vst [vmem:[#allocation123_spill] sm:$0xff] %v2488_v15  ;;  %v358_v9 = vld [vmem:[%s1984_s15 + $0x338] sm:$0xff]  ;;  %v361_v4 = vld [vmem:[%s1984_s15 + $0x350] sm:$0xff] }
  0x88   : > { %4569 = vst [vmem:[#allocation124_spill] sm:$0xff] %v2491_v60  ;;  %4570 = vst [vmem:[#allocation125_spill] sm:$0xff] %v2494_v36  ;;  %v363_v36 = vld [vmem:[%s1984_s15 + $0x360] sm:$0xff]  ;;  %v364_v60 = vld [vmem:[%s1984_s15 + $0x368] sm:$0xff] }
  0x89   : > { %4571 = vst [vmem:[#allocation126_spill] sm:$0xff] %v2497_v19  ;;  %4572 = vst [vmem:[#allocation127_spill] sm:$0xff] %v2504_v21  ;;  %v362_v19 = vld [vmem:[%s1984_s15 + $0x358] sm:$0xff]  ;;  %v365_v15 = vld [vmem:[%s1984_s15 + $0x370] sm:$0xff] }
  0x8a   : > { %4573 = vst [vmem:[#allocation128_spill] sm:$0xff] %v2507_v5  ;;  %4574 = vst [vmem:[#allocation129_spill] sm:$0xff] %v2510_v26  ;;  %v4578_v5 = vld [vmem:[#allocation81_spill] sm:$0xff]  ;;  %v368_v21 = vld [vmem:[%s1984_s15 + $0x388] sm:$0xff] }
  0x8b   : > { %4575 = vst [vmem:[#allocation130_spill] sm:$0xff] %v2513_v25  ;;  %4576 = vst [vmem:[#allocation131_spill] sm:$0xff] %v2520_v41  ;;  %v2526_v6 = vmul.f32 %v4578_v5, %v343_v31  ;;  %v366_v25 = vld [vmem:[%s1984_s15 + $0x378] sm:$0xff]  ;;  %v367_v26 = vld [vmem:[%s1984_s15 + $0x380] sm:$0xff]  ;;  %v2542_v31 = vmul.f32 %v2374_v11, %v347_v35  ;;  %v2558_v35 = vmul.f32 %v2402_v24, %v351_v28 }
  0x8c   : > { %4577 = vst [vmem:[#allocation132_spill] sm:$0xff] %v2523_v32  ;;  %4580 = vst [vmem:[#allocation134_spill] sm:$0xff] %v2529_v51  ;;  %v369_v13 = vld [vmem:[%s1984_s15 + $0x390] sm:$0xff]  ;;  %v4582_v41 = vld [vmem:[#allocation88_spill] sm:$0xff] }
  0x8d   : > { %4579 = vst [vmem:[#allocation133_spill] sm:$0xff] %v2526_v6  ;;  %4581 = vst [vmem:[#allocation135_spill] sm:$0xff] %v2536_v10  ;;  %v2539_v54 = vmul.f32 %v4582_v41, %v346_v42  ;;  %v370_v51 = vld [vmem:[%s1984_s15 + $0x398] sm:$0xff]  ;;  %v371_v6 = vld [vmem:[%s1984_s15 + $0x3a0] sm:$0xff]  ;;  %v2555_v42 = vmul.f32 %v2399_v62, %v350_v20 }
  0x8e   : > { %4584 = vst [vmem:[#allocation137_spill] sm:$0xff] %v2542_v31  ;;  %4585 = vst [vmem:[#allocation138_spill] sm:$0xff] %v2545_v43  ;;  %v372_v32 = vld [vmem:[%s1984_s15 + $0x3a8] sm:$0xff]  ;;  %v373_v61 = vld [vmem:[%s1984_s15 + $0x3b0] sm:$0xff] }
  0x8f   : > { %4583 = vst [vmem:[#allocation136_spill] sm:$0xff] %v2539_v54  ;;  %4586 = vst [vmem:[#allocation139_spill] sm:$0xff] %v2552_v29  ;;  %v374_v43 = vld [vmem:[%s1984_s15 + $0x3b8] sm:$0xff]  ;;  %v375_v31 = vld [vmem:[%s1984_s15 + $0x3c0] sm:$0xff] }
  0x90   : > { %4587 = vst [vmem:[#allocation140_spill] sm:$0xff] %v2555_v42  ;;  %4588 = vst [vmem:[#allocation141_spill] sm:$0xff] %v2558_v35  ;;  %v376_v54 = vld [vmem:[%s1984_s15 + $0x3c8] sm:$0xff]  ;;  %v377_v10 = vld [vmem:[%s1984_s15 + $0x3d0] sm:$0xff] }
  0x91   : > { %4589 = vst [vmem:[#allocation142_spill] sm:$0xff] %v2561_v1  ;;  %v4590_v27 = vld [vmem:[#allocation12_spill] sm:$0xff]  ;;  %v4592_v29 = vld [vmem:[#allocation13_spill] sm:$0xff]  ;;  %v4594_v42 = vld [vmem:[#allocation14_spill] sm:$0xff] }
  0x92   : > { %v2568_v12 = vmul.f32 %v4590_v27, %v354_v63  ;;  %v2571_v20 = vmul.f32 %v4592_v29, %v355_v48  ;;  %v2574_v28 = vmul.f32 %v4594_v42, %v356_v58  ;;  %v4596_v35 = vld [vmem:[#allocation19_spill] sm:$0xff]  ;;  %v378_v1 = vld [vmem:[%s1984_s15 + $0x3d8] sm:$0xff]  ;;  %v379_v40 = vld [vmem:[%s1984_s15 + $0x3e0] sm:$0xff] }
  0x93   : > { %v2577_v46 = vmul.f32 %v4596_v35, %v357_v57  ;;  %v380_v24 = vld [vmem:[%s1984_s15 + $0x3e8] sm:$0xff]  ;;  %v381_v62 = vld [vmem:[%s1984_s15 + $0x3f0] sm:$0xff]  ;;  %v4598_v0 = vld [vmem:[#allocation20_spill] sm:$0xff] }
  0x94   : > { %4591 = vst [vmem:[#allocation143_spill] sm:$0xff] %v2568_v12  ;;  %4593 = vst [vmem:[#allocation144_spill] sm:$0xff] %v2571_v20  ;;  %v2584_v63 = vmul.f32 %v4598_v0, %v358_v9  ;;  %v4600_v12 = vld [vmem:[#allocation21_spill] sm:$0xff]  ;;  %v4602_v20 = vld [vmem:[#allocation26_spill] sm:$0xff] }
  0x95   : > { %4595 = vst [vmem:[#allocation145_spill] sm:$0xff] %v2574_v28  ;;  %4597 = vst [vmem:[#allocation146_spill] sm:$0xff] %v2577_v46  ;;  %v2587_v48 = vmul.f32 %v4600_v12, %v359_v38  ;;  %v2590_v58 = vmul.f32 %v4602_v20, %v360_v59  ;;  %v4604_v28 = vld [vmem:[#allocation27_spill] sm:$0xff]  ;;  %v382_v46 = vld [vmem:[%s1984_s15 + $0x3f8] sm:$0xff] }
  0x96   : > { %4599 = vst [vmem:[#allocation147_spill] sm:$0xff] %v2584_v63  ;;  %v2593_v57 = vmul.f32 %v4604_v28, %v361_v4  ;;  %v383_v35 = vld [vmem:[%s1984_s15 + $0x400] sm:$0xff]  ;;  %v384_v42 = vld [vmem:[%s1984_s15 + $0x408] sm:$0xff]  ;;  %v385_v29 = vld [vmem:[%s1984_s15 + $0x410] sm:$0xff] }
  0x97   : > { %4601 = vst [vmem:[#allocation148_spill] sm:$0xff] %v2587_v48  ;;  %4603 = vst [vmem:[#allocation149_spill] sm:$0xff] %v2590_v58  ;;  %v4606_v27 = vld [vmem:[#allocation28_spill] sm:$0xff]  ;;  %v4608_v63 = vld [vmem:[#allocation33_spill] sm:$0xff] }
  0x98   : > { %4605 = vst [vmem:[#allocation150_spill] sm:$0xff] %v2593_v57  ;;  %v2600_v9 = vmul.f32 %v4606_v27, %v362_v19  ;;  %v2603_v38 = vmul.f32 %v4608_v63, %v363_v36  ;;  %v4610_v48 = vld [vmem:[#allocation34_spill] sm:$0xff]  ;;  %v4612_v58 = vld [vmem:[#allocation35_spill] sm:$0xff]  ;;  %v386_v57 = vld [vmem:[%s1984_s15 + $0x418] sm:$0xff] }
  0x99   : > { %v2606_v59 = vmul.f32 %v4610_v48, %v364_v60  ;;  %v2609_v4 = vmul.f32 %v4612_v58, %v365_v15  ;;  %v387_v28 = vld [vmem:[%s1984_s15 + $0x420] sm:$0xff]  ;;  %v388_v20 = vld [vmem:[%s1984_s15 + $0x428] sm:$0xff]  ;;  %v389_v12 = vld [vmem:[%s1984_s15 + $0x430] sm:$0xff]  ;;  %v2622_v60 = vmul.f32 %v2130_v7, %v368_v21  ;;  %v2625_v15 = vmul.f32 %v2149_v18, %v369_v13 }
  0x9a   : > { %4607 = vst [vmem:[#allocation28_spill] sm:$0xff] %v2600_v9  ;;  %4609 = vst [vmem:[#allocation33_spill] sm:$0xff] %v2603_v38  ;;  %v4614_v0 = vld [vmem:[#allocation40_spill] sm:$0xff]  ;;  %v4616_v9 = vld [vmem:[#allocation41_spill] sm:$0xff]  ;;  %v2638_v21 = vmul.f32 %v2174_v17, %v372_v32  ;;  %v2641_v13 = vmul.f32 %v2177_v52, %v373_v61  ;;  %v2654_v32 = vmul.f32 %v2202_v50, %v376_v54 }
  0x9b   : > { %4611 = vst [vmem:[#allocation34_spill] sm:$0xff] %v2606_v59  ;;  %4613 = vst [vmem:[#allocation151_spill] sm:$0xff] %v2609_v4  ;;  %v2616_v19 = vmul.f32 %v4614_v0, %v366_v25  ;;  %v2619_v36 = vmul.f32 %v4616_v9, %v367_v26  ;;  %v390_v4 = vld [vmem:[%s1984_s15 + $0x438] sm:$0xff]  ;;  %v391_v59 = vld [vmem:[%s1984_s15 + $0x440] sm:$0xff]  ;;  %v2632_v25 = vmul.f32 %v2152_v8, %v370_v51 }
  0x9c   : > { %4618 = vst [vmem:[#allocation152_spill] sm:$0xff] %v2622_v60  ;;  %4619 = vst [vmem:[#allocation153_spill] sm:$0xff] %v2625_v15  ;;  %v392_v38 = vld [vmem:[%s1984_s15 + $0x448] sm:$0xff]  ;;  %v393_v58 = vld [vmem:[%s1984_s15 + $0x450] sm:$0xff]  ;;  %v2635_v26 = vmul.f32 %v2155_v16, %v371_v6  ;;  %v2648_v51 = vmul.f32 %v2180_v22, %v374_v43  ;;  %v2651_v6 = vmul.f32 %v2199_v23, %v375_v31 }
  0x9d   : > { %4615 = vst [vmem:[#allocation40_spill] sm:$0xff] %v2616_v19  ;;  %4617 = vst [vmem:[#allocation41_spill] sm:$0xff] %v2619_v36  ;;  %v394_v15 = vld [vmem:[%s1984_s15 + $0x458] sm:$0xff]  ;;  %v395_v60 = vld [vmem:[%s1984_s15 + $0x460] sm:$0xff]  ;;  %v2657_v61 = vmul.f32 %v2205_v33, %v377_v10  ;;  %v2664_v43 = vmul.f32 %v2224_v34, %v378_v1  ;;  %v2667_v31 = vmul.f32 %v2227_v53, %v379_v40 }
  0x9e   : > { %4620 = vst [vmem:[#allocation154_spill] sm:$0xff] %v2632_v25  ;;  %4621 = vst [vmem:[#allocation155_spill] sm:$0xff] %v2635_v26  ;;  %v396_v36 = vld [vmem:[%s1984_s15 + $0x468] sm:$0xff]  ;;  %v397_v19 = vld [vmem:[%s1984_s15 + $0x470] sm:$0xff]  ;;  %v2670_v54 = vmul.f32 %v2230_v44, %v380_v24  ;;  %v2673_v10 = vmul.f32 %v2249_v45, %v381_v62  ;;  %v2680_v1 = vmul.f32 %v2252_v30, %v382_v46 }
  0x9f   : > { %4622 = vst [vmem:[#allocation156_spill] sm:$0xff] %v2638_v21  ;;  %4623 = vst [vmem:[#allocation157_spill] sm:$0xff] %v2641_v13  ;;  %v398_v13 = vld [vmem:[%s1984_s15 + $0x478] sm:$0xff]  ;;  %v399_v21 = vld [vmem:[%s1984_s15 + $0x480] sm:$0xff]  ;;  %v2683_v40 = vmul.f32 %v2255_v55, %v383_v35  ;;  %v2686_v24 = vmul.f32 %v2274_v56, %v384_v42  ;;  %v2689_v62 = vmul.f32 %v2277_v39, %v385_v29 }
  0xa0   : > { %4624 = vst [vmem:[#allocation158_spill] sm:$0xff] %v2648_v51  ;;  %4625 = vst [vmem:[#allocation159_spill] sm:$0xff] %v2651_v6  ;;  %v400_v26 = vld [vmem:[%s1984_s15 + $0x488] sm:$0xff]  ;;  %v401_v25 = vld [vmem:[%s1984_s15 + $0x490] sm:$0xff]  ;;  %v2696_v46 = vmul.f32 %v2280_v2, %v386_v57  ;;  %v2699_v35 = vmul.f32 %v2299_v3, %v387_v28  ;;  %v2702_v42 = vmul.f32 %v2302_v49, %v388_v20 }
  0xa1   : > { %4626 = vst [vmem:[#allocation160_spill] sm:$0xff] %v2654_v32  ;;  %4627 = vst [vmem:[#allocation161_spill] sm:$0xff] %v2657_v61  ;;  %v403_v61 = vld [vmem:[%s1984_s15 + $0x4a0] sm:$0xff]  ;;  %v404_v32 = vld [vmem:[%s1984_s15 + $0x4a8] sm:$0xff]  ;;  %v2712_v57 = vmul.f32 %v2324_v14, %v390_v4  ;;  %v2715_v28 = vmul.f32 %v2327_v47, %v391_v59  ;;  %v2718_v20 = vmul.f32 %v4578_v5, %v392_v38 }
  0xa2   : > { %4628 = vst [vmem:[#allocation162_spill] sm:$0xff] %v2664_v43  ;;  %4629 = vst [vmem:[#allocation163_spill] sm:$0xff] %v2667_v31  ;;  %v405_v6 = vld [vmem:[%s1984_s15 + $0x4b0] sm:$0xff]  ;;  %v406_v51 = vld [vmem:[%s1984_s15 + $0x4b8] sm:$0xff]  ;;  %v2728_v4 = vmul.f32 %v2352_v37, %v394_v15  ;;  %v2731_v59 = vmul.f32 %v4582_v41, %v395_v60  ;;  %v2734_v38 = vmul.f32 %v2374_v11, %v396_v36 }
  0xa3   : > { %4630 = vst [vmem:[#allocation164_spill] sm:$0xff] %v2670_v54  ;;  %4631 = vst [vmem:[#allocation165_spill] sm:$0xff] %v2673_v10  ;;  %v407_v10 = vld [vmem:[%s1984_s15 + $0x4c0] sm:$0xff]  ;;  %v408_v54 = vld [vmem:[%s1984_s15 + $0x4c8] sm:$0xff] }
  0xa4   : > { %4632 = vst [vmem:[#allocation166_spill] sm:$0xff] %v2680_v1  ;;  %4633 = vst [vmem:[#allocation167_spill] sm:$0xff] %v2683_v40  ;;  %v409_v31 = vld [vmem:[%s1984_s15 + $0x4d0] sm:$0xff]  ;;  %v410_v43 = vld [vmem:[%s1984_s15 + $0x4d8] sm:$0xff] }
  0xa5   : > { %4634 = vst [vmem:[#allocation168_spill] sm:$0xff] %v2686_v24  ;;  %4635 = vst [vmem:[#allocation169_spill] sm:$0xff] %v2689_v62  ;;  %v4639_v24 = vld [vmem:[#allocation74_spill] sm:$0xff]  ;;  %v411_v62 = vld [vmem:[%s1984_s15 + $0x4e0] sm:$0xff] }
  0xa6   : > { %4636 = vst [vmem:[#allocation170_spill] sm:$0xff] %v2696_v46  ;;  %4637 = vst [vmem:[#allocation171_spill] sm:$0xff] %v2699_v35  ;;  %v2705_v29 = vmul.f32 %v4639_v24, %v389_v12  ;;  %v412_v40 = vld [vmem:[%s1984_s15 + $0x4e8] sm:$0xff]  ;;  %v413_v1 = vld [vmem:[%s1984_s15 + $0x4f0] sm:$0xff] }
  0xa7   : > { %4638 = vst [vmem:[#allocation172_spill] sm:$0xff] %v2702_v42  ;;  %v414_v39 = vld [vmem:[%s1984_s15 + $0x4f8] sm:$0xff]  ;;  %4641 = vst [vmem:[#allocation174_spill] sm:$0xff] %v2712_v57  ;;  %v4644_v42 = vld [vmem:[#allocation86_spill] sm:$0xff] }
  0xa8   : > { %4640 = vst [vmem:[#allocation173_spill] sm:$0xff] %v2705_v29  ;;  %4642 = vst [vmem:[#allocation175_spill] sm:$0xff] %v2715_v28  ;;  %v2721_v12 = vmul.f32 %v4644_v42, %v393_v58  ;;  %v415_v29 = vld [vmem:[%s1984_s15 + $0x500] sm:$0xff]  ;;  %v416_v35 = vld [vmem:[%s1984_s15 + $0x508] sm:$0xff] }
  0xa9   : > { %4643 = vst [vmem:[#allocation176_spill] sm:$0xff] %v2718_v20  ;;  %v417_v46 = vld [vmem:[%s1984_s15 + $0x510] sm:$0xff]  ;;  %v418_v24 = vld [vmem:[%s1984_s15 + $0x518] sm:$0xff]  ;;  %4646 = vst [vmem:[#allocation178_spill] sm:$0xff] %v2728_v4 }
  0xaa   : > { %4645 = vst [vmem:[#allocation177_spill] sm:$0xff] %v2721_v12  ;;  %4647 = vst [vmem:[#allocation179_spill] sm:$0xff] %v2731_v59  ;;  %v4649_v20 = vld [vmem:[#allocation94_spill] sm:$0xff]  ;;  %v419_v12 = vld [vmem:[%s1984_s15 + $0x520] sm:$0xff] }
  0xab   : > { %4648 = vst [vmem:[#allocation180_spill] sm:$0xff] %v2734_v38  ;;  %v2737_v58 = vmul.f32 %v4649_v20, %v397_v19  ;;  %v420_v28 = vld [vmem:[%s1984_s15 + $0x528] sm:$0xff]  ;;  %v421_v57 = vld [vmem:[%s1984_s15 + $0x530] sm:$0xff]  ;;  %v422_v42 = vld [vmem:[%s1984_s15 + $0x538] sm:$0xff] }
  0xac   : > { %v4651_v5 = vld [vmem:[#allocation95_spill] sm:$0xff]  ;;  %v4653_v4 = vld [vmem:[#allocation100_spill] sm:$0xff]  ;;  %v4655_v59 = vld [vmem:[#allocation101_spill] sm:$0xff] }
  0xad   : > { %4650 = vst [vmem:[#allocation181_spill] sm:$0xff] %v2737_v58  ;;  %v2744_v15 = vmul.f32 %v4651_v5, %v398_v13  ;;  %v2747_v60 = vmul.f32 %v4653_v4, %v399_v21  ;;  %v2750_v36 = vmul.f32 %v4655_v59, %v400_v26  ;;  %v4657_v38 = vld [vmem:[#allocation102_spill] sm:$0xff]  ;;  %v423_v58 = vld [vmem:[%s1984_s15 + $0x540] sm:$0xff]  ;;  %v425_v11 = vld [vmem:[%s1984_s15 + $0x550] sm:$0xff] }
  0xae   : > { %v2753_v19 = vmul.f32 %v4657_v38, %v401_v25  ;;  %v424_v20 = vld [vmem:[%s1984_s15 + $0x548] sm:$0xff]  ;;  %v426_v41 = vld [vmem:[%s1984_s15 + $0x558] sm:$0xff]  ;;  %v429_v59 = vld [vmem:[%s1984_s15 + $0x570] sm:$0xff] }
  0xaf   : > { %4652 = vst [vmem:[#allocation182_spill] sm:$0xff] %v2744_v15  ;;  %4654 = vst [vmem:[#allocation183_spill] sm:$0xff] %v2747_v60  ;;  %v4659_v37 = vld [vmem:[#allocation12_spill] sm:$0xff]  ;;  %v4661_v15 = vld [vmem:[#allocation13_spill] sm:$0xff] }
  0xb0   : > { %4656 = vst [vmem:[#allocation184_spill] sm:$0xff] %v2750_v36  ;;  %4658 = vst [vmem:[#allocation185_spill] sm:$0xff] %v2753_v19  ;;  %v2760_v13 = vmul.f32 %v4659_v37, %v403_v61  ;;  %v2763_v21 = vmul.f32 %v4661_v15, %v404_v32  ;;  %v4663_v60 = vld [vmem:[#allocation14_spill] sm:$0xff]  ;;  %v4665_v36 = vld [vmem:[#allocation19_spill] sm:$0xff] }
  0xb1   : > { %v2766_v26 = vmul.f32 %v4663_v60, %v405_v6  ;;  %v2769_v25 = vmul.f32 %v4665_v36, %v406_v51  ;;  %v427_v19 = vld [vmem:[%s1984_s15 + $0x560] sm:$0xff]  ;;  %v428_v38 = vld [vmem:[%s1984_s15 + $0x568] sm:$0xff]  ;;  %v430_v4 = vld [vmem:[%s1984_s15 + $0x578] sm:$0xff] }
  0xb2   : > { %4660 = vst [vmem:[#allocation12_spill] sm:$0xff] %v2760_v13  ;;  %4662 = vst [vmem:[#allocation186_spill] sm:$0xff] %v2763_v21  ;;  %v4667_v5 = vld [vmem:[#allocation20_spill] sm:$0xff]  ;;  %v4669_v13 = vld [vmem:[#allocation21_spill] sm:$0xff] }
  0xb3   : > { %4664 = vst [vmem:[#allocation187_spill] sm:$0xff] %v2766_v26  ;;  %4666 = vst [vmem:[#allocation188_spill] sm:$0xff] %v2769_v25  ;;  %v2776_v61 = vmul.f32 %v4667_v5, %v407_v10  ;;  %v2779_v32 = vmul.f32 %v4669_v13, %v408_v54  ;;  %v4671_v21 = vld [vmem:[#allocation26_spill] sm:$0xff]  ;;  %v4673_v26 = vld [vmem:[#allocation27_spill] sm:$0xff]  ;;  %v2792_v10 = vmul.f32 %v4606_v27, %v411_v62 }
  0xb4   : > { %v2782_v6 = vmul.f32 %v4671_v21, %v409_v31  ;;  %v2785_v51 = vmul.f32 %v4673_v26, %v410_v43  ;;  %v431_v25 = vld [vmem:[%s1984_s15 + $0x580] sm:$0xff]  ;;  %v432_v36 = vld [vmem:[%s1984_s15 + $0x588] sm:$0xff]  ;;  %v433_v60 = vld [vmem:[%s1984_s15 + $0x590] sm:$0xff]  ;;  %v2795_v54 = vmul.f32 %v4608_v63, %v412_v40  ;;  %v2798_v31 = vmul.f32 %v4610_v48, %v413_v1 }
  0xb5   : > { %4668 = vst [vmem:[#allocation20_spill] sm:$0xff] %v2776_v61  ;;  %4670 = vst [vmem:[#allocation21_spill] sm:$0xff] %v2779_v32  ;;  %v434_v15 = vld [vmem:[%s1984_s15 + $0x598] sm:$0xff]  ;;  %v436_v32 = vld [vmem:[%s1984_s15 + $0x5a8] sm:$0xff]  ;;  %v2808_v62 = vmul.f32 %v4614_v0, %v415_v29  ;;  %v2811_v40 = vmul.f32 %v4616_v9, %v416_v35  ;;  %v2814_v1 = vmul.f32 %v2130_v7, %v417_v46 }
  0xb6   : > { %4672 = vst [vmem:[#allocation26_spill] sm:$0xff] %v2782_v6  ;;  %4674 = vst [vmem:[#allocation189_spill] sm:$0xff] %v2785_v51  ;;  %v4678_v6 = vld [vmem:[#allocation35_spill] sm:$0xff]  ;;  %v435_v51 = vld [vmem:[%s1984_s15 + $0x5a0] sm:$0xff]  ;;  %v2824_v29 = vmul.f32 %v2152_v8, %v419_v12  ;;  %v2827_v35 = vmul.f32 %v2155_v16, %v420_v28  ;;  %v2830_v46 = vmul.f32 %v2174_v17, %v421_v57 }
  0xb7   : > { %4675 = vst [vmem:[#allocation190_spill] sm:$0xff] %v2792_v10  ;;  %4676 = vst [vmem:[#allocation191_spill] sm:$0xff] %v2795_v54  ;;  %v2801_v43 = vmul.f32 %v4678_v6, %v414_v39  ;;  %v437_v61 = vld [vmem:[%s1984_s15 + $0x5b0] sm:$0xff]  ;;  %v438_v26 = vld [vmem:[%s1984_s15 + $0x5b8] sm:$0xff]  ;;  %v2817_v39 = vmul.f32 %v2149_v18, %v418_v24  ;;  %v2833_v24 = vmul.f32 %v2177_v52, %v422_v42 }
  0xb8   : > { %4677 = vst [vmem:[#allocation192_spill] sm:$0xff] %v2798_v31  ;;  %4680 = vst [vmem:[#allocation193_spill] sm:$0xff] %v2808_v62  ;;  %v440_v31 = vld [vmem:[%s1984_s15 + $0x5c8] sm:$0xff]  ;;  %v441_v54 = vld [vmem:[%s1984_s15 + $0x5d0] sm:$0xff]  ;;  %v2840_v12 = vmul.f32 %v2180_v22, %v423_v58  ;;  %v2843_v28 = vmul.f32 %v2199_v23, %v424_v20  ;;  %v2846_v57 = vmul.f32 %v2202_v50, %v425_v11 }
  0xb9   : > { %4679 = vst [vmem:[#allocation35_spill] sm:$0xff] %v2801_v43  ;;  %4681 = vst [vmem:[#allocation194_spill] sm:$0xff] %v2811_v40  ;;  %v439_v43 = vld [vmem:[%s1984_s15 + $0x5c0] sm:$0xff]  ;;  %v442_v10 = vld [vmem:[%s1984_s15 + $0x5d8] sm:$0xff]  ;;  %v2849_v42 = vmul.f32 %v2205_v33, %v426_v41  ;;  %v2856_v58 = vmul.f32 %v2224_v34, %v427_v19  ;;  %v2859_v20 = vmul.f32 %v2227_v53, %v428_v38 }
  0xba   : > { %4682 = vst [vmem:[#allocation195_spill] sm:$0xff] %v2814_v1  ;;  %4683 = vst [vmem:[#allocation196_spill] sm:$0xff] %v2817_v39  ;;  %v443_v39 = vld [vmem:[%s1984_s15 + $0x5e0] sm:$0xff]  ;;  %v444_v1 = vld [vmem:[%s1984_s15 + $0x5e8] sm:$0xff]  ;;  %v2862_v11 = vmul.f32 %v2230_v44, %v429_v59  ;;  %v2865_v41 = vmul.f32 %v2249_v45, %v430_v4  ;;  %v2872_v19 = vmul.f32 %v2252_v30, %v431_v25 }
  0xbb   : > { %4684 = vst [vmem:[#allocation197_spill] sm:$0xff] %v2824_v29  ;;  %4685 = vst [vmem:[#allocation198_spill] sm:$0xff] %v2827_v35  ;;  %v445_v40 = vld [vmem:[%s1984_s15 + $0x5f0] sm:$0xff]  ;;  %v446_v62 = vld [vmem:[%s1984_s15 + $0x5f8] sm:$0xff]  ;;  %v2875_v38 = vmul.f32 %v2255_v55, %v432_v36  ;;  %v2878_v59 = vmul.f32 %v2274_v56, %v433_v60  ;;  %v2888_v25 = vmul.f32 %v2280_v2, %v435_v51 }
  0xbc   : > { %4686 = vst [vmem:[#allocation199_spill] sm:$0xff] %v2830_v46  ;;  %4687 = vst [vmem:[#allocation200_spill] sm:$0xff] %v2833_v24  ;;  %v447_v24 = vld [vmem:[%s1984_s15 + $0x600] sm:$0xff]  ;;  %v448_v46 = vld [vmem:[%s1984_s15 + $0x608] sm:$0xff]  ;;  %v2891_v36 = vmul.f32 %v2299_v3, %v436_v32  ;;  %v2894_v60 = vmul.f32 %v2302_v49, %v437_v61  ;;  %v2904_v51 = vmul.f32 %v2324_v14, %v439_v43 }
  0xbd   : > { %4688 = vst [vmem:[#allocation201_spill] sm:$0xff] %v2840_v12  ;;  %4689 = vst [vmem:[#allocation202_spill] sm:$0xff] %v2843_v28  ;;  %v449_v35 = vld [vmem:[%s1984_s15 + $0x610] sm:$0xff]  ;;  %v450_v29 = vld [vmem:[%s1984_s15 + $0x618] sm:$0xff]  ;;  %v2907_v32 = vmul.f32 %v2327_v47, %v440_v31 }
  0xbe   : > { %4690 = vst [vmem:[#allocation203_spill] sm:$0xff] %v2846_v57  ;;  %4691 = vst [vmem:[#allocation204_spill] sm:$0xff] %v2849_v42  ;;  %v451_v42 = vld [vmem:[%s1984_s15 + $0x620] sm:$0xff]  ;;  %v452_v57 = vld [vmem:[%s1984_s15 + $0x628] sm:$0xff] }
  0xbf   : > { %4692 = vst [vmem:[#allocation205_spill] sm:$0xff] %v2856_v58  ;;  %4693 = vst [vmem:[#allocation206_spill] sm:$0xff] %v2859_v20  ;;  %v453_v28 = vld [vmem:[%s1984_s15 + $0x630] sm:$0xff]  ;;  %v454_v12 = vld [vmem:[%s1984_s15 + $0x638] sm:$0xff] }
  0xc0   : > { %4694 = vst [vmem:[#allocation207_spill] sm:$0xff] %v2862_v11  ;;  %4695 = vst [vmem:[#allocation208_spill] sm:$0xff] %v2865_v41  ;;  %v4699_v11 = vld [vmem:[#allocation67_spill] sm:$0xff]  ;;  %v455_v41 = vld [vmem:[%s1984_s15 + $0x640] sm:$0xff] }
  0xc1   : > { %4696 = vst [vmem:[#allocation209_spill] sm:$0xff] %v2872_v19  ;;  %4697 = vst [vmem:[#allocation210_spill] sm:$0xff] %v2875_v38  ;;  %v2881_v4 = vmul.f32 %v4699_v11, %v434_v15  ;;  %v456_v20 = vld [vmem:[%s1984_s15 + $0x648] sm:$0xff]  ;;  %v457_v58 = vld [vmem:[%s1984_s15 + $0x650] sm:$0xff] }
  0xc2   : > { %4698 = vst [vmem:[#allocation211_spill] sm:$0xff] %v2878_v59  ;;  %v458_v45 = vld [vmem:[%s1984_s15 + $0x658] sm:$0xff]  ;;  %4701 = vst [vmem:[#allocation213_spill] sm:$0xff] %v2888_v25  ;;  %v4704_v59 = vld [vmem:[#allocation74_spill] sm:$0xff] }
  0xc3   : > { %4700 = vst [vmem:[#allocation212_spill] sm:$0xff] %v2881_v4  ;;  %4702 = vst [vmem:[#allocation214_spill] sm:$0xff] %v2891_v36  ;;  %v2897_v15 = vmul.f32 %v4704_v59, %v438_v26  ;;  %v459_v4 = vld [vmem:[%s1984_s15 + $0x660] sm:$0xff]  ;;  %v460_v38 = vld [vmem:[%s1984_s15 + $0x668] sm:$0xff] }
  0xc4   : > { %4703 = vst [vmem:[#allocation215_spill] sm:$0xff] %v2894_v60  ;;  %v461_v19 = vld [vmem:[%s1984_s15 + $0x670] sm:$0xff]  ;;  %v462_v11 = vld [vmem:[%s1984_s15 + $0x678] sm:$0xff]  ;;  %4706 = vst [vmem:[#allocation217_spill] sm:$0xff] %v2904_v51 }
  0xc5   : > { %4705 = vst [vmem:[#allocation216_spill] sm:$0xff] %v2897_v15  ;;  %4707 = vst [vmem:[#allocation218_spill] sm:$0xff] %v2907_v32  ;;  %v4708_v36 = vld [vmem:[#allocation81_spill] sm:$0xff]  ;;  %v4710_v60 = vld [vmem:[#allocation86_spill] sm:$0xff] }
  0xc6   : > { %v2910_v61 = vmul.f32 %v4708_v36, %v441_v54  ;;  %v2913_v26 = vmul.f32 %v4710_v60, %v442_v10  ;;  %v463_v15 = vld [vmem:[%s1984_s15 + $0x680] sm:$0xff]  ;;  %v464_v25 = vld [vmem:[%s1984_s15 + $0x688] sm:$0xff]  ;;  %v465_v59 = vld [vmem:[%s1984_s15 + $0x690] sm:$0xff] }
  0xc7   : > { %v466_v49 = vld [vmem:[%s1984_s15 + $0x698] sm:$0xff]  ;;  %v4712_v3 = vld [vmem:[#allocation87_spill] sm:$0xff]  ;;  %v4716_v32 = vld [vmem:[#allocation93_spill] sm:$0xff] }
  0xc8   : > { %4709 = vst [vmem:[#allocation219_spill] sm:$0xff] %v2910_v61  ;;  %4711 = vst [vmem:[#allocation220_spill] sm:$0xff] %v2913_v26  ;;  %v2920_v43 = vmul.f32 %v4712_v3, %v443_v39  ;;  %v4714_v51 = vld [vmem:[#allocation88_spill] sm:$0xff]  ;;  %v2926_v54 = vmul.f32 %v4716_v32, %v445_v40  ;;  %v4718_v61 = vld [vmem:[#allocation94_spill] sm:$0xff] }
  0xc9   : > { %v2923_v31 = vmul.f32 %v4714_v51, %v444_v1  ;;  %v2929_v10 = vmul.f32 %v4718_v61, %v446_v62  ;;  %v467_v26 = vld [vmem:[%s1984_s15 + $0x6a0] sm:$0xff]  ;;  %v468_v60 = vld [vmem:[%s1984_s15 + $0x6a8] sm:$0xff]  ;;  %v469_v36 = vld [vmem:[%s1984_s15 + $0x6b0] sm:$0xff] }
  0xca   : > { %4713 = vst [vmem:[#allocation221_spill] sm:$0xff] %v2920_v43  ;;  %4717 = vst [vmem:[#allocation223_spill] sm:$0xff] %v2926_v54  ;;  %v470_v47 = vld [vmem:[%s1984_s15 + $0x6b8] sm:$0xff]  ;;  %v4720_v14 = vld [vmem:[#allocation95_spill] sm:$0xff] }
  0xcb   : > { %4715 = vst [vmem:[#allocation222_spill] sm:$0xff] %v2923_v31  ;;  %4719 = vst [vmem:[#allocation224_spill] sm:$0xff] %v2929_v10  ;;  %v2936_v39 = vmul.f32 %v4720_v14, %v447_v24  ;;  %v4722_v43 = vld [vmem:[#allocation100_spill] sm:$0xff]  ;;  %v4724_v31 = vld [vmem:[#allocation101_spill] sm:$0xff] }
  0xcc   : > { %v2939_v1 = vmul.f32 %v4722_v43, %v448_v46  ;;  %v2942_v40 = vmul.f32 %v4724_v31, %v449_v35  ;;  %v4726_v54 = vld [vmem:[#allocation102_spill] sm:$0xff]  ;;  %v471_v10 = vld [vmem:[%s1984_s15 + $0x6c0] sm:$0xff]  ;;  %v473_v32 = vld [vmem:[%s1984_s15 + $0x6d0] sm:$0xff]  ;;  %v2955_v46 = vmul.f32 %v4659_v37, %v452_v57  ;;  %v2971_v37 = vmul.f32 %v4667_v5, %v456_v20 }
  0xcd   : > { %4721 = vst [vmem:[#allocation95_spill] sm:$0xff] %v2936_v39  ;;  %v2945_v62 = vmul.f32 %v4726_v54, %v450_v29  ;;  %v472_v61 = vld [vmem:[%s1984_s15 + $0x6c8] sm:$0xff]  ;;  %v474_v51 = vld [vmem:[%s1984_s15 + $0x6d8] sm:$0xff]  ;;  %v4728_v3 = vld [vmem:[#allocation11_spill] sm:$0xff]  ;;  %v2987_v5 = vmul.f32 %v4606_v27, %v460_v38  ;;  %v3003_v27 = vmul.f32 %v4614_v0, %v464_v25  ;;  %v3019_v0 = vmul.f32 %v2152_v8, %v468_v60 }
  0xce   : > { %4723 = vst [vmem:[#allocation225_spill] sm:$0xff] %v2939_v1  ;;  %4725 = vst [vmem:[#allocation226_spill] sm:$0xff] %v2942_v40  ;;  %v2952_v24 = vmul.f32 %v4728_v3, %v451_v42  ;;  %v4731_v1 = vld [vmem:[#allocation13_spill] sm:$0xff]  ;;  %v4733_v40 = vld [vmem:[#allocation14_spill] sm:$0xff]  ;;  %v3035_v8 = vmul.f32 %v2180_v22, %v472_v61 }
  0xcf   : > { %4727 = vst [vmem:[#allocation227_spill] sm:$0xff] %v2945_v62  ;;  %4730 = vst [vmem:[#allocation228_spill] sm:$0xff] %v2955_v46  ;;  %v2958_v35 = vmul.f32 %v4731_v1, %v453_v28  ;;  %v2961_v29 = vmul.f32 %v4733_v40, %v454_v12  ;;  %v475_v62 = vld [vmem:[%s1984_s15 + $0x6e0] sm:$0xff]  ;;  %v476_v39 = vld [vmem:[%s1984_s15 + $0x6e8] sm:$0xff]  ;;  %v2974_v28 = vmul.f32 %v4669_v13, %v457_v58 }
  0xd0   : > { %4729 = vst [vmem:[#allocation11_spill] sm:$0xff] %v2952_v24  ;;  %v477_v54 = vld [vmem:[%s1984_s15 + $0x6f0] sm:$0xff]  ;;  %v478_v31 = vld [vmem:[%s1984_s15 + $0x6f8] sm:$0xff]  ;;  %4737 = vst [vmem:[#allocation229_spill] sm:$0xff] %v2971_v37  ;;  %v2977_v12 = vmul.f32 %v4671_v21, %v458_v45  ;;  %v2990_v13 = vmul.f32 %v4608_v63, %v461_v19  ;;  %v2993_v45 = vmul.f32 %v4610_v48, %v462_v11 }
  0xd1   : > { %4732 = vst [vmem:[#allocation13_spill] sm:$0xff] %v2958_v35  ;;  %4734 = vst [vmem:[#allocation14_spill] sm:$0xff] %v2961_v29  ;;  %v4735_v43 = vld [vmem:[#allocation19_spill] sm:$0xff]  ;;  %v479_v57 = vld [vmem:[%s1984_s15 + $0x700] sm:$0xff]  ;;  %v3006_v63 = vmul.f32 %v4616_v9, %v465_v59  ;;  %v3009_v48 = vmul.f32 %v2130_v7, %v466_v49  ;;  %v3022_v9 = vmul.f32 %v2155_v16, %v469_v36 }
  0xd2   : > { %v2968_v3 = vmul.f32 %v4735_v43, %v455_v41  ;;  %4738 = vst [vmem:[#allocation230_spill] sm:$0xff] %v2974_v28  ;;  %4739 = vst [vmem:[#allocation231_spill] sm:$0xff] %v2977_v12  ;;  %v480_v42 = vld [vmem:[%s1984_s15 + $0x708] sm:$0xff]  ;;  %v481_v1 = vld [vmem:[%s1984_s15 + $0x710] sm:$0xff]  ;;  %v3025_v49 = vmul.f32 %v2174_v17, %v470_v47  ;;  %v3038_v16 = vmul.f32 %v2199_v23, %v473_v32 }
  0xd3   : > { %v482_v40 = vld [vmem:[%s1984_s15 + $0x718] sm:$0xff]  ;;  %v4740_v29 = vld [vmem:[#allocation27_spill] sm:$0xff]  ;;  %4742 = vst [vmem:[#allocation232_spill] sm:$0xff] %v2987_v5  ;;  %4743 = vst [vmem:[#allocation233_spill] sm:$0xff] %v2990_v13  ;;  %v3041_v47 = vmul.f32 %v2202_v50, %v474_v51  ;;  %v3051_v61 = vmul.f32 %v2224_v34, %v476_v39  ;;  %v3054_v32 = vmul.f32 %v2227_v53, %v477_v54 }
  0xd4   : > { %4736 = vst [vmem:[#allocation19_spill] sm:$0xff] %v2968_v3  ;;  %v2984_v41 = vmul.f32 %v4740_v29, %v459_v4  ;;  %4744 = vst [vmem:[#allocation234_spill] sm:$0xff] %v2993_v45  ;;  %v483_v21 = vld [vmem:[%s1984_s15 + $0x720] sm:$0xff]  ;;  %v484_v58 = vld [vmem:[%s1984_s15 + $0x728] sm:$0xff]  ;;  %v3000_v4 = vmul.f32 %v4678_v6, %v463_v15  ;;  %v3016_v6 = vmul.f32 %v2149_v18, %v467_v26 }
  0xd5   : > { %v485_v20 = vld [vmem:[%s1984_s15 + $0x730] sm:$0xff]  ;;  %v486_v43 = vld [vmem:[%s1984_s15 + $0x738] sm:$0xff]  ;;  %4746 = vst [vmem:[#allocation236_spill] sm:$0xff] %v3003_v27  ;;  %4747 = vst [vmem:[#allocation237_spill] sm:$0xff] %v3006_v63  ;;  %v3032_v18 = vmul.f32 %v2177_v52, %v471_v10  ;;  %v3048_v10 = vmul.f32 %v2205_v33, %v475_v62  ;;  %v3057_v51 = vmul.f32 %v2230_v44, %v478_v31 }
  0xd6   : > { %4741 = vst [vmem:[#allocation27_spill] sm:$0xff] %v2984_v41  ;;  %4745 = vst [vmem:[#allocation235_spill] sm:$0xff] %v3000_v4  ;;  %v487_v11 = vld [vmem:[%s1984_s15 + $0x740] sm:$0xff]  ;;  %v488_v19 = vld [vmem:[%s1984_s15 + $0x748] sm:$0xff]  ;;  %v3067_v39 = vmul.f32 %v2252_v30, %v480_v42  ;;  %v3070_v54 = vmul.f32 %v2255_v55, %v481_v1  ;;  %v3073_v31 = vmul.f32 %v2274_v56, %v482_v40 }
  0xd7   : > { %4748 = vst [vmem:[#allocation238_spill] sm:$0xff] %v3009_v48  ;;  %v489_v38 = vld [vmem:[%s1984_s15 + $0x750] sm:$0xff]  ;;  %v490_v29 = vld [vmem:[%s1984_s15 + $0x758] sm:$0xff]  ;;  %4749 = vst [vmem:[#allocation239_spill] sm:$0xff] %v3016_v6  ;;  %v3083_v42 = vmul.f32 %v2280_v2, %v484_v58 }
  0xd8   : > { %4750 = vst [vmem:[#allocation240_spill] sm:$0xff] %v3019_v0  ;;  %4751 = vst [vmem:[#allocation241_spill] sm:$0xff] %v3022_v9  ;;  %v491_v7 = vld [vmem:[%s1984_s15 + $0x760] sm:$0xff]  ;;  %v492_v59 = vld [vmem:[%s1984_s15 + $0x768] sm:$0xff] }
  0xd9   : > { %4752 = vst [vmem:[#allocation242_spill] sm:$0xff] %v3025_v49  ;;  %v493_v25 = vld [vmem:[%s1984_s15 + $0x770] sm:$0xff]  ;;  %v494_v15 = vld [vmem:[%s1984_s15 + $0x778] sm:$0xff]  ;;  %4753 = vst [vmem:[#allocation243_spill] sm:$0xff] %v3032_v18 }
  0xda   : > { %4754 = vst [vmem:[#allocation244_spill] sm:$0xff] %v3035_v8  ;;  %4755 = vst [vmem:[#allocation245_spill] sm:$0xff] %v3038_v16  ;;  %v495_v36 = vld [vmem:[%s1984_s15 + $0x780] sm:$0xff]  ;;  %v496_v60 = vld [vmem:[%s1984_s15 + $0x788] sm:$0xff] }
  0xdb   : > { %4756 = vst [vmem:[#allocation246_spill] sm:$0xff] %v3041_v47  ;;  %v497_v26 = vld [vmem:[%s1984_s15 + $0x790] sm:$0xff]  ;;  %v498_v49 = vld [vmem:[%s1984_s15 + $0x798] sm:$0xff]  ;;  %4757 = vst [vmem:[#allocation247_spill] sm:$0xff] %v3048_v10 }
  0xdc   : > { %4758 = vst [vmem:[#allocation248_spill] sm:$0xff] %v3051_v61  ;;  %4759 = vst [vmem:[#allocation249_spill] sm:$0xff] %v3054_v32  ;;  %v499_v47 = vld [vmem:[%s1984_s15 + $0x7a0] sm:$0xff]  ;;  %v500_v16 = vld [vmem:[%s1984_s15 + $0x7a8] sm:$0xff] }
  0xdd   : > { %4760 = vst [vmem:[#allocation250_spill] sm:$0xff] %v3057_v51  ;;  %v501_v8 = vld [vmem:[%s1984_s15 + $0x7b0] sm:$0xff]  ;;  %v502_v18 = vld [vmem:[%s1984_s15 + $0x7b8] sm:$0xff]  ;;  %v4761_v9 = vld [vmem:[#allocation62_spill] sm:$0xff] }
  0xde   : > { %v3064_v62 = vmul.f32 %v4761_v9, %v479_v57  ;;  %4763 = vst [vmem:[#allocation251_spill] sm:$0xff] %v3067_v39  ;;  %4764 = vst [vmem:[#allocation252_spill] sm:$0xff] %v3070_v54  ;;  %v503_v51 = vld [vmem:[%s1984_s15 + $0x7c0] sm:$0xff]  ;;  %v504_v32 = vld [vmem:[%s1984_s15 + $0x7c8] sm:$0xff] }
  0xdf   : > { %4765 = vst [vmem:[#allocation253_spill] sm:$0xff] %v3073_v31  ;;  %v505_v61 = vld [vmem:[%s1984_s15 + $0x7d0] sm:$0xff]  ;;  %v506_v10 = vld [vmem:[%s1984_s15 + $0x7d8] sm:$0xff]  ;;  %4768 = vst [vmem:[#allocation254_spill] sm:$0xff] %v3083_v42 }
  0xe0   : > { %4762 = vst [vmem:[#allocation62_spill] sm:$0xff] %v3064_v62  ;;  %v4766_v0 = vld [vmem:[#allocation67_spill] sm:$0xff]  ;;  %v4769_v39 = vld [vmem:[#allocation72_spill] sm:$0xff]  ;;  %v4771_v54 = vld [vmem:[#allocation73_spill] sm:$0xff] }
  0xe1   : > { %v3080_v57 = vmul.f32 %v4766_v0, %v483_v21  ;;  %v3086_v1 = vmul.f32 %v4769_v39, %v485_v20  ;;  %v3089_v40 = vmul.f32 %v4771_v54, %v486_v43  ;;  %v507_v31 = vld [vmem:[%s1984_s15 + $0x7e0] sm:$0xff]  ;;  %v508_v62 = vld [vmem:[%s1984_s15 + $0x7e8] sm:$0xff]  ;;  %v509_v6 = vld [vmem:[%s1984_s15 + $0x7f0] sm:$0xff] }
  0xe2   : > { %v510_v48 = vld [vmem:[%s1984_s15 + $0x7f8] sm:$0xff]  ;;  %v4773_v63 = vld [vmem:[#allocation74_spill] sm:$0xff]  ;;  %v513_v4 = vld [vmem:[%s1984_s15 + $0x810] sm:$0xff] }
  0xe3   : > { %4767 = vst [vmem:[#allocation67_spill] sm:$0xff] %v3080_v57  ;;  %4770 = vst [vmem:[#allocation72_spill] sm:$0xff] %v3086_v1  ;;  %v3096_v21 = vmul.f32 %v4773_v63, %v487_v11  ;;  %v4775_v57 = vld [vmem:[#allocation79_spill] sm:$0xff]  ;;  %v4777_v42 = vld [vmem:[#allocation80_spill] sm:$0xff] }
  0xe4   : > { %4772 = vst [vmem:[#allocation73_spill] sm:$0xff] %v3089_v40  ;;  %v3099_v58 = vmul.f32 %v4775_v57, %v488_v19  ;;  %v3102_v20 = vmul.f32 %v4777_v42, %v489_v38  ;;  %v4779_v1 = vld [vmem:[#allocation81_spill] sm:$0xff]  ;;  %v512_v27 = vld [vmem:[%s1984_s15 + $0x808] sm:$0xff]  ;;  %v514_v45 = vld [vmem:[%s1984_s15 + $0x818] sm:$0xff] }
  0xe5   : > { %4774 = vst [vmem:[#allocation74_spill] sm:$0xff] %v3096_v21  ;;  %v3105_v43 = vmul.f32 %v4779_v1, %v490_v29  ;;  %v511_v40 = vld [vmem:[%s1984_s15 + $0x800] sm:$0xff]  ;;  %v4781_v13 = vld [vmem:[#allocation86_spill] sm:$0xff]  ;;  %v4783_v21 = vld [vmem:[#allocation87_spill] sm:$0xff] }
  0xe6   : > { %4776 = vst [vmem:[#allocation79_spill] sm:$0xff] %v3099_v58  ;;  %4778 = vst [vmem:[#allocation80_spill] sm:$0xff] %v3102_v20  ;;  %v3112_v11 = vmul.f32 %v4781_v13, %v491_v7  ;;  %v3115_v19 = vmul.f32 %v4783_v21, %v492_v59  ;;  %v4785_v58 = vld [vmem:[#allocation88_spill] sm:$0xff]  ;;  %v4787_v29 = vld [vmem:[#allocation93_spill] sm:$0xff]  ;;  %v3133_v59 = vmul.f32 %v4720_v14, %v496_v60 }
  0xe7   : > { %4780 = vst [vmem:[#allocation81_spill] sm:$0xff] %v3105_v43  ;;  %v3118_v38 = vmul.f32 %v4785_v58, %v493_v25  ;;  %v3121_v43 = vmul.f32 %v4787_v29, %v494_v15  ;;  %v515_v20 = vld [vmem:[%s1984_s15 + $0x820] sm:$0xff]  ;;  %v516_v5 = vld [vmem:[%s1984_s15 + $0x828] sm:$0xff]  ;;  %v517_v41 = vld [vmem:[%s1984_s15 + $0x830] sm:$0xff] }
  0xe8   : > { %4782 = vst [vmem:[#allocation86_spill] sm:$0xff] %v3112_v11  ;;  %4784 = vst [vmem:[#allocation87_spill] sm:$0xff] %v3115_v19  ;;  %v3127_v12 = vld [vmem:[%s1984_s15 + $0x838] sm:$0xff]  ;;  %v4789_v28 = vld [vmem:[#allocation94_spill] sm:$0xff] }
  0xe9   : > { %4786 = vst [vmem:[#allocation88_spill] sm:$0xff] %v3118_v38  ;;  %4788 = vst [vmem:[#allocation93_spill] sm:$0xff] %v3121_v43  ;;  %v3130_v7 = vmul.f32 %v4789_v28, %v495_v36  ;;  %v4792_v25 = vld [vmem:[#allocation100_spill] sm:$0xff]  ;;  %v4794_v15 = vld [vmem:[#allocation101_spill] sm:$0xff] }
  0xea   : > { %4791 = vst [vmem:[#allocation255_spill] sm:$0xff] %v3133_v59  ;;  %v3136_v38 = vmul.f32 %v4792_v25, %v497_v26  ;;  %v3139_v43 = vmul.f32 %v4794_v15, %v498_v49  ;;  %v3142_v19 = vld [vmem:[%s1984_s15 + $0x840] sm:$0xff]  ;;  %v3145_v11 = vld [vmem:[%s1984_s15 + $0x848] sm:$0xff]  ;;  %v3148_v36 = vld [vmem:[%s1984_s15 + $0x850] sm:$0xff] }
  0xeb   : > { %4790 = vst [vmem:[#allocation94_spill] sm:$0xff] %v3130_v7  ;;  %v3151_v7 = vld [vmem:[%s1984_s15 + $0x858] sm:$0xff]  ;;  %v4796_v60 = vld [vmem:[#allocation102_spill] sm:$0xff]  ;;  %v525_v35 = vld [vmem:[%s1984_s15 + $0x870] sm:$0xff] }
  0xec   : > { %4793 = vst [vmem:[#allocation100_spill] sm:$0xff] %v3136_v38  ;;  %4795 = vst [vmem:[#allocation101_spill] sm:$0xff] %v3139_v43  ;;  %v3154_v59 = vmul.f32 %v4796_v60, %v499_v47  ;;  %v3157_v26 = vld [vmem:[%s1990_s19] sm:$0xff]  ;;  %v3163_v43 = vld [vmem:[%s1990_s19 + $0x8] sm:$0xff] }
  0xed   : > { %v3160_v49 = vmul.f32 %v3157_v26, %v500_v16  ;;  %4799 = vst [vmem:[#allocation257_spill] sm:$0xff] %v3163_v43  ;;  %v3166_v38 = vmul.f32 %v3163_v43, %v501_v8  ;;  %v3169_v37 = vld [vmem:[%s1990_s19 + $0x10] sm:$0xff]  ;;  %v523_v47 = vld [vmem:[%s1984_s15 + $0x860] sm:$0xff] }
  0xee   : > { %4797 = vst [vmem:[#allocation102_spill] sm:$0xff] %v3154_v59  ;;  %4801 = vst [vmem:[#allocation259_spill] sm:$0xff] %v3169_v37  ;;  %v3172_v3 = vmul.f32 %v3169_v37, %v502_v18  ;;  %v524_v59 = vld [vmem:[%s1984_s15 + $0x868] sm:$0xff]  ;;  %v526_v16 = vld [vmem:[%s1984_s15 + $0x878] sm:$0xff] }
  0xef   : > { %4798 = vst [vmem:[#allocation256_spill] sm:$0xff] %v3160_v49  ;;  %4800 = vst [vmem:[#allocation258_spill] sm:$0xff] %v3166_v38  ;;  %v3179_v49 = vld [vmem:[%s1990_s19 + $0x18] sm:$0xff]  ;;  %v3185_v38 = vld [vmem:[%s1990_s19 + $0x20] sm:$0xff] }
  0xf0   : > { %4802 = vst [vmem:[#allocation260_spill] sm:$0xff] %v3172_v3  ;;  %4803 = vst [vmem:[#allocation261_spill] sm:$0xff] %v3179_v49  ;;  %v3182_v8 = vmul.f32 %v3179_v49, %v503_v51  ;;  %v3188_v46 = vmul.f32 %v3185_v38, %v504_v32  ;;  %v3191_v18 = vld [vmem:[%s1990_s19 + $0x28] sm:$0xff]  ;;  %v3197_v24 = vld [vmem:[%s1990_s19 + $0x30] sm:$0xff] }
  0xf1   : > { %4805 = vst [vmem:[#allocation263_spill] sm:$0xff] %v3185_v38  ;;  %4807 = vst [vmem:[#allocation265_spill] sm:$0xff] %v3191_v18  ;;  %v3194_v3 = vmul.f32 %v3191_v18, %v505_v61  ;;  %v3200_v37 = vmul.f32 %v3197_v24, %v506_v10  ;;  %v527_v51 = vld [vmem:[%s1984_s15 + $0x880] sm:$0xff]  ;;  %v529_v49 = vld [vmem:[%s1984_s15 + $0x890] sm:$0xff] }
  0xf2   : > { %4804 = vst [vmem:[#allocation262_spill] sm:$0xff] %v3182_v8  ;;  %4806 = vst [vmem:[#allocation264_spill] sm:$0xff] %v3188_v46  ;;  %v528_v8 = vld [vmem:[%s1984_s15 + $0x888] sm:$0xff]  ;;  %v530_v32 = vld [vmem:[%s1984_s15 + $0x898] sm:$0xff] }
  0xf3   : > { %4808 = vst [vmem:[#allocation266_spill] sm:$0xff] %v3194_v3  ;;  %4809 = vst [vmem:[#allocation267_spill] sm:$0xff] %v3197_v24  ;;  %v3207_v46 = vld [vmem:[%s1990_s19 + $0x38] sm:$0xff]  ;;  %v3213_v3 = vld [vmem:[%s1990_s19 + $0x40] sm:$0xff] }
  0xf4   : > { %4810 = vst [vmem:[#allocation268_spill] sm:$0xff] %v3200_v37  ;;  %4811 = vst [vmem:[#allocation269_spill] sm:$0xff] %v3207_v46  ;;  %v3210_v61 = vmul.f32 %v3207_v46, %v507_v31  ;;  %v3216_v18 = vmul.f32 %v3213_v3, %v508_v62  ;;  %v3219_v10 = vld [vmem:[%s1990_s19 + $0x48] sm:$0xff]  ;;  %v3225_v24 = vld [vmem:[%s1990_s19 + $0x50] sm:$0xff] }
  0xf5   : > { %4813 = vst [vmem:[#allocation271_spill] sm:$0xff] %v3213_v3  ;;  %4815 = vst [vmem:[#allocation273_spill] sm:$0xff] %v3219_v10  ;;  %v3222_v37 = vmul.f32 %v3219_v10, %v509_v6  ;;  %v3228_v38 = vmul.f32 %v3225_v24, %v510_v48  ;;  %v531_v31 = vld [vmem:[%s1984_s15 + $0x8a0] sm:$0xff]  ;;  %v533_v46 = vld [vmem:[%s1984_s15 + $0x8b0] sm:$0xff] }
  0xf6   : > { %4812 = vst [vmem:[#allocation270_spill] sm:$0xff] %v3210_v61  ;;  %4814 = vst [vmem:[#allocation272_spill] sm:$0xff] %v3216_v18  ;;  %v532_v61 = vld [vmem:[%s1984_s15 + $0x8a8] sm:$0xff]  ;;  %v534_v62 = vld [vmem:[%s1984_s15 + $0x8b8] sm:$0xff] }
  0xf7   : > { %4816 = vst [vmem:[#allocation274_spill] sm:$0xff] %v3222_v37  ;;  %4817 = vst [vmem:[#allocation275_spill] sm:$0xff] %v3225_v24  ;;  %v3235_v18 = vld [vmem:[%s1990_s19 + $0x58] sm:$0xff]  ;;  %v3241_v37 = vld [vmem:[%s1990_s19 + $0x60] sm:$0xff] }
  0xf8   : > { %4818 = vst [vmem:[#allocation276_spill] sm:$0xff] %v3228_v38  ;;  %4819 = vst [vmem:[#allocation277_spill] sm:$0xff] %v3235_v18  ;;  %v3238_v6 = vmul.f32 %v3235_v18, %v511_v40  ;;  %v3244_v10 = vmul.f32 %v3241_v37, %v512_v27  ;;  %v3247_v48 = vld [vmem:[%s1990_s19 + $0x68] sm:$0xff]  ;;  %v3253_v24 = vld [vmem:[%s1990_s19 + $0x70] sm:$0xff] }
  0xf9   : > { %4822 = vst [vmem:[#allocation280_spill] sm:$0xff] %v3247_v48  ;;  %v3250_v38 = vmul.f32 %v3247_v48, %v513_v4  ;;  %4824 = vst [vmem:[#allocation282_spill] sm:$0xff] %v3253_v24  ;;  %v3256_v3 = vmul.f32 %v3253_v24, %v514_v45  ;;  %v535_v40 = vld [vmem:[%s1984_s15 + $0x8c0] sm:$0xff]  ;;  %v537_v18 = vld [vmem:[%s1984_s15 + $0x8d0] sm:$0xff] }
  0xfa   : > { %4820 = vst [vmem:[#allocation278_spill] sm:$0xff] %v3238_v6  ;;  %4821 = vst [vmem:[#allocation279_spill] sm:$0xff] %v3244_v10  ;;  %v536_v6 = vld [vmem:[%s1984_s15 + $0x8c8] sm:$0xff]  ;;  %v538_v43 = vld [vmem:[%s1984_s15 + $0x8d8] sm:$0xff] }
  0xfb   : > { %4823 = vst [vmem:[#allocation281_spill] sm:$0xff] %v3250_v38  ;;  %4825 = vst [vmem:[#allocation283_spill] sm:$0xff] %v3256_v3  ;;  %v3263_v27 = vld [vmem:[%s1990_s19 + $0x78] sm:$0xff]  ;;  %v3269_v4 = vld [vmem:[%s1990_s19 + $0x80] sm:$0xff] }
  0xfc   : > { %4826 = vst [vmem:[#allocation284_spill] sm:$0xff] %v3263_v27  ;;  %v3266_v10 = vmul.f32 %v3263_v27, %v515_v20  ;;  %v3272_v38 = vmul.f32 %v3269_v4, %v516_v5  ;;  %v3275_v45 = vld [vmem:[%s1990_s19 + $0x88] sm:$0xff]  ;;  %v3281_v24 = vld [vmem:[%s1990_s19 + $0x90] sm:$0xff]  ;;  %v539_v20 = vld [vmem:[%s1984_s15 + $0x8e0] sm:$0xff] }
  0xfd   : > { %4829 = vst [vmem:[#allocation287_spill] sm:$0xff] %v3275_v45  ;;  %v3278_v3 = vmul.f32 %v3275_v45, %v517_v41  ;;  %4831 = vst [vmem:[#allocation289_spill] sm:$0xff] %v3281_v24  ;;  %v3285_v48 = vmul.f32 %v3281_v24, %v3127_v12  ;;  %v541_v27 = vld [vmem:[%s1984_s15 + $0x8f0] sm:$0xff]  ;;  %v542_v5 = vld [vmem:[%s1984_s15 + $0x8f8] sm:$0xff]  ;;  %v3297_v41 = vmul.f32 %v2177_v52, %v3145_v11 }
  0xfe   : > { %4827 = vst [vmem:[#allocation285_spill] sm:$0xff] %v3266_v10  ;;  %4828 = vst [vmem:[#allocation286_spill] sm:$0xff] %v3272_v38  ;;  %v540_v10 = vld [vmem:[%s1984_s15 + $0x8e8] sm:$0xff]  ;;  %v3293_v38 = vmul.f32 %v2174_v17, %v3142_v19  ;;  %v3301_v12 = vmul.f32 %v2180_v22, %v3148_v36  ;;  %v545_v45 = vld [vmem:[%s1984_s15 + $0x910] sm:$0xff]  ;;  %v3312_v19 = vmul.f32 %v2202_v50, %v523_v47 }
  0xff   : > { %4830 = vst [vmem:[#allocation288_spill] sm:$0xff] %v3278_v3  ;;  %4832 = vst [vmem:[#allocation290_spill] sm:$0xff] %v3285_v48  ;;  %v3305_v48 = vmul.f32 %v2199_v23, %v3151_v7  ;;  %v543_v3 = vld [vmem:[%s1984_s15 + $0x900] sm:$0xff]  ;;  %v544_v24 = vld [vmem:[%s1984_s15 + $0x908] sm:$0xff]  ;;  %v3315_v52 = vmul.f32 %v2205_v33, %v524_v59  ;;  %v3318_v22 = vmul.f32 %v2224_v34, %v525_v35 }
 0x100   : > { %4833 = vst [vmem:[#allocation291_spill] sm:$0xff] %v3293_v38  ;;  %4834 = vst [vmem:[#allocation292_spill] sm:$0xff] %v3297_v41  ;;  %v546_v17 = vld [vmem:[%s1984_s15 + $0x918] sm:$0xff]  ;;  %v3321_v23 = vmul.f32 %v2227_v53, %v526_v16  ;;  %v547_v11 = vld [vmem:[%s1984_s15 + $0x920] sm:$0xff]  ;;  %v3328_v50 = vmul.f32 %v2230_v44, %v527_v51  ;;  %v3331_v33 = vmul.f32 %v4761_v9, %v528_v8 }
 0x101   : > { %4835 = vst [vmem:[#allocation293_spill] sm:$0xff] %v3301_v12  ;;  %4836 = vst [vmem:[#allocation294_spill] sm:$0xff] %v3305_v48  ;;  %v548_v7 = vld [vmem:[%s1984_s15 + $0x928] sm:$0xff]  ;;  %v549_v36 = vld [vmem:[%s1984_s15 + $0x930] sm:$0xff]  ;;  %v3334_v34 = vmul.f32 %v2252_v30, %v529_v49  ;;  %v3337_v53 = vmul.f32 %v2255_v55, %v530_v32  ;;  %v3344_v44 = vmul.f32 %v2274_v56, %v531_v31 }
 0x102   : > { %4837 = vst [vmem:[#allocation295_spill] sm:$0xff] %v3312_v19  ;;  %4838 = vst [vmem:[#allocation296_spill] sm:$0xff] %v3315_v52  ;;  %v550_v48 = vld [vmem:[%s1984_s15 + $0x938] sm:$0xff]  ;;  %v551_v35 = vld [vmem:[%s1984_s15 + $0x940] sm:$0xff]  ;;  %v3347_v9 = vmul.f32 %v4766_v0, %v532_v61  ;;  %v3350_v30 = vmul.f32 %v2280_v2, %v533_v46  ;;  %v3353_v55 = vmul.f32 %v4769_v39, %v534_v62 }
 0x103   : > { %4839 = vst [vmem:[#allocation297_spill] sm:$0xff] %v3318_v22  ;;  %4840 = vst [vmem:[#allocation298_spill] sm:$0xff] %v3321_v23  ;;  %v552_v59 = vld [vmem:[%s1984_s15 + $0x948] sm:$0xff]  ;;  %v553_v47 = vld [vmem:[%s1984_s15 + $0x950] sm:$0xff]  ;;  %v3360_v56 = vmul.f32 %v4771_v54, %v535_v40  ;;  %v3363_v0 = vmul.f32 %v4773_v63, %v536_v6  ;;  %v3366_v2 = vmul.f32 %v4775_v57, %v537_v18 }
 0x104   : > { %4841 = vst [vmem:[#allocation299_spill] sm:$0xff] %v3328_v50  ;;  %4842 = vst [vmem:[#allocation300_spill] sm:$0xff] %v3331_v33  ;;  %v554_v16 = vld [vmem:[%s1984_s15 + $0x958] sm:$0xff]  ;;  %v555_v49 = vld [vmem:[%s1984_s15 + $0x960] sm:$0xff]  ;;  %v3369_v46 = vmul.f32 %v4777_v42, %v538_v43  ;;  %v3376_v54 = vmul.f32 %v4779_v1, %v539_v20  ;;  %v3379_v63 = vmul.f32 %v4781_v13, %v540_v10 }
 0x105   : > { %4843 = vst [vmem:[#allocation301_spill] sm:$0xff] %v3334_v34  ;;  %4844 = vst [vmem:[#allocation302_spill] sm:$0xff] %v3337_v53  ;;  %v556_v8 = vld [vmem:[%s1984_s15 + $0x968] sm:$0xff]  ;;  %v557_v51 = vld [vmem:[%s1984_s15 + $0x970] sm:$0xff]  ;;  %v3382_v57 = vmul.f32 %v4783_v21, %v541_v27  ;;  %v3385_v42 = vmul.f32 %v4785_v58, %v542_v5  ;;  %v3392_v1 = vmul.f32 %v4787_v29, %v543_v3 }
 0x106   : > { %4845 = vst [vmem:[#allocation303_spill] sm:$0xff] %v3344_v44  ;;  %4846 = vst [vmem:[#allocation304_spill] sm:$0xff] %v3347_v9  ;;  %v558_v32 = vld [vmem:[%s1984_s15 + $0x978] sm:$0xff]  ;;  %v559_v39 = vld [vmem:[%s1984_s15 + $0x980] sm:$0xff]  ;;  %v3395_v13 = vmul.f32 %v4789_v28, %v544_v24  ;;  %v3398_v21 = vmul.f32 %v4720_v14, %v545_v45  ;;  %v3401_v58 = vmul.f32 %v4792_v25, %v546_v17 }
 0x107   : > { %4847 = vst [vmem:[#allocation305_spill] sm:$0xff] %v3350_v30  ;;  %4848 = vst [vmem:[#allocation306_spill] sm:$0xff] %v3353_v55  ;;  %v560_v61 = vld [vmem:[%s1984_s15 + $0x988] sm:$0xff]  ;;  %v561_v31 = vld [vmem:[%s1984_s15 + $0x990] sm:$0xff]  ;;  %v3408_v3 = vmul.f32 %v4794_v15, %v547_v11  ;;  %v3411_v24 = vmul.f32 %v4796_v60, %v548_v7  ;;  %v3414_v14 = vmul.f32 %v3157_v26, %v549_v36 }
 0x108   : > { %4849 = vst [vmem:[#allocation307_spill] sm:$0xff] %v3360_v56  ;;  %4850 = vst [vmem:[#allocation308_spill] sm:$0xff] %v3363_v0  ;;  %v562_v62 = vld [vmem:[%s1984_s15 + $0x998] sm:$0xff]  ;;  %v563_v43 = vld [vmem:[%s1984_s15 + $0x9a0] sm:$0xff] }
 0x109   : > { %4851 = vst [vmem:[#allocation309_spill] sm:$0xff] %v3366_v2  ;;  %4852 = vst [vmem:[#allocation310_spill] sm:$0xff] %v3369_v46  ;;  %v564_v18 = vld [vmem:[%s1984_s15 + $0x9a8] sm:$0xff]  ;;  %v565_v6 = vld [vmem:[%s1984_s15 + $0x9b0] sm:$0xff] }
 0x10a   : > { %4853 = vst [vmem:[#allocation311_spill] sm:$0xff] %v3376_v54  ;;  %4854 = vst [vmem:[#allocation312_spill] sm:$0xff] %v3379_v63  ;;  %v566_v40 = vld [vmem:[%s1984_s15 + $0x9b8] sm:$0xff]  ;;  %v567_v10 = vld [vmem:[%s1984_s15 + $0x9c0] sm:$0xff] }
 0x10b   : > { %4855 = vst [vmem:[#allocation313_spill] sm:$0xff] %v3382_v57  ;;  %4856 = vst [vmem:[#allocation314_spill] sm:$0xff] %v3385_v42  ;;  %v568_v27 = vld [vmem:[%s1984_s15 + $0x9c8] sm:$0xff]  ;;  %v569_v20 = vld [vmem:[%s1984_s15 + $0x9d0] sm:$0xff] }
 0x10c   : > { %4857 = vst [vmem:[#allocation315_spill] sm:$0xff] %v3392_v1  ;;  %4858 = vst [vmem:[#allocation316_spill] sm:$0xff] %v3395_v13  ;;  %v570_v5 = vld [vmem:[%s1984_s15 + $0x9d8] sm:$0xff]  ;;  %v4864_v28 = vld [vmem:[#allocation257_spill] sm:$0xff] }
 0x10d   : > { %4859 = vst [vmem:[#allocation317_spill] sm:$0xff] %v3398_v21  ;;  %4860 = vst [vmem:[#allocation318_spill] sm:$0xff] %v3401_v58  ;;  %v3417_v29 = vmul.f32 %v4864_v28, %v550_v48  ;;  %v571_v25 = vld [vmem:[%s1984_s15 + $0x9e0] sm:$0xff]  ;;  %v572_v45 = vld [vmem:[%s1984_s15 + $0x9e8] sm:$0xff] }
 0x10e   : > { %4861 = vst [vmem:[#allocation319_spill] sm:$0xff] %v3408_v3  ;;  %4862 = vst [vmem:[#allocation320_spill] sm:$0xff] %v3411_v24  ;;  %v573_v17 = vld [vmem:[%s1984_s15 + $0x9f0] sm:$0xff]  ;;  %v574_v58 = vld [vmem:[%s1984_s15 + $0x9f8] sm:$0xff] }
 0x10f   : > { %4863 = vst [vmem:[#allocation321_spill] sm:$0xff] %v3414_v14  ;;  %4865 = vst [vmem:[#allocation257_spill] sm:$0xff] %v3417_v29  ;;  %v4866_v21 = vld [vmem:[#allocation259_spill] sm:$0xff]  ;;  %v4868_v11 = vld [vmem:[#allocation261_spill] sm:$0xff] }
 0x110   : > { %v3424_v15 = vmul.f32 %v4866_v21, %v551_v35  ;;  %v3427_v60 = vmul.f32 %v4868_v11, %v552_v59  ;;  %v4870_v7 = vld [vmem:[#allocation263_spill] sm:$0xff]  ;;  %v4872_v24 = vld [vmem:[#allocation265_spill] sm:$0xff]  ;;  %v576_v13 = vld [vmem:[%s1984_s15 + $0xa08] sm:$0xff] }
 0x111   : > { %v3430_v36 = vmul.f32 %v4870_v7, %v553_v47  ;;  %v3433_v48 = vmul.f32 %v4872_v24, %v554_v16  ;;  %v575_v3 = vld [vmem:[%s1984_s15 + $0xa00] sm:$0xff]  ;;  %v577_v1 = vld [vmem:[%s1984_s15 + $0xa10] sm:$0xff]  ;;  %v578_v42 = vld [vmem:[%s1984_s15 + $0xa18] sm:$0xff] }
 0x112   : > { %4867 = vst [vmem:[#allocation259_spill] sm:$0xff] %v3424_v15  ;;  %4869 = vst [vmem:[#allocation261_spill] sm:$0xff] %v3427_v60  ;;  %v4874_v57 = vld [vmem:[#allocation267_spill] sm:$0xff]  ;;  %v4876_v63 = vld [vmem:[#allocation269_spill] sm:$0xff] }
 0x113   : > { %4871 = vst [vmem:[#allocation263_spill] sm:$0xff] %v3430_v36  ;;  %4873 = vst [vmem:[#allocation265_spill] sm:$0xff] %v3433_v48  ;;  %v3440_v35 = vmul.f32 %v4874_v57, %v555_v49  ;;  %v3443_v59 = vmul.f32 %v4876_v63, %v556_v8  ;;  %v4878_v54 = vld [vmem:[#allocation271_spill] sm:$0xff]  ;;  %v4880_v46 = vld [vmem:[#allocation273_spill] sm:$0xff] }
 0x114   : > { %v3446_v47 = vmul.f32 %v4878_v54, %v557_v51  ;;  %v3449_v16 = vmul.f32 %v4880_v46, %v558_v32  ;;  %v579_v2 = vld [vmem:[%s1984_s15 + $0xa20] sm:$0xff]  ;;  %v580_v0 = vld [vmem:[%s1984_s15 + $0xa28] sm:$0xff]  ;;  %v581_v56 = vld [vmem:[%s1984_s15 + $0xa30] sm:$0xff]  ;;  %v3462_v51 = vmul.f32 %v3241_v37, %v561_v31  ;;  %v3480_v31 = vmul.f32 %v3269_v4, %v565_v6 }
 0x115   : > { %4875 = vst [vmem:[#allocation267_spill] sm:$0xff] %v3440_v35  ;;  %4877 = vst [vmem:[#allocation269_spill] sm:$0xff] %v3443_v59  ;;  %v582_v55 = vld [vmem:[%s1984_s15 + $0xa38] sm:$0xff]  ;;  %v4882_v30 = vld [vmem:[#allocation275_spill] sm:$0xff] }
 0x116   : > { %4879 = vst [vmem:[#allocation271_spill] sm:$0xff] %v3446_v47  ;;  %4881 = vst [vmem:[#allocation273_spill] sm:$0xff] %v3449_v16  ;;  %v3456_v49 = vmul.f32 %v4882_v30, %v559_v39  ;;  %v4884_v9 = vld [vmem:[#allocation277_spill] sm:$0xff]  ;;  %v4887_v32 = vld [vmem:[#allocation280_spill] sm:$0xff] }
 0x117   : > { %v3459_v8 = vmul.f32 %v4884_v9, %v560_v61  ;;  %4886 = vst [vmem:[#allocation322_spill] sm:$0xff] %v3462_v51  ;;  %v3465_v44 = vmul.f32 %v4887_v32, %v562_v62  ;;  %v583_v53 = vld [vmem:[%s1984_s15 + $0xa40] sm:$0xff]  ;;  %v584_v34 = vld [vmem:[%s1984_s15 + $0xa48] sm:$0xff]  ;;  %v585_v33 = vld [vmem:[%s1984_s15 + $0xa50] sm:$0xff] }
 0x118   : > { %4883 = vst [vmem:[#allocation275_spill] sm:$0xff] %v3456_v49  ;;  %v3471_v50 = vld [vmem:[%s1984_s15 + $0xa58] sm:$0xff]  ;;  %v4889_v23 = vld [vmem:[#allocation282_spill] sm:$0xff]  ;;  %4893 = vst [vmem:[#allocation323_spill] sm:$0xff] %v3480_v31 }
 0x119   : > { %4885 = vst [vmem:[#allocation277_spill] sm:$0xff] %v3459_v8  ;;  %4888 = vst [vmem:[#allocation280_spill] sm:$0xff] %v3465_v44  ;;  %v3474_v39 = vmul.f32 %v4889_v23, %v563_v43  ;;  %v4891_v61 = vld [vmem:[#allocation284_spill] sm:$0xff]  ;;  %v4894_v62 = vld [vmem:[#allocation287_spill] sm:$0xff] }
 0x11a   : > { %v3477_v22 = vmul.f32 %v4891_v61, %v564_v18  ;;  %v3483_v52 = vmul.f32 %v4894_v62, %v566_v40  ;;  %v3486_v19 = vld [vmem:[%s1984_s15 + $0xa60] sm:$0xff]  ;;  %v3489_v12 = vld [vmem:[%s1984_s15 + $0xa68] sm:$0xff]  ;;  %v3492_v43 = vld [vmem:[%s1984_s15 + $0xa70] sm:$0xff] }
 0x11b   : > { %4890 = vst [vmem:[#allocation282_spill] sm:$0xff] %v3474_v39  ;;  %v3495_v41 = vld [vmem:[%s1984_s15 + $0xa78] sm:$0xff]  ;;  %v4896_v18 = vld [vmem:[#allocation289_spill] sm:$0xff]  ;;  %v3549_v8 = vld [vmem:[%s1990_s19 + $0xc8] sm:$0xff] }
 0x11c   : > { %4892 = vst [vmem:[#allocation284_spill] sm:$0xff] %v3477_v22  ;;  %4895 = vst [vmem:[#allocation287_spill] sm:$0xff] %v3483_v52  ;;  %v3498_v38 = vmul.f32 %v4896_v18, %v567_v10  ;;  %v3501_v6 = vld [vmem:[%s1990_s19 + $0x98] sm:$0xff]  ;;  %v3507_v52 = vld [vmem:[%s1990_s19 + $0xa0] sm:$0xff]  ;;  %v3552_v49 = vmul.f32 %v3549_v8, %v574_v58 }
 0x11d   : > { %v3504_v40 = vmul.f32 %v3501_v6, %v568_v27  ;;  %v3510_v31 = vmul.f32 %v3507_v52, %v569_v20  ;;  %v3513_v22 = vld [vmem:[%s1990_s19 + $0xa8] sm:$0xff]  ;;  %v3519_v10 = vld [vmem:[%s1984_s15 + $0xa80] sm:$0xff]  ;;  %v3531_v20 = vld [vmem:[%s1990_s19 + $0xb0] sm:$0xff] }
 0x11e   : > { %4897 = vst [vmem:[#allocation289_spill] sm:$0xff] %v3498_v38  ;;  %v3516_v39 = vmul.f32 %v3513_v22, %v570_v5  ;;  %v3522_v38 = vld [vmem:[%s1984_s15 + $0xa88] sm:$0xff]  ;;  %v3525_v27 = vld [vmem:[%s1984_s15 + $0xa90] sm:$0xff]  ;;  %v3537_v44 = vld [vmem:[%s1990_s19 + $0xb8] sm:$0xff] }
 0x11f   : > { %4898 = vst [vmem:[#allocation324_spill] sm:$0xff] %v3504_v40  ;;  %4899 = vst [vmem:[#allocation325_spill] sm:$0xff] %v3510_v31  ;;  %v3528_v40 = vld [vmem:[%s1984_s15 + $0xa98] sm:$0xff]  ;;  %v3534_v31 = vmul.f32 %v3531_v20, %v571_v25  ;;  %v3540_v5 = vmul.f32 %v3537_v44, %v572_v45  ;;  %v3555_v25 = vld [vmem:[%s1984_s15 + $0xaa0] sm:$0xff] }
 0x120   : > { %4900 = vst [vmem:[#allocation326_spill] sm:$0xff] %v3516_v39  ;;  %v3543_v39 = vld [vmem:[%s1990_s19 + $0xc0] sm:$0xff]  ;;  %4904 = vst [vmem:[#allocation330_spill] sm:$0xff] %v3552_v49  ;;  %v3561_v45 = vld [vmem:[%s1984_s15 + $0xab0] sm:$0xff] }
 0x121   : > { %4901 = vst [vmem:[#allocation327_spill] sm:$0xff] %v3534_v31  ;;  %4902 = vst [vmem:[#allocation328_spill] sm:$0xff] %v3540_v5  ;;  %v3546_v51 = vmul.f32 %v3543_v39, %v573_v17  ;;  %v3558_v31 = vld [vmem:[%s1984_s15 + $0xaa8] sm:$0xff]  ;;  %v3564_v5 = vld [vmem:[%s1984_s15 + $0xab8] sm:$0xff] }
 0x122   : > { %v3567_v17 = vld [vmem:[%s1990_s19 + $0xd0] sm:$0xff]  ;;  %v3573_v16 = vld [vmem:[%s1990_s19 + $0xd8] sm:$0xff]  ;;  %v3579_v49 = vld [vmem:[%s1990_s19 + $0xe0] sm:$0xff] }
 0x123   : > { %4903 = vst [vmem:[#allocation329_spill] sm:$0xff] %v3546_v51  ;;  %v3570_v51 = vmul.f32 %v3567_v17, %v575_v3  ;;  %v3576_v58 = vmul.f32 %v3573_v16, %v576_v13  ;;  %v3582_v47 = vmul.f32 %v3579_v49, %v577_v1  ;;  %v3585_v59 = vld [vmem:[%s1990_s19 + $0xe8] sm:$0xff]  ;;  %v3591_v3 = vld [vmem:[%s1984_s15 + $0xac0] sm:$0xff]  ;;  %v3603_v1 = vld [vmem:[%s1990_s19 + $0xf0] sm:$0xff] }
 0x124   : > { %v3588_v35 = vmul.f32 %v3585_v59, %v578_v42  ;;  %v3597_v13 = vld [vmem:[%s1984_s15 + $0xad0] sm:$0xff]  ;;  %v3609_v48 = vld [vmem:[%s1990_s19 + $0xf8] sm:$0xff] }
 0x125   : > { %4905 = vst [vmem:[#allocation331_spill] sm:$0xff] %v3570_v51  ;;  %4906 = vst [vmem:[#allocation332_spill] sm:$0xff] %v3576_v58  ;;  %v3594_v51 = vld [vmem:[%s1984_s15 + $0xac8] sm:$0xff]  ;;  %v3600_v58 = vld [vmem:[%s1984_s15 + $0xad8] sm:$0xff]  ;;  %v3612_v42 = vmul.f32 %v3609_v48, %v580_v0 }
 0x126   : > { %4907 = vst [vmem:[#allocation333_spill] sm:$0xff] %v3582_v47  ;;  %4908 = vst [vmem:[#allocation334_spill] sm:$0xff] %v3588_v35  ;;  %v3606_v47 = vmul.f32 %v3603_v1, %v579_v2  ;;  %v3615_v35 = vld [vmem:[%s1990_s19 + $0x100] sm:$0xff]  ;;  %v3621_v60 = vld [vmem:[%s1990_s19 + $0x108] sm:$0xff] }
 0x127   : > { %4910 = vst [vmem:[#allocation336_spill] sm:$0xff] %v3612_v42  ;;  %4911 = vst [vmem:[#allocation337_spill] sm:$0xff] %v3615_v35  ;;  %v3618_v36 = vmul.f32 %v3615_v35, %v581_v56  ;;  %v3624_v15 = vmul.f32 %v3621_v60, %v582_v55  ;;  %v603_v2 = vld [vmem:[%s1984_s15 + $0xae0] sm:$0xff]  ;;  %v605_v29 = vld [vmem:[%s1984_s15 + $0xaf0] sm:$0xff] }
 0x128   : > { %4909 = vst [vmem:[#allocation335_spill] sm:$0xff] %v3606_v47  ;;  %4913 = vst [vmem:[#allocation339_spill] sm:$0xff] %v3621_v60  ;;  %v604_v47 = vld [vmem:[%s1984_s15 + $0xae8] sm:$0xff]  ;;  %v606_v0 = vld [vmem:[%s1984_s15 + $0xaf8] sm:$0xff] }
 0x129   : > { %4912 = vst [vmem:[#allocation338_spill] sm:$0xff] %v3618_v36  ;;  %4914 = vst [vmem:[#allocation340_spill] sm:$0xff] %v3624_v15  ;;  %v3631_v42 = vld [vmem:[%s1990_s19 + $0x110] sm:$0xff]  ;;  %v3637_v36 = vld [vmem:[%s1990_s19 + $0x118] sm:$0xff] }
 0x12a   : > { %4915 = vst [vmem:[#allocation341_spill] sm:$0xff] %v3631_v42  ;;  %v3634_v56 = vmul.f32 %v3631_v42, %v583_v53  ;;  %4917 = vst [vmem:[#allocation343_spill] sm:$0xff] %v3637_v36  ;;  %v3640_v14 = vmul.f32 %v3637_v36, %v584_v34  ;;  %v3643_v55 = vld [vmem:[%s1990_s19 + $0x120] sm:$0xff]  ;;  %v3649_v60 = vld [vmem:[%s1990_s19 + $0x128] sm:$0xff] }
 0x12b   : > { %4919 = vst [vmem:[#allocation345_spill] sm:$0xff] %v3643_v55  ;;  %v3646_v15 = vmul.f32 %v3643_v55, %v585_v33  ;;  %4921 = vst [vmem:[#allocation347_spill] sm:$0xff] %v3649_v60  ;;  %v3653_v53 = vmul.f32 %v3649_v60, %v3471_v50  ;;  %v608_v42 = vld [vmem:[%s1984_s15 + $0xb08] sm:$0xff]  ;;  %v609_v34 = vld [vmem:[%s1984_s15 + $0xb10] sm:$0xff] }
 0x12c   : > { %4916 = vst [vmem:[#allocation342_spill] sm:$0xff] %v3634_v56  ;;  %4918 = vst [vmem:[#allocation344_spill] sm:$0xff] %v3640_v14  ;;  %v607_v56 = vld [vmem:[%s1984_s15 + $0xb00] sm:$0xff]  ;;  %v610_v14 = vld [vmem:[%s1984_s15 + $0xb18] sm:$0xff] }
 0x12d   : > { %4920 = vst [vmem:[#allocation346_spill] sm:$0xff] %v3646_v15  ;;  %4922 = vst [vmem:[#allocation348_spill] sm:$0xff] %v3653_v53  ;;  %v3660_v36 = vld [vmem:[%s1990_s19 + $0x130] sm:$0xff]  ;;  %v3667_v15 = vld [vmem:[%s1990_s19 + $0x138] sm:$0xff] }
 0x12e   : > { %4923 = vst [vmem:[#allocation349_spill] sm:$0xff] %v3660_v36  ;;  %v3664_v33 = vmul.f32 %v3660_v36, %v3486_v19  ;;  %4925 = vst [vmem:[#allocation351_spill] sm:$0xff] %v3667_v15  ;;  %v3671_v50 = vmul.f32 %v3667_v15, %v3489_v12  ;;  %v3674_v53 = vld [vmem:[%s1990_s19 + $0x140] sm:$0xff]  ;;  %v3681_v55 = vld [vmem:[%s1990_s19 + $0x148] sm:$0xff] }
 0x12f   : > { %4927 = vst [vmem:[#allocation353_spill] sm:$0xff] %v3674_v53  ;;  %v3678_v60 = vmul.f32 %v3674_v53, %v3492_v43  ;;  %4929 = vst [vmem:[#allocation355_spill] sm:$0xff] %v3681_v55  ;;  %v3685_v19 = vmul.f32 %v3681_v55, %v3495_v41  ;;  %v612_v12 = vld [vmem:[%s1984_s15 + $0xb28] sm:$0xff]  ;;  %v614_v15 = vld [vmem:[%s1984_s15 + $0xb38] sm:$0xff] }
 0x130   : > { %4924 = vst [vmem:[#allocation350_spill] sm:$0xff] %v3664_v33  ;;  %4926 = vst [vmem:[#allocation352_spill] sm:$0xff] %v3671_v50  ;;  %v611_v33 = vld [vmem:[%s1984_s15 + $0xb20] sm:$0xff]  ;;  %v613_v50 = vld [vmem:[%s1984_s15 + $0xb30] sm:$0xff] }
 0x131   : > { %4928 = vst [vmem:[#allocation354_spill] sm:$0xff] %v3678_v60  ;;  %4930 = vst [vmem:[#allocation356_spill] sm:$0xff] %v3685_v19  ;;  %v3692_v36 = vld [vmem:[%s1990_s19 + $0x150] sm:$0xff]  ;;  %v3699_v60 = vld [vmem:[%s1990_s19 + $0x158] sm:$0xff] }
 0x132   : > { %4931 = vst [vmem:[#allocation357_spill] sm:$0xff] %v3692_v36  ;;  %v3696_v43 = vmul.f32 %v3692_v36, %v3519_v10  ;;  %4933 = vst [vmem:[#allocation359_spill] sm:$0xff] %v3699_v60  ;;  %v3703_v41 = vmul.f32 %v3699_v60, %v3522_v38  ;;  %v3706_v19 = vld [vmem:[%s1990_s19 + $0x160] sm:$0xff]  ;;  %v3713_v53 = vld [vmem:[%s1990_s19 + $0x168] sm:$0xff] }
 0x133   : > { %4935 = vst [vmem:[#allocation361_spill] sm:$0xff] %v3706_v19  ;;  %v3710_v55 = vmul.f32 %v3706_v19, %v3525_v27  ;;  %4937 = vst [vmem:[#allocation363_spill] sm:$0xff] %v3713_v53  ;;  %v3717_v10 = vmul.f32 %v3713_v53, %v3528_v40  ;;  %v616_v36 = vld [vmem:[%s1984_s15 + $0xb48] sm:$0xff]  ;;  %v617_v38 = vld [vmem:[%s1984_s15 + $0xb50] sm:$0xff]  ;;  %v3746_v53 = vmul.f32 %v3157_v26, %v3564_v5 }
 0x134   : > { %4932 = vst [vmem:[#allocation358_spill] sm:$0xff] %v3696_v43  ;;  %4934 = vst [vmem:[#allocation360_spill] sm:$0xff] %v3703_v41  ;;  %v615_v43 = vld [vmem:[%s1984_s15 + $0xb40] sm:$0xff]  ;;  %v618_v41 = vld [vmem:[%s1984_s15 + $0xb58] sm:$0xff]  ;;  %v3766_v26 = vmul.f32 %v4870_v7, %v3600_v58 }
 0x135   : > { %4936 = vst [vmem:[#allocation362_spill] sm:$0xff] %v3710_v55  ;;  %4938 = vst [vmem:[#allocation364_spill] sm:$0xff] %v3717_v10  ;;  %v3724_v60 = vld [vmem:[%s1990_s19 + $0x170] sm:$0xff]  ;;  %v3731_v55 = vld [vmem:[%s1990_s19 + $0x178] sm:$0xff] }
 0x136   : > { %4939 = vst [vmem:[#allocation365_spill] sm:$0xff] %v3724_v60  ;;  %v3728_v27 = vmul.f32 %v3724_v60, %v3555_v25  ;;  %v3735_v19 = vmul.f32 %v3731_v55, %v3558_v31  ;;  %v3738_v40 = vld [vmem:[%s1990_s19 + $0x180] sm:$0xff]  ;;  %4943 = vst [vmem:[#allocation369_spill] sm:$0xff] %v3746_v53  ;;  %v621_v60 = vld [vmem:[%s1984_s15 + $0xb70] sm:$0xff]  ;;  %v3754_v31 = vmul.f32 %v4864_v28, %v3591_v3 }
 0x137   : > { %v3742_v10 = vmul.f32 %v3738_v40, %v3561_v45  ;;  %v619_v25 = vld [vmem:[%s1984_s15 + $0xb60] sm:$0xff]  ;;  %v622_v35 = vld [vmem:[%s1984_s15 + $0xb78] sm:$0xff]  ;;  %v3762_v45 = vmul.f32 %v4868_v11, %v3597_v13  ;;  %v625_v53 = vld [vmem:[%s1984_s15 + $0xb90] sm:$0xff]  ;;  %v3772_v28 = vmul.f32 %v4872_v24, %v603_v2  ;;  %v3781_v11 = vmul.f32 %v4878_v54, %v606_v0 }
 0x138   : > { %4940 = vst [vmem:[#allocation366_spill] sm:$0xff] %v3728_v27  ;;  %4941 = vst [vmem:[#allocation367_spill] sm:$0xff] %v3735_v19  ;;  %v620_v27 = vld [vmem:[%s1984_s15 + $0xb68] sm:$0xff]  ;;  %v3758_v19 = vmul.f32 %v4866_v21, %v3594_v51  ;;  %v623_v5 = vld [vmem:[%s1984_s15 + $0xb80] sm:$0xff]  ;;  %v3775_v21 = vmul.f32 %v4874_v57, %v604_v47  ;;  %v3778_v51 = vmul.f32 %v4876_v63, %v605_v29 }
 0x139   : > { %4942 = vst [vmem:[#allocation368_spill] sm:$0xff] %v3742_v10  ;;  %v624_v10 = vld [vmem:[%s1984_s15 + $0xb88] sm:$0xff]  ;;  %v626_v7 = vld [vmem:[%s1984_s15 + $0xb98] sm:$0xff]  ;;  %v627_v58 = vld [vmem:[%s1984_s15 + $0xba0] sm:$0xff]  ;;  %v3787_v13 = vmul.f32 %v4880_v46, %v607_v56  ;;  %v3790_v24 = vmul.f32 %v4882_v30, %v608_v42  ;;  %v3793_v57 = vmul.f32 %v4884_v9, %v609_v34  ;;  %v3796_v63 = vmul.f32 %v3241_v37, %v610_v14 }
 0x13a   : > { %v628_v3 = vld [vmem:[%s1984_s15 + $0xba8] sm:$0xff]  ;;  %v629_v54 = vld [vmem:[%s1984_s15 + $0xbb0] sm:$0xff]  ;;  %v630_v29 = vld [vmem:[%s1984_s15 + $0xbb8] sm:$0xff]  ;;  %v3802_v2 = vmul.f32 %v4887_v32, %v611_v33  ;;  %v3805_v46 = vmul.f32 %v4889_v23, %v612_v12  ;;  %v3808_v30 = vmul.f32 %v4891_v61, %v613_v50  ;;  %v3811_v9 = vmul.f32 %v3269_v4, %v614_v15 }
 0x13b   : > { %v631_v47 = vld [vmem:[%s1984_s15 + $0xbc0] sm:$0xff]  ;;  %v632_v37 = vld [vmem:[%s1984_s15 + $0xbc8] sm:$0xff]  ;;  %v633_v14 = vld [vmem:[%s1984_s15 + $0xbd0] sm:$0xff]  ;;  %v3817_v0 = vmul.f32 %v4894_v62, %v615_v43  ;;  %v3820_v32 = vmul.f32 %v4896_v18, %v616_v36  ;;  %v3823_v23 = vmul.f32 %v3501_v6, %v617_v38  ;;  %v3826_v61 = vmul.f32 %v3507_v52, %v618_v41 }
 0x13c   : > { %v634_v42 = vld [vmem:[%s1984_s15 + $0xbd8] sm:$0xff]  ;;  %v635_v4 = vld [vmem:[%s1984_s15 + $0xbe0] sm:$0xff]  ;;  %v636_v15 = vld [vmem:[%s1984_s15 + $0xbe8] sm:$0xff]  ;;  %v3832_v34 = vmul.f32 %v3513_v22, %v619_v25  ;;  %v3835_v62 = vmul.f32 %v3531_v20, %v620_v27  ;;  %v3838_v36 = vmul.f32 %v3537_v44, %v621_v60  ;;  %v3841_v18 = vmul.f32 %v3543_v39, %v622_v35 }
 0x13d   : > { %v637_v56 = vld [vmem:[%s1984_s15 + $0xbf0] sm:$0xff]  ;;  %v638_v52 = vld [vmem:[%s1984_s15 + $0xbf8] sm:$0xff]  ;;  %v639_v6 = vld [vmem:[%s1984_s15 + $0xc00] sm:$0xff]  ;;  %v3847_v50 = vmul.f32 %v3549_v8, %v623_v5  ;;  %v3850_v22 = vmul.f32 %v3567_v17, %v624_v10  ;;  %v3853_v20 = vmul.f32 %v3573_v16, %v625_v53  ;;  %v3856_v44 = vmul.f32 %v3579_v49, %v626_v7 }
 0x13e   : > { %v640_v33 = vld [vmem:[%s1984_s15 + $0xc08] sm:$0xff]  ;;  %v641_v60 = vld [vmem:[%s1984_s15 + $0xc10] sm:$0xff]  ;;  %v642_v35 = vld [vmem:[%s1984_s15 + $0xc18] sm:$0xff]  ;;  %v3862_v12 = vmul.f32 %v3585_v59, %v627_v58  ;;  %v3865_v43 = vmul.f32 %v3603_v1, %v628_v3  ;;  %v3868_v8 = vmul.f32 %v3609_v48, %v629_v54 }
 0x13f   : > { %v643_v39 = vld [vmem:[%s1984_s15 + $0xc20] sm:$0xff]  ;;  %v644_v16 = vld [vmem:[%s1984_s15 + $0xc28] sm:$0xff]  ;;  %v645_v53 = vld [vmem:[%s1984_s15 + $0xc30] sm:$0xff] }
 0x140   : > { %v4944_v17 = vld [vmem:[#allocation337_spill] sm:$0xff]  ;;  %v646_v10 = vld [vmem:[%s1984_s15 + $0xc38] sm:$0xff]  ;;  %v4945_v49 = vld [vmem:[#allocation339_spill] sm:$0xff] }
 0x141   : > { %v3871_v41 = vmul.f32 %v4944_v17, %v630_v29  ;;  %v3877_v38 = vmul.f32 %v4945_v49, %v631_v47  ;;  %v4946_v27 = vld [vmem:[#allocation341_spill] sm:$0xff]  ;;  %v4947_v59 = vld [vmem:[#allocation343_spill] sm:$0xff] }
 0x142   : > { %v3880_v25 = vmul.f32 %v4946_v27, %v632_v37  ;;  %v3883_v5 = vmul.f32 %v4947_v59, %v633_v14  ;;  %v4948_v1 = vld [vmem:[#allocation345_spill] sm:$0xff]  ;;  %v4949_v48 = vld [vmem:[#allocation347_spill] sm:$0xff] }
 0x143   : > { %v3886_v7 = vmul.f32 %v4948_v1, %v634_v42  ;;  %v3889_v58 = vmul.f32 %v4949_v48, %v635_v4  ;;  %v4950_v3 = vld [vmem:[#allocation349_spill] sm:$0xff]  ;;  %v4952_v29 = vld [vmem:[#allocation351_spill] sm:$0xff] }
 0x144   : > { %v3892_v54 = vmul.f32 %v4950_v3, %v636_v15  ;;  %v3895_v17 = vmul.f32 %v4952_v29, %v637_v56  ;;  %v4954_v47 = vld [vmem:[#allocation353_spill] sm:$0xff]  ;;  %v4956_v37 = vld [vmem:[#allocation355_spill] sm:$0xff] }
 0x145   : > { %v3898_v49 = vmul.f32 %v4954_v47, %v638_v52  ;;  %v3901_v27 = vmul.f32 %v4956_v37, %v639_v6  ;;  %v4958_v14 = vld [vmem:[#allocation357_spill] sm:$0xff]  ;;  %v4960_v42 = vld [vmem:[#allocation359_spill] sm:$0xff]  ;;  %v3919_v52 = vmul.f32 %v3731_v55, %v645_v53  ;;  %v3922_v6 = vmul.f32 %v3738_v40, %v646_v10  ;;  %v4971_v47 = vld [vmem:[#allocation22_spill] sm:$0xff] }
 0x146   : > { %4951 = vst [vmem:[#allocation337_spill] sm:$0xff] %v3892_v54  ;;  %4953 = vst [vmem:[#allocation339_spill] sm:$0xff] %v3895_v17  ;;  %v3904_v59 = vmul.f32 %v4958_v14, %v640_v33  ;;  %v3907_v1 = vmul.f32 %v4960_v42, %v641_v60  ;;  %v4962_v4 = vld [vmem:[#allocation361_spill] sm:$0xff]  ;;  %v4964_v15 = vld [vmem:[#allocation363_spill] sm:$0xff] }
 0x147   : > { %4955 = vst [vmem:[#allocation341_spill] sm:$0xff] %v3898_v49  ;;  %4957 = vst [vmem:[#allocation343_spill] sm:$0xff] %v3901_v27  ;;  %v3910_v48 = vmul.f32 %v4962_v4, %v642_v35  ;;  %v3913_v3 = vmul.f32 %v4964_v15, %v643_v39  ;;  %v4966_v56 = vld [vmem:[#allocation365_spill] sm:$0xff]  ;;  %v4970_v33 = vld [vmem:[#allocation15_spill] sm:$0xff] }
 0x148   : > { %4959 = vst [vmem:[#allocation345_spill] sm:$0xff] %v3904_v59  ;;  %4961 = vst [vmem:[#allocation347_spill] sm:$0xff] %v3907_v1  ;;  %v3916_v29 = vmul.f32 %v4966_v56, %v644_v16  ;;  %v1088_v37 = vadd.f32 %v4971_v47, %v4970_v33  ;;  %v4972_v60 = vld [vmem:[#allocation16_spill] sm:$0xff]  ;;  %v4973_v14 = vld [vmem:[#allocation25_spill] sm:$0xff] }
 0x149   : > { %4963 = vst [vmem:[#allocation349_spill] sm:$0xff] %v3910_v48  ;;  %4965 = vst [vmem:[#allocation351_spill] sm:$0xff] %v3913_v3  ;;  %v1142_v42 = vadd.f32 %v4973_v14, %v4972_v60  ;;  %v4974_v35 = vld [vmem:[#allocation17_spill] sm:$0xff]  ;;  %v4975_v4 = vld [vmem:[#allocation143_spill] sm:$0xff] }
 0x14a   : > { %4967 = vst [vmem:[#allocation353_spill] sm:$0xff] %v3916_v29  ;;  %4968 = vst [vmem:[#allocation355_spill] sm:$0xff] %v3919_v52  ;;  %v1196_v48 = vadd.f32 %v4975_v4, %v4974_v35  ;;  %v4976_v39 = vld [vmem:[#allocation18_spill] sm:$0xff]  ;;  %v4977_v15 = vld [vmem:[#allocation12_spill] sm:$0xff] }
 0x14b   : > { %4969 = vst [vmem:[#allocation357_spill] sm:$0xff] %v3922_v6  ;;  %v1250_v3 = vadd.f32 %v4977_v15, %v4976_v39  ;;  %v4978_v16 = vld [vmem:[#allocation11_spill] sm:$0xff]  ;;  %v4979_v56 = vld [vmem:[#allocation228_spill] sm:$0xff]  ;;  %v4981_v53 = vld [vmem:[#allocation258_spill] sm:$0xff] }
 0x14c   : > { %v1304_v29 = vadd.f32 %v4979_v56, %v4978_v16  ;;  %v4980_v55 = vld [vmem:[#allocation256_spill] sm:$0xff]  ;;  %v4982_v40 = vld [vmem:[#allocation321_spill] sm:$0xff]  ;;  %v4985_v47 = vld [vmem:[#allocation23_spill] sm:$0xff] }
 0x14d   : > { %v1358_v52 = vadd.f32 %v4981_v53, %v4980_v55  ;;  %v4983_v10 = vld [vmem:[#allocation257_spill] sm:$0xff]  ;;  %v1089_v60 = vadd.f32 %v1088_v37, %v4985_v47  ;;  %v4986_v14 = vld [vmem:[#allocation32_spill] sm:$0xff]  ;;  %v4988_v27 = vld [vmem:[#allocation186_spill] sm:$0xff] }
 0x14e   : > { %v1412_v6 = vadd.f32 %v4983_v10, %v4982_v40  ;;  %v4984_v1 = vld [vmem:[#allocation369_spill] sm:$0xff]  ;;  %v1143_v59 = vadd.f32 %v1142_v42, %v4986_v14  ;;  %v4987_v35 = vld [vmem:[#allocation144_spill] sm:$0xff]  ;;  %v1251_v39 = vadd.f32 %v1250_v3, %v4988_v27  ;;  %v4991_v17 = vld [vmem:[#allocation259_spill] sm:$0xff] }
 0x14f   : > { %v1466_v33 = vadd.f32 %v3754_v31, %v4984_v1  ;;  %v1197_v4 = vadd.f32 %v1196_v48, %v4987_v35  ;;  %v4989_v15 = vld [vmem:[#allocation13_spill] sm:$0xff]  ;;  %v4990_v16 = vld [vmem:[#allocation260_spill] sm:$0xff]  ;;  %v4993_v54 = vld [vmem:[#allocation39_spill] sm:$0xff] }
 0x150   : > { %v1305_v49 = vadd.f32 %v1304_v29, %v4989_v15  ;;  %v1359_v56 = vadd.f32 %v1358_v52, %v4990_v16  ;;  %v1413_v55 = vadd.f32 %v1412_v6, %v4991_v17  ;;  %v4992_v40 = vld [vmem:[#allocation24_spill] sm:$0xff]  ;;  %v1144_v31 = vadd.f32 %v1143_v59, %v4993_v54  ;;  %v4994_v1 = vld [vmem:[#allocation145_spill] sm:$0xff]  ;;  %v4995_v47 = vld [vmem:[#allocation187_spill] sm:$0xff] }
 0x151   : > { %v1467_v53 = vadd.f32 %v1466_v33, %v3758_v19  ;;  %v1090_v10 = vadd.f32 %v1089_v60, %v4992_v40  ;;  %v1198_v37 = vadd.f32 %v1197_v4, %v4994_v1  ;;  %v1252_v42 = vadd.f32 %v1251_v39, %v4995_v47  ;;  %v4996_v14 = vld [vmem:[#allocation14_spill] sm:$0xff]  ;;  %v4998_v3 = vld [vmem:[#allocation261_spill] sm:$0xff]  ;;  %v5002_v16 = vld [vmem:[#allocation188_spill] sm:$0xff] }
 0x152   : > { %v1306_v48 = vadd.f32 %v1305_v49, %v4996_v14  ;;  %v4997_v35 = vld [vmem:[#allocation262_spill] sm:$0xff]  ;;  %v1414_v29 = vadd.f32 %v1413_v55, %v4998_v3  ;;  %v4999_v15 = vld [vmem:[#allocation29_spill] sm:$0xff]  ;;  %v5003_v59 = vld [vmem:[#allocation19_spill] sm:$0xff] }
 0x153   : > { %v1360_v27 = vadd.f32 %v1359_v56, %v4997_v35  ;;  %v1468_v52 = vadd.f32 %v1467_v53, %v3762_v45  ;;  %v1091_v17 = vadd.f32 %v1090_v10, %v4999_v15  ;;  %v5000_v6 = vld [vmem:[#allocation45_spill] sm:$0xff]  ;;  %v5001_v33 = vld [vmem:[#allocation146_spill] sm:$0xff]  ;;  %v1253_v54 = vadd.f32 %v1252_v42, %v5002_v16  ;;  %v5004_v40 = vld [vmem:[#allocation264_spill] sm:$0xff] }
 0x154   : > { %v1145_v19 = vadd.f32 %v1144_v31, %v5000_v6  ;;  %v1199_v60 = vadd.f32 %v1198_v37, %v5001_v33  ;;  %v1307_v4 = vadd.f32 %v1306_v48, %v5003_v59  ;;  %v5005_v1 = vld [vmem:[#allocation263_spill] sm:$0xff]  ;;  %v5006_v47 = vld [vmem:[#allocation30_spill] sm:$0xff]  ;;  %v5007_v14 = vld [vmem:[#allocation49_spill] sm:$0xff] }
 0x155   : > { %v1361_v39 = vadd.f32 %v1360_v27, %v5004_v40  ;;  %v1415_v49 = vadd.f32 %v1414_v29, %v5005_v1  ;;  %v1469_v56 = vadd.f32 %v1468_v52, %v3766_v26  ;;  %v1092_v55 = vadd.f32 %v1091_v17, %v5006_v47  ;;  %v5008_v53 = vld [vmem:[#allocation147_spill] sm:$0xff]  ;;  %v5009_v35 = vld [vmem:[#allocation20_spill] sm:$0xff]  ;;  %v5010_v3 = vld [vmem:[#allocation229_spill] sm:$0xff] }
 0x156   : > { %v1146_v45 = vadd.f32 %v1145_v19, %v5007_v14  ;;  %v1200_v10 = vadd.f32 %v1199_v60, %v5008_v53  ;;  %v1254_v31 = vadd.f32 %v1253_v54, %v5009_v35  ;;  %v1308_v37 = vadd.f32 %v1307_v4, %v5010_v3  ;;  %v5011_v15 = vld [vmem:[#allocation266_spill] sm:$0xff]  ;;  %v5012_v6 = vld [vmem:[#allocation265_spill] sm:$0xff]  ;;  %v5013_v33 = vld [vmem:[#allocation31_spill] sm:$0xff] }
 0x157   : > { %v1362_v42 = vadd.f32 %v1361_v39, %v5011_v15  ;;  %v1416_v48 = vadd.f32 %v1415_v49, %v5012_v6  ;;  %v1470_v27 = vadd.f32 %v1469_v56, %v3772_v28  ;;  %v1093_v29 = vadd.f32 %v1092_v55, %v5013_v33  ;;  %v5014_v16 = vld [vmem:[#allocation53_spill] sm:$0xff]  ;;  %v5015_v52 = vld [vmem:[#allocation148_spill] sm:$0xff]  ;;  %v5017_v40 = vld [vmem:[#allocation230_spill] sm:$0xff] }
 0x158   : > { %v1147_v26 = vadd.f32 %v1146_v45, %v5014_v16  ;;  %v1201_v17 = vadd.f32 %v1200_v10, %v5015_v52  ;;  %v5016_v59 = vld [vmem:[#allocation21_spill] sm:$0xff]  ;;  %v1309_v60 = vadd.f32 %v1308_v37, %v5017_v40  ;;  %v5018_v1 = vld [vmem:[#allocation268_spill] sm:$0xff]  ;;  %v5019_v47 = vld [vmem:[#allocation267_spill] sm:$0xff] }
 0x159   : > { %v1255_v19 = vadd.f32 %v1254_v31, %v5016_v59  ;;  %v1363_v54 = vadd.f32 %v1362_v42, %v5018_v1  ;;  %v1417_v4 = vadd.f32 %v1416_v48, %v5019_v47  ;;  %v1471_v39 = vadd.f32 %v1470_v27, %v3775_v21  ;;  %v5020_v14 = vld [vmem:[#allocation36_spill] sm:$0xff]  ;;  %v5021_v53 = vld [vmem:[#allocation57_spill] sm:$0xff]  ;;  %v5023_v35 = vld [vmem:[#allocation26_spill] sm:$0xff] }
 0x15a   : > { %v1094_v49 = vadd.f32 %v1093_v29, %v5020_v14  ;;  %v1148_v28 = vadd.f32 %v1147_v26, %v5021_v53  ;;  %v5022_v56 = vld [vmem:[#allocation149_spill] sm:$0xff]  ;;  %v5024_v3 = vld [vmem:[#allocation231_spill] sm:$0xff]  ;;  %v5025_v15 = vld [vmem:[#allocation270_spill] sm:$0xff] }
 0x15b   : > { %v1202_v55 = vadd.f32 %v1201_v17, %v5022_v56  ;;  %v1256_v45 = vadd.f32 %v1255_v19, %v5023_v35  ;;  %v1310_v10 = vadd.f32 %v1309_v60, %v5024_v3  ;;  %v1364_v31 = vadd.f32 %v1363_v54, %v5025_v15  ;;  %v5026_v6 = vld [vmem:[#allocation269_spill] sm:$0xff]  ;;  %v5029_v27 = vld [vmem:[#allocation150_spill] sm:$0xff]  ;;  %v5031_v59 = vld [vmem:[#allocation27_spill] sm:$0xff] }
 0x15c   : > { %v1418_v37 = vadd.f32 %v1417_v4, %v5026_v6  ;;  %v1472_v42 = vadd.f32 %v1471_v39, %v3778_v51  ;;  %v5027_v33 = vld [vmem:[#allocation37_spill] sm:$0xff]  ;;  %v5032_v40 = vld [vmem:[#allocation272_spill] sm:$0xff]  ;;  %v5033_v1 = vld [vmem:[#allocation271_spill] sm:$0xff] }
 0x15d   : > { %v1095_v48 = vadd.f32 %v1094_v49, %v5027_v33  ;;  %v5028_v16 = vld [vmem:[#allocation61_spill] sm:$0xff]  ;;  %v1203_v29 = vadd.f32 %v1202_v55, %v5029_v27  ;;  %v1311_v17 = vadd.f32 %v1310_v10, %v5031_v59  ;;  %v1365_v19 = vadd.f32 %v1364_v31, %v5032_v40  ;;  %v5034_v47 = vld [vmem:[#allocation38_spill] sm:$0xff]  ;;  %v5036_v39 = vld [vmem:[#allocation28_spill] sm:$0xff] }
 0x15e   : > { %v1149_v21 = vadd.f32 %v1148_v28, %v5028_v16  ;;  %v5030_v52 = vld [vmem:[#allocation189_spill] sm:$0xff]  ;;  %v1419_v60 = vadd.f32 %v1418_v37, %v5033_v1  ;;  %v1473_v54 = vadd.f32 %v1472_v42, %v3781_v11  ;;  %v5035_v14 = vld [vmem:[#allocation66_spill] sm:$0xff]  ;;  %v5038_v56 = vld [vmem:[#allocation232_spill] sm:$0xff] }
 0x15f   : > { %v1257_v26 = vadd.f32 %v1256_v45, %v5030_v52  ;;  %v1096_v4 = vadd.f32 %v1095_v48, %v5034_v47  ;;  %v1204_v49 = vadd.f32 %v1203_v29, %v5036_v39  ;;  %v5037_v53 = vld [vmem:[#allocation190_spill] sm:$0xff]  ;;  %v1312_v55 = vadd.f32 %v1311_v17, %v5038_v56  ;;  %v5040_v3 = vld [vmem:[#allocation273_spill] sm:$0xff]  ;;  %v5042_v37 = vld [vmem:[#allocation71_spill] sm:$0xff] }
 0x160   : > { %v1150_v51 = vadd.f32 %v1149_v21, %v5035_v14  ;;  %v5039_v35 = vld [vmem:[#allocation274_spill] sm:$0xff]  ;;  %v1420_v10 = vadd.f32 %v1419_v60, %v5040_v3  ;;  %v1474_v15 = vadd.f32 %v1473_v54, %v3787_v13  ;;  %v5043_v42 = vld [vmem:[#allocation33_spill] sm:$0xff]  ;;  %v5044_v48 = vld [vmem:[#allocation191_spill] sm:$0xff] }
 0x161   : > { %v1258_v28 = vadd.f32 %v1257_v26, %v5037_v53  ;;  %v1366_v45 = vadd.f32 %v1365_v19, %v5039_v35  ;;  %v5041_v31 = vld [vmem:[#allocation42_spill] sm:$0xff]  ;;  %v1205_v33 = vadd.f32 %v1204_v49, %v5043_v42  ;;  %v5045_v21 = vld [vmem:[#allocation233_spill] sm:$0xff]  ;;  %v5046_v29 = vld [vmem:[#allocation276_spill] sm:$0xff] }
 0x162   : > { %v1097_v6 = vadd.f32 %v1096_v4, %v5041_v31  ;;  %v1151_v11 = vadd.f32 %v1150_v51, %v5042_v37  ;;  %v1313_v27 = vadd.f32 %v1312_v55, %v5045_v21  ;;  %v5047_v26 = vld [vmem:[#allocation275_spill] sm:$0xff]  ;;  %v1475_v17 = vadd.f32 %v1474_v15, %v3790_v24  ;;  %v5049_v1 = vld [vmem:[#allocation78_spill] sm:$0xff]  ;;  %v5051_v47 = vld [vmem:[#allocation192_spill] sm:$0xff] }
 0x163   : > { %v1259_v16 = vadd.f32 %v1258_v28, %v5044_v48  ;;  %v1367_v52 = vadd.f32 %v1366_v45, %v5046_v29  ;;  %v1421_v59 = vadd.f32 %v1420_v10, %v5047_v26  ;;  %v5048_v40 = vld [vmem:[#allocation43_spill] sm:$0xff]  ;;  %v5050_v60 = vld [vmem:[#allocation34_spill] sm:$0xff]  ;;  %v5054_v53 = vld [vmem:[#allocation277_spill] sm:$0xff] }
 0x164   : > { %v1098_v19 = vadd.f32 %v1097_v6, %v5048_v40  ;;  %v1152_v13 = vadd.f32 %v1151_v11, %v5049_v1  ;;  %v1206_v54 = vadd.f32 %v1205_v33, %v5050_v60  ;;  %v5052_v14 = vld [vmem:[#allocation234_spill] sm:$0xff]  ;;  %v1476_v56 = vadd.f32 %v1475_v17, %v3793_v57  ;;  %v5055_v55 = vld [vmem:[#allocation44_spill] sm:$0xff]  ;;  %v5056_v45 = vld [vmem:[#allocation85_spill] sm:$0xff] }
 0x165   : > { %v1260_v4 = vadd.f32 %v1259_v16, %v5051_v47  ;;  %v1314_v51 = vadd.f32 %v1313_v27, %v5052_v14  ;;  %v5053_v39 = vld [vmem:[#allocation278_spill] sm:$0xff]  ;;  %v1422_v28 = vadd.f32 %v1421_v59, %v5054_v53  ;;  %v5057_v3 = vld [vmem:[#allocation151_spill] sm:$0xff]  ;;  %v5063_v29 = vld [vmem:[#allocation92_spill] sm:$0xff] }
 0x166   : > { %v1368_v49 = vadd.f32 %v1367_v52, %v5053_v39  ;;  %v1099_v35 = vadd.f32 %v1098_v19, %v5055_v55  ;;  %v1153_v24 = vadd.f32 %v1152_v13, %v5056_v45  ;;  %v1207_v10 = vadd.f32 %v1206_v54, %v5057_v3  ;;  %v5058_v15 = vld [vmem:[#allocation35_spill] sm:$0xff]  ;;  %v5061_v33 = vld [vmem:[#allocation322_spill] sm:$0xff]  ;;  %v5064_v52 = vld [vmem:[#allocation40_spill] sm:$0xff] }
 0x167   : > { %v1261_v31 = vadd.f32 %v1260_v4, %v5058_v15  ;;  %v5059_v6 = vld [vmem:[#allocation235_spill] sm:$0xff]  ;;  %v1423_v48 = vadd.f32 %v1422_v28, %v5061_v33  ;;  %v1477_v16 = vadd.f32 %v1476_v56, %v3796_v63  ;;  %v5062_v21 = vld [vmem:[#allocation46_spill] sm:$0xff]  ;;  %v5065_v59 = vld [vmem:[#allocation193_spill] sm:$0xff] }
 0x168   : > { %v1315_v37 = vadd.f32 %v1314_v51, %v5059_v6  ;;  %v5060_v11 = vld [vmem:[#allocation279_spill] sm:$0xff]  ;;  %v1100_v27 = vadd.f32 %v1099_v35, %v5062_v21  ;;  %v1154_v57 = vadd.f32 %v1153_v24, %v5063_v29  ;;  %v1208_v26 = vadd.f32 %v1207_v10, %v5064_v52  ;;  %v5066_v40 = vld [vmem:[#allocation236_spill] sm:$0xff]  ;;  %v5067_v1 = vld [vmem:[#allocation281_spill] sm:$0xff] }
 0x169   : > { %v1369_v42 = vadd.f32 %v1368_v49, %v5060_v11  ;;  %v1262_v17 = vadd.f32 %v1261_v31, %v5065_v59  ;;  %v5068_v60 = vld [vmem:[#allocation280_spill] sm:$0xff]  ;;  %v1478_v47 = vadd.f32 %v1477_v16, %v3802_v2  ;;  %v5069_v4 = vld [vmem:[#allocation47_spill] sm:$0xff]  ;;  %v5071_v39 = vld [vmem:[#allocation41_spill] sm:$0xff] }
 0x16a   : > { %v1316_v19 = vadd.f32 %v1315_v37, %v5066_v40  ;;  %v1424_v54 = vadd.f32 %v1423_v48, %v5068_v60  ;;  %v1101_v14 = vadd.f32 %v1100_v27, %v5069_v4  ;;  %v5070_v51 = vld [vmem:[#allocation99_spill] sm:$0xff]  ;;  %v1209_v49 = vadd.f32 %v1208_v26, %v5071_v39  ;;  %v5072_v53 = vld [vmem:[#allocation194_spill] sm:$0xff]  ;;  %v5073_v56 = vld [vmem:[#allocation237_spill] sm:$0xff] }
 0x16b   : > { %v1370_v13 = vadd.f32 %v1369_v42, %v5067_v1  ;;  %v1155_v63 = vadd.f32 %v1154_v57, %v5070_v51  ;;  %v1263_v28 = vadd.f32 %v1262_v17, %v5072_v53  ;;  %v5074_v35 = vld [vmem:[#allocation283_spill] sm:$0xff]  ;;  %v5075_v24 = vld [vmem:[#allocation282_spill] sm:$0xff]  ;;  %v1479_v10 = vadd.f32 %v1478_v47, %v3805_v46  ;;  %v5076_v15 = vld [vmem:[#allocation48_spill] sm:$0xff] }
 0x16c   : > { %v1317_v55 = vadd.f32 %v1316_v19, %v5073_v56  ;;  %v1425_v3 = vadd.f32 %v1424_v54, %v5075_v24  ;;  %v1102_v31 = vadd.f32 %v1101_v14, %v5076_v15  ;;  %v5077_v6 = vld [vmem:[#allocation106_spill] sm:$0xff]  ;;  %v5078_v37 = vld [vmem:[#allocation152_spill] sm:$0xff]  ;;  %v5079_v42 = vld [vmem:[#allocation195_spill] sm:$0xff] }
 0x16d   : > { %v1371_v45 = vadd.f32 %v1370_v13, %v5074_v35  ;;  %v1156_v2 = vadd.f32 %v1155_v63, %v5077_v6  ;;  %v1210_v11 = vadd.f32 %v1209_v49, %v5078_v37  ;;  %v1264_v33 = vadd.f32 %v1263_v28, %v5079_v42  ;;  %v5080_v48 = vld [vmem:[#allocation238_spill] sm:$0xff]  ;;  %v5081_v21 = vld [vmem:[#allocation285_spill] sm:$0xff]  ;;  %v5082_v29 = vld [vmem:[#allocation284_spill] sm:$0xff] }
 0x16e   : > { %v1318_v16 = vadd.f32 %v1317_v55, %v5080_v48  ;;  %v1426_v57 = vadd.f32 %v1425_v3, %v5082_v29  ;;  %v1480_v52 = vadd.f32 %v1479_v10, %v3808_v30  ;;  %v5083_v26 = vld [vmem:[#allocation50_spill] sm:$0xff]  ;;  %v5085_v40 = vld [vmem:[#allocation153_spill] sm:$0xff]  ;;  %v5086_v1 = vld [vmem:[#allocation196_spill] sm:$0xff] }
 0x16f   : > { %v1372_v27 = vadd.f32 %v1371_v45, %v5081_v21  ;;  %v1103_v59 = vadd.f32 %v1102_v31, %v5083_v26  ;;  %v5084_v17 = vld [vmem:[#allocation110_spill] sm:$0xff]  ;;  %v1211_v19 = vadd.f32 %v1210_v11, %v5085_v40  ;;  %v1265_v13 = vadd.f32 %v1264_v33, %v5086_v1  ;;  %v5087_v60 = vld [vmem:[#allocation239_spill] sm:$0xff]  ;;  %v5093_v55 = vld [vmem:[#allocation197_spill] sm:$0xff] }
 0x170   : > { %v1157_v46 = vadd.f32 %v1156_v2, %v5084_v17  ;;  %v1319_v54 = vadd.f32 %v1318_v16, %v5087_v60  ;;  %v5088_v47 = vld [vmem:[#allocation286_spill] sm:$0xff]  ;;  %v5089_v14 = vld [vmem:[#allocation323_spill] sm:$0xff]  ;;  %v1481_v63 = vadd.f32 %v1480_v52, %v3811_v9  ;;  %v5094_v45 = vld [vmem:[#allocation240_spill] sm:$0xff] }
 0x171   : > { %v1373_v4 = vadd.f32 %v1372_v27, %v5088_v47  ;;  %v1427_v51 = vadd.f32 %v1426_v57, %v5089_v14  ;;  %v5090_v39 = vld [vmem:[#allocation51_spill] sm:$0xff]  ;;  %v5092_v28 = vld [vmem:[#allocation154_spill] sm:$0xff]  ;;  %v1266_v35 = vadd.f32 %v1265_v13, %v5093_v55  ;;  %v5095_v3 = vld [vmem:[#allocation288_spill] sm:$0xff] }
 0x172   : > { %v1104_v49 = vadd.f32 %v1103_v59, %v5090_v39  ;;  %v5091_v53 = vld [vmem:[#allocation111_spill] sm:$0xff]  ;;  %v1212_v56 = vadd.f32 %v1211_v19, %v5092_v28  ;;  %v1320_v24 = vadd.f32 %v1319_v54, %v5094_v45  ;;  %v1482_v6 = vadd.f32 %v1481_v63, %v3817_v0  ;;  %v5097_v2 = vld [vmem:[#allocation52_spill] sm:$0xff]  ;;  %v5100_v48 = vld [vmem:[#allocation198_spill] sm:$0xff] }
 0x173   : > { %v1158_v30 = vadd.f32 %v1157_v46, %v5091_v53  ;;  %v1374_v10 = vadd.f32 %v1373_v4, %v5095_v3  ;;  %v5096_v15 = vld [vmem:[#allocation287_spill] sm:$0xff]  ;;  %v5098_v11 = vld [vmem:[#allocation112_spill] sm:$0xff]  ;;  %v1267_v16 = vadd.f32 %v1266_v35, %v5100_v48  ;;  %v5101_v21 = vld [vmem:[#allocation241_spill] sm:$0xff] }
 0x174   : > { %v1428_v31 = vadd.f32 %v1427_v51, %v5096_v15  ;;  %v1105_v37 = vadd.f32 %v1104_v49, %v5097_v2  ;;  %v5099_v42 = vld [vmem:[#allocation155_spill] sm:$0xff]  ;;  %v1321_v27 = vadd.f32 %v1320_v24, %v5101_v21  ;;  %v5102_v29 = vld [vmem:[#allocation290_spill] sm:$0xff]  ;;  %v5103_v52 = vld [vmem:[#allocation289_spill] sm:$0xff]  ;;  %v1483_v59 = vadd.f32 %v1482_v6, %v3820_v32 }
 0x175   : > { %v1159_v9 = vadd.f32 %v1158_v30, %v5098_v11  ;;  %v1213_v33 = vadd.f32 %v1212_v56, %v5099_v42  ;;  %v1375_v57 = vadd.f32 %v1374_v10, %v5102_v29  ;;  %v5104_v17 = vld [vmem:[#allocation54_spill] sm:$0xff]  ;;  %v5105_v40 = vld [vmem:[#allocation113_spill] sm:$0xff]  ;;  %v5106_v19 = vld [vmem:[#allocation156_spill] sm:$0xff] }
 0x176   : > { %v1429_v26 = vadd.f32 %v1428_v31, %v5103_v52  ;;  %v1106_v46 = vadd.f32 %v1105_v37, %v5104_v17  ;;  %v5107_v13 = vld [vmem:[#allocation199_spill] sm:$0xff]  ;;  %v5108_v54 = vld [vmem:[#allocation242_spill] sm:$0xff]  ;;  %v5110_v51 = vld [vmem:[#allocation324_spill] sm:$0xff]  ;;  %v1484_v39 = vadd.f32 %v1483_v59, %v3823_v23 }
 0x177   : > { %v1160_v0 = vadd.f32 %v1159_v9, %v5105_v40  ;;  %v1214_v1 = vadd.f32 %v1213_v33, %v5106_v19  ;;  %v1268_v60 = vadd.f32 %v1267_v16, %v5107_v13  ;;  %v1322_v47 = vadd.f32 %v1321_v27, %v5108_v54  ;;  %v5109_v4 = vld [vmem:[#allocation291_spill] sm:$0xff]  ;;  %v5112_v30 = vld [vmem:[#allocation114_spill] sm:$0xff]  ;;  %v5113_v28 = vld [vmem:[#allocation157_spill] sm:$0xff] }
 0x178   : > { %v1376_v14 = vadd.f32 %v1375_v57, %v5109_v4  ;;  %v1430_v63 = vadd.f32 %v1429_v26, %v5110_v51  ;;  %v5111_v49 = vld [vmem:[#allocation55_spill] sm:$0xff]  ;;  %v5114_v55 = vld [vmem:[#allocation200_spill] sm:$0xff]  ;;  %v5117_v15 = vld [vmem:[#allocation325_spill] sm:$0xff]  ;;  %v1485_v6 = vadd.f32 %v1484_v39, %v3826_v61 }
 0x179   : > { %v1107_v53 = vadd.f32 %v1106_v46, %v5111_v49  ;;  %v1161_v32 = vadd.f32 %v1160_v0, %v5112_v30  ;;  %v1215_v56 = vadd.f32 %v1214_v1, %v5113_v28  ;;  %v1269_v35 = vadd.f32 %v1268_v60, %v5114_v55  ;;  %v5115_v45 = vld [vmem:[#allocation243_spill] sm:$0xff]  ;;  %v5116_v3 = vld [vmem:[#allocation292_spill] sm:$0xff]  ;;  %v5120_v9 = vld [vmem:[#allocation158_spill] sm:$0xff] }
 0x17a   : > { %v1323_v24 = vadd.f32 %v1322_v47, %v5115_v45  ;;  %v1377_v10 = vadd.f32 %v1376_v14, %v5116_v3  ;;  %v1431_v31 = vadd.f32 %v1430_v63, %v5117_v15  ;;  %v5118_v2 = vld [vmem:[#allocation56_spill] sm:$0xff]  ;;  %v5119_v11 = vld [vmem:[#allocation115_spill] sm:$0xff]  ;;  %v5121_v33 = vld [vmem:[#allocation201_spill] sm:$0xff]  ;;  %v1486_v26 = vadd.f32 %v1485_v6, %v3832_v34 }
 0x17b   : > { %v1108_v37 = vadd.f32 %v1107_v53, %v5118_v2  ;;  %v1162_v23 = vadd.f32 %v1161_v32, %v5119_v11  ;;  %v1216_v42 = vadd.f32 %v1215_v56, %v5120_v9  ;;  %v1270_v48 = vadd.f32 %v1269_v35, %v5121_v33  ;;  %v5122_v16 = vld [vmem:[#allocation244_spill] sm:$0xff]  ;;  %v5123_v27 = vld [vmem:[#allocation293_spill] sm:$0xff]  ;;  %v5124_v57 = vld [vmem:[#allocation326_spill] sm:$0xff] }
 0x17c   : > { %v1324_v21 = vadd.f32 %v1323_v24, %v5122_v16  ;;  %v1378_v29 = vadd.f32 %v1377_v10, %v5123_v27  ;;  %v1432_v52 = vadd.f32 %v1431_v31, %v5124_v57  ;;  %v5125_v59 = vld [vmem:[#allocation58_spill] sm:$0xff]  ;;  %v5126_v46 = vld [vmem:[#allocation116_spill] sm:$0xff]  ;;  %v5127_v40 = vld [vmem:[#allocation159_spill] sm:$0xff]  ;;  %v1487_v51 = vadd.f32 %v1486_v26, %v3835_v62 }
 0x17d   : > { %v1109_v17 = vadd.f32 %v1108_v37, %v5125_v59  ;;  %v1163_v61 = vadd.f32 %v1162_v23, %v5126_v46  ;;  %v1217_v0 = vadd.f32 %v1216_v42, %v5127_v40  ;;  %v5128_v19 = vld [vmem:[#allocation202_spill] sm:$0xff]  ;;  %v5129_v13 = vld [vmem:[#allocation245_spill] sm:$0xff]  ;;  %v5131_v4 = vld [vmem:[#allocation327_spill] sm:$0xff] }
 0x17e   : > { %v1271_v1 = vadd.f32 %v1270_v48, %v5128_v19  ;;  %v1325_v60 = vadd.f32 %v1324_v21, %v5129_v13  ;;  %v5130_v54 = vld [vmem:[#allocation294_spill] sm:$0xff]  ;;  %v1433_v14 = vadd.f32 %v1432_v52, %v5131_v4  ;;  %v5132_v63 = vld [vmem:[#allocation59_spill] sm:$0xff]  ;;  %v5133_v49 = vld [vmem:[#allocation117_spill] sm:$0xff]  ;;  %v1488_v10 = vadd.f32 %v1487_v51, %v3838_v36 }
 0x17f   : > { %v1379_v47 = vadd.f32 %v1378_v29, %v5130_v54  ;;  %v1110_v39 = vadd.f32 %v1109_v17, %v5132_v63  ;;  %v1164_v34 = vadd.f32 %v1163_v61, %v5133_v49  ;;  %v5134_v53 = vld [vmem:[#allocation160_spill] sm:$0xff]  ;;  %v5135_v32 = vld [vmem:[#allocation203_spill] sm:$0xff]  ;;  %v5136_v56 = vld [vmem:[#allocation246_spill] sm:$0xff] }
 0x180   : > { %v1218_v30 = vadd.f32 %v1217_v0, %v5134_v53  ;;  %v1272_v28 = vadd.f32 %v1271_v1, %v5135_v32  ;;  %v1326_v55 = vadd.f32 %v1325_v60, %v5136_v56  ;;  %v5137_v35 = vld [vmem:[#allocation295_spill] sm:$0xff]  ;;  %v5138_v24 = vld [vmem:[#allocation328_spill] sm:$0xff]  ;;  %v5140_v6 = vld [vmem:[#allocation118_spill] sm:$0xff]  ;;  %v1489_v27 = vadd.f32 %v1488_v10, %v3841_v18 }
 0x181   : > { %v1380_v45 = vadd.f32 %v1379_v47, %v5137_v35  ;;  %v1434_v3 = vadd.f32 %v1433_v14, %v5138_v24  ;;  %v5139_v15 = vld [vmem:[#allocation60_spill] sm:$0xff]  ;;  %v1165_v62 = vadd.f32 %v1164_v34, %v5140_v6  ;;  %v5141_v2 = vld [vmem:[#allocation161_spill] sm:$0xff]  ;;  %v5143_v9 = vld [vmem:[#allocation247_spill] sm:$0xff] }
 0x182   : > { %v1111_v31 = vadd.f32 %v1110_v39, %v5139_v15  ;;  %v1219_v37 = vadd.f32 %v1218_v30, %v5141_v2  ;;  %v5142_v11 = vld [vmem:[#allocation204_spill] sm:$0xff]  ;;  %v1327_v42 = vadd.f32 %v1326_v55, %v5143_v9  ;;  %v5145_v16 = vld [vmem:[#allocation329_spill] sm:$0xff]  ;;  %v5146_v29 = vld [vmem:[#allocation63_spill] sm:$0xff]  ;;  %v1490_v60 = vadd.f32 %v1489_v27, %v3847_v50 }
 0x183   : > { %v1273_v23 = vadd.f32 %v1272_v28, %v5142_v11  ;;  %v5144_v33 = vld [vmem:[#allocation296_spill] sm:$0xff]  ;;  %v1435_v21 = vadd.f32 %v1434_v3, %v5145_v16  ;;  %v5147_v52 = vld [vmem:[#allocation119_spill] sm:$0xff]  ;;  %v5148_v26 = vld [vmem:[#allocation162_spill] sm:$0xff] }
 0x184   : > { %v1381_v48 = vadd.f32 %v1380_v45, %v5144_v33  ;;  %v1112_v57 = vadd.f32 %v1111_v31, %v5146_v29  ;;  %v1166_v36 = vadd.f32 %v1165_v62, %v5147_v52  ;;  %v1220_v59 = vadd.f32 %v1219_v37, %v5148_v26  ;;  %v5149_v17 = vld [vmem:[#allocation205_spill] sm:$0xff]  ;;  %v5150_v61 = vld [vmem:[#allocation248_spill] sm:$0xff]  ;;  %v5152_v1 = vld [vmem:[#allocation330_spill] sm:$0xff] }
 0x185   : > { %v1274_v46 = vadd.f32 %v1273_v23, %v5149_v17  ;;  %v1328_v40 = vadd.f32 %v1327_v42, %v5150_v61  ;;  %v5151_v0 = vld [vmem:[#allocation297_spill] sm:$0xff]  ;;  %v1436_v13 = vadd.f32 %v1435_v21, %v5152_v1  ;;  %v5153_v54 = vld [vmem:[#allocation64_spill] sm:$0xff]  ;;  %v5155_v14 = vld [vmem:[#allocation163_spill] sm:$0xff]  ;;  %v1491_v56 = vadd.f32 %v1490_v60, %v3850_v22 }
 0x186   : > { %v1382_v19 = vadd.f32 %v1381_v48, %v5151_v0  ;;  %v1113_v47 = vadd.f32 %v1112_v57, %v5153_v54  ;;  %v5154_v4 = vld [vmem:[#allocation120_spill] sm:$0xff]  ;;  %v1221_v51 = vadd.f32 %v1220_v59, %v5155_v14  ;;  %v5156_v63 = vld [vmem:[#allocation206_spill] sm:$0xff]  ;;  %v5157_v49 = vld [vmem:[#allocation249_spill] sm:$0xff] }
 0x187   : > { %v1167_v18 = vadd.f32 %v1166_v36, %v5154_v4  ;;  %v1275_v39 = vadd.f32 %v1274_v46, %v5156_v63  ;;  %v1329_v34 = vadd.f32 %v1328_v40, %v5157_v49  ;;  %v5158_v53 = vld [vmem:[#allocation298_spill] sm:$0xff]  ;;  %v5159_v32 = vld [vmem:[#allocation331_spill] sm:$0xff]  ;;  %v5160_v55 = vld [vmem:[#allocation65_spill] sm:$0xff]  ;;  %v1492_v23 = vadd.f32 %v1491_v56, %v3853_v20 }
 0x188   : > { %v1383_v30 = vadd.f32 %v1382_v19, %v5158_v53  ;;  %v1437_v28 = vadd.f32 %v1436_v13, %v5159_v32  ;;  %v1114_v35 = vadd.f32 %v1113_v47, %v5160_v55  ;;  %v5161_v45 = vld [vmem:[#allocation121_spill] sm:$0xff]  ;;  %v5162_v24 = vld [vmem:[#allocation164_spill] sm:$0xff]  ;;  %v5163_v10 = vld [vmem:[#allocation207_spill] sm:$0xff] }
 0x189   : > { %v1168_v50 = vadd.f32 %v1167_v18, %v5161_v45  ;;  %v1222_v3 = vadd.f32 %v1221_v51, %v5162_v24  ;;  %v1276_v15 = vadd.f32 %v1275_v39, %v5163_v10  ;;  %v5164_v31 = vld [vmem:[#allocation250_spill] sm:$0xff]  ;;  %v5165_v62 = vld [vmem:[#allocation299_spill] sm:$0xff]  ;;  %v5166_v37 = vld [vmem:[#allocation332_spill] sm:$0xff]  ;;  %v1493_v17 = vadd.f32 %v1492_v23, %v3856_v44 }
 0x18a   : > { %v1330_v6 = vadd.f32 %v1329_v34, %v5164_v31  ;;  %v1384_v2 = vadd.f32 %v1383_v30, %v5165_v62  ;;  %v1438_v11 = vadd.f32 %v1437_v28, %v5166_v37  ;;  %v5167_v9 = vld [vmem:[#allocation68_spill] sm:$0xff]  ;;  %v5168_v33 = vld [vmem:[#allocation122_spill] sm:$0xff]  ;;  %v5169_v48 = vld [vmem:[#allocation165_spill] sm:$0xff] }
 0x18b   : > { %v1115_v42 = vadd.f32 %v1114_v35, %v5167_v9  ;;  %v1169_v22 = vadd.f32 %v1168_v50, %v5168_v33  ;;  %v1223_v16 = vadd.f32 %v1222_v3, %v5169_v48  ;;  %v5170_v21 = vld [vmem:[#allocation208_spill] sm:$0xff]  ;;  %v5171_v29 = vld [vmem:[#allocation62_spill] sm:$0xff]  ;;  %v5173_v26 = vld [vmem:[#allocation333_spill] sm:$0xff]  ;;  %v1494_v51 = vadd.f32 %v1493_v17, %v3862_v12 }
 0x18c   : > { %v1277_v27 = vadd.f32 %v1276_v15, %v5170_v21  ;;  %v1331_v57 = vadd.f32 %v1330_v6, %v5171_v29  ;;  %v5172_v52 = vld [vmem:[#allocation300_spill] sm:$0xff]  ;;  %v1439_v59 = vadd.f32 %v1438_v11, %v5173_v26  ;;  %v5174_v46 = vld [vmem:[#allocation69_spill] sm:$0xff]  ;;  %v5175_v40 = vld [vmem:[#allocation123_spill] sm:$0xff] }
 0x18d   : > { %v1385_v36 = vadd.f32 %v1384_v2, %v5172_v52  ;;  %v1116_v61 = vadd.f32 %v1115_v42, %v5174_v46  ;;  %v1170_v20 = vadd.f32 %v1169_v22, %v5175_v40  ;;  %v5176_v0 = vld [vmem:[#allocation166_spill] sm:$0xff]  ;;  %v5177_v1 = vld [vmem:[#allocation209_spill] sm:$0xff]  ;;  %v5178_v60 = vld [vmem:[#allocation251_spill] sm:$0xff]  ;;  %v1495_v24 = vadd.f32 %v1494_v51, %v3865_v43 }
 0x18e   : > { %v1224_v19 = vadd.f32 %v1223_v16, %v5176_v0  ;;  %v1278_v13 = vadd.f32 %v1277_v27, %v5177_v1  ;;  %v1332_v54 = vadd.f32 %v1331_v57, %v5178_v60  ;;  %v5179_v47 = vld [vmem:[#allocation301_spill] sm:$0xff]  ;;  %v5180_v18 = vld [vmem:[#allocation334_spill] sm:$0xff]  ;;  %v5182_v49 = vld [vmem:[#allocation124_spill] sm:$0xff] }
 0x18f   : > { %v1386_v4 = vadd.f32 %v1385_v36, %v5179_v47  ;;  %v1440_v14 = vadd.f32 %v1439_v59, %v5180_v18  ;;  %v5181_v63 = vld [vmem:[#allocation70_spill] sm:$0xff]  ;;  %v1171_v44 = vadd.f32 %v1170_v20, %v5182_v49  ;;  %v5183_v34 = vld [vmem:[#allocation167_spill] sm:$0xff]  ;;  %v5185_v28 = vld [vmem:[#allocation252_spill] sm:$0xff]  ;;  %v1496_v22 = vadd.f32 %v1495_v24, %v3868_v8 }
 0x190   : > { %v1117_v39 = vadd.f32 %v1116_v61, %v5181_v63  ;;  %v1225_v53 = vadd.f32 %v1224_v19, %v5183_v34  ;;  %v5184_v30 = vld [vmem:[#allocation210_spill] sm:$0xff]  ;;  %v1333_v56 = vadd.f32 %v1332_v54, %v5185_v28  ;;  %v5187_v45 = vld [vmem:[#allocation335_spill] sm:$0xff]  ;;  %v5189_v15 = vld [vmem:[#allocation125_spill] sm:$0xff] }
 0x191   : > { %v1279_v32 = vadd.f32 %v1278_v13, %v5184_v30  ;;  %v5186_v55 = vld [vmem:[#allocation302_spill] sm:$0xff]  ;;  %v1441_v50 = vadd.f32 %v1440_v14, %v5187_v45  ;;  %v5188_v3 = vld [vmem:[#allocation75_spill] sm:$0xff]  ;;  %v1172_v12 = vadd.f32 %v1171_v44, %v5189_v15  ;;  %v5190_v31 = vld [vmem:[#allocation168_spill] sm:$0xff]  ;;  %v1497_v40 = vadd.f32 %v1496_v22, %v3871_v41 }
 0x192   : > { %v1387_v35 = vadd.f32 %v1386_v4, %v5186_v55  ;;  %v1118_v10 = vadd.f32 %v1117_v39, %v5188_v3  ;;  %v1226_v6 = vadd.f32 %v1225_v53, %v5190_v31  ;;  %v5191_v62 = vld [vmem:[#allocation211_spill] sm:$0xff]  ;;  %v5192_v37 = vld [vmem:[#allocation253_spill] sm:$0xff]  ;;  %v5194_v42 = vld [vmem:[#allocation336_spill] sm:$0xff] }
 0x193   : > { %v1280_v2 = vadd.f32 %v1279_v32, %v5191_v62  ;;  %v1334_v11 = vadd.f32 %v1333_v56, %v5192_v37  ;;  %v5193_v23 = vld [vmem:[#allocation303_spill] sm:$0xff]  ;;  %v1442_v33 = vadd.f32 %v1441_v50, %v5194_v42  ;;  %v5195_v48 = vld [vmem:[#allocation76_spill] sm:$0xff]  ;;  %v5196_v21 = vld [vmem:[#allocation126_spill] sm:$0xff]  ;;  %v1498_v39 = vadd.f32 %v1497_v40, %v3877_v38 }
 0x194   : > { %v1388_v9 = vadd.f32 %v1387_v35, %v5193_v23  ;;  %v1119_v16 = vadd.f32 %v1118_v10, %v5195_v48  ;;  %v1173_v43 = vadd.f32 %v1172_v12, %v5196_v21  ;;  %v5197_v27 = vld [vmem:[#allocation169_spill] sm:$0xff]  ;;  %v5198_v57 = vld [vmem:[#allocation212_spill] sm:$0xff]  ;;  %v5199_v36 = vld [vmem:[#allocation67_spill] sm:$0xff] }
 0x195   : > { %v1227_v29 = vadd.f32 %v1226_v6, %v5197_v27  ;;  %v1281_v52 = vadd.f32 %v1280_v2, %v5198_v57  ;;  %v1335_v26 = vadd.f32 %v1334_v11, %v5199_v36  ;;  %v5200_v59 = vld [vmem:[#allocation304_spill] sm:$0xff]  ;;  %v5201_v46 = vld [vmem:[#allocation338_spill] sm:$0xff]  ;;  %v5202_v20 = vld [vmem:[#allocation77_spill] sm:$0xff]  ;;  %v1499_v3 = vadd.f32 %v1498_v39, %v3880_v25 }
 0x196   : > { %v1389_v17 = vadd.f32 %v1388_v9, %v5200_v59  ;;  %v1443_v61 = vadd.f32 %v1442_v33, %v5201_v46  ;;  %v1120_v0 = vadd.f32 %v1119_v16, %v5202_v20  ;;  %v5203_v19 = vld [vmem:[#allocation127_spill] sm:$0xff]  ;;  %v5204_v1 = vld [vmem:[#allocation170_spill] sm:$0xff]  ;;  %v5205_v60 = vld [vmem:[#allocation213_spill] sm:$0xff] }
 0x197   : > { %v1174_v8 = vadd.f32 %v1173_v43, %v5203_v19  ;;  %v1228_v13 = vadd.f32 %v1227_v29, %v5204_v1  ;;  %v1282_v54 = vadd.f32 %v1281_v52, %v5205_v60  ;;  %v5206_v47 = vld [vmem:[#allocation254_spill] sm:$0xff]  ;;  %v5207_v18 = vld [vmem:[#allocation305_spill] sm:$0xff]  ;;  %v5208_v51 = vld [vmem:[#allocation340_spill] sm:$0xff]  ;;  %v1500_v22 = vadd.f32 %v1499_v3, %v3883_v5 }
 0x198   : > { %v1336_v4 = vadd.f32 %v1335_v26, %v5206_v47  ;;  %v1390_v14 = vadd.f32 %v1389_v17, %v5207_v18  ;;  %v1444_v63 = vadd.f32 %v1443_v61, %v5208_v51  ;;  %v5209_v49 = vld [vmem:[#allocation82_spill] sm:$0xff]  ;;  %v5210_v34 = vld [vmem:[#allocation128_spill] sm:$0xff]  ;;  %v5211_v53 = vld [vmem:[#allocation171_spill] sm:$0xff] }
 0x199   : > { %v1121_v44 = vadd.f32 %v1120_v0, %v5209_v49  ;;  %v1175_v41 = vadd.f32 %v1174_v8, %v5210_v34  ;;  %v1229_v30 = vadd.f32 %v1228_v13, %v5211_v53  ;;  %v5212_v32 = vld [vmem:[#allocation214_spill] sm:$0xff]  ;;  %v5213_v56 = vld [vmem:[#allocation72_spill] sm:$0xff]  ;;  %v5216_v10 = vld [vmem:[#allocation83_spill] sm:$0xff]  ;;  %v1501_v61 = vadd.f32 %v1500_v22, %v3886_v7 }
 0x19a   : > { %v1283_v28 = vadd.f32 %v1282_v54, %v5212_v32  ;;  %v1337_v55 = vadd.f32 %v1336_v4, %v5213_v56  ;;  %v5214_v35 = vld [vmem:[#allocation306_spill] sm:$0xff]  ;;  %v5217_v12 = vld [vmem:[#allocation129_spill] sm:$0xff]  ;;  %v5218_v31 = vld [vmem:[#allocation172_spill] sm:$0xff] }
 0x19b   : > { %v1391_v45 = vadd.f32 %v1390_v14, %v5214_v35  ;;  %v5215_v50 = vld [vmem:[#allocation342_spill] sm:$0xff]  ;;  %v1122_v15 = vadd.f32 %v1121_v44, %v5216_v10  ;;  %v1176_v38 = vadd.f32 %v1175_v41, %v5217_v12  ;;  %v1230_v6 = vadd.f32 %v1229_v30, %v5218_v31  ;;  %v5219_v62 = vld [vmem:[#allocation215_spill] sm:$0xff]  ;;  %v5220_v37 = vld [vmem:[#allocation73_spill] sm:$0xff] }
 0x19c   : > { %v1445_v24 = vadd.f32 %v1444_v63, %v5215_v50  ;;  %v1284_v2 = vadd.f32 %v1283_v28, %v5219_v62  ;;  %v1338_v11 = vadd.f32 %v1337_v55, %v5220_v37  ;;  %v5221_v23 = vld [vmem:[#allocation307_spill] sm:$0xff]  ;;  %v5222_v42 = vld [vmem:[#allocation344_spill] sm:$0xff]  ;;  %v5224_v21 = vld [vmem:[#allocation130_spill] sm:$0xff]  ;;  %v1502_v51 = vadd.f32 %v1501_v61, %v3889_v58 }
 0x19d   : > { %v1392_v9 = vadd.f32 %v1391_v45, %v5221_v23  ;;  %v5223_v48 = vld [vmem:[#allocation84_spill] sm:$0xff]  ;;  %v1177_v25 = vadd.f32 %v1176_v38, %v5224_v21  ;;  %v5225_v43 = vld [vmem:[#allocation173_spill] sm:$0xff]  ;;  %v5227_v52 = vld [vmem:[#allocation74_spill] sm:$0xff] }
 0x19e   : > { %v1446_v33 = vadd.f32 %v1445_v24, %v5222_v42  ;;  %v1123_v16 = vadd.f32 %v1122_v15, %v5223_v48  ;;  %v1231_v27 = vadd.f32 %v1230_v6, %v5225_v43  ;;  %v5226_v29 = vld [vmem:[#allocation216_spill] sm:$0xff]  ;;  %v1339_v36 = vadd.f32 %v1338_v11, %v5227_v52  ;;  %v5229_v17 = vld [vmem:[#allocation346_spill] sm:$0xff]  ;;  %v5230_v40 = vld [vmem:[#allocation89_spill] sm:$0xff] }
 0x19f   : > { %v1285_v57 = vadd.f32 %v1284_v2, %v5226_v29  ;;  %v5228_v26 = vld [vmem:[#allocation308_spill] sm:$0xff]  ;;  %v5231_v0 = vld [vmem:[#allocation131_spill] sm:$0xff]  ;;  %v5232_v19 = vld [vmem:[#allocation174_spill] sm:$0xff] }
 0x1a0   : > { %v1393_v59 = vadd.f32 %v1392_v9, %v5228_v26  ;;  %v1447_v46 = vadd.f32 %v1446_v33, %v5229_v17  ;;  %v1124_v20 = vadd.f32 %v1123_v16, %v5230_v40  ;;  %v1178_v5 = vadd.f32 %v1177_v25, %v5231_v0  ;;  %v5233_v1 = vld [vmem:[#allocation217_spill] sm:$0xff]  ;;  %v5234_v60 = vld [vmem:[#allocation79_spill] sm:$0xff]  ;;  %v5236_v18 = vld [vmem:[#allocation348_spill] sm:$0xff] }
 0x1a1   : > { %v1232_v8 = vadd.f32 %v1231_v27, %v5232_v19  ;;  %v1286_v13 = vadd.f32 %v1285_v57, %v5233_v1  ;;  %v1340_v54 = vadd.f32 %v1339_v36, %v5234_v60  ;;  %v5235_v47 = vld [vmem:[#allocation309_spill] sm:$0xff]  ;;  %v5237_v63 = vld [vmem:[#allocation90_spill] sm:$0xff]  ;;  %v5238_v49 = vld [vmem:[#allocation132_spill] sm:$0xff] }
 0x1a2   : > { %v1394_v4 = vadd.f32 %v1393_v59, %v5235_v47  ;;  %v1448_v14 = vadd.f32 %v1447_v46, %v5236_v18  ;;  %v1125_v39 = vadd.f32 %v1124_v20, %v5237_v63  ;;  %v1179_v7 = vadd.f32 %v1178_v5, %v5238_v49  ;;  %v5239_v44 = vld [vmem:[#allocation175_spill] sm:$0xff]  ;;  %v5240_v41 = vld [vmem:[#allocation218_spill] sm:$0xff]  ;;  %v5241_v30 = vld [vmem:[#allocation80_spill] sm:$0xff] }
 0x1a3   : > { %v1233_v34 = vadd.f32 %v1232_v8, %v5239_v44  ;;  %v1287_v53 = vadd.f32 %v1286_v13, %v5240_v41  ;;  %v1341_v32 = vadd.f32 %v1340_v54, %v5241_v30  ;;  %v5242_v28 = vld [vmem:[#allocation310_spill] sm:$0xff]  ;;  %v5244_v45 = vld [vmem:[#allocation337_spill] sm:$0xff]  ;;  %v5245_v24 = vld [vmem:[#allocation91_spill] sm:$0xff] }
 0x1a4   : > { %v1395_v56 = vadd.f32 %v1394_v4, %v5242_v28  ;;  %v5243_v55 = vld [vmem:[#allocation350_spill] sm:$0xff]  ;;  %v1503_v50 = vadd.f32 %v1502_v51, %v5244_v45  ;;  %v1126_v3 = vadd.f32 %v1125_v39, %v5245_v24  ;;  %v5246_v10 = vld [vmem:[#allocation133_spill] sm:$0xff]  ;;  %v5247_v15 = vld [vmem:[#allocation176_spill] sm:$0xff] }
 0x1a5   : > { %v1449_v35 = vadd.f32 %v1448_v14, %v5243_v55  ;;  %v1180_v58 = vadd.f32 %v1179_v7, %v5246_v10  ;;  %v1234_v12 = vadd.f32 %v1233_v34, %v5247_v15  ;;  %v5248_v38 = vld [vmem:[#allocation219_spill] sm:$0xff]  ;;  %v5249_v6 = vld [vmem:[#allocation81_spill] sm:$0xff]  ;;  %v5251_v11 = vld [vmem:[#allocation352_spill] sm:$0xff] }
 0x1a6   : > { %v1288_v31 = vadd.f32 %v1287_v53, %v5248_v38  ;;  %v1342_v62 = vadd.f32 %v1341_v32, %v5249_v6  ;;  %v5250_v2 = vld [vmem:[#allocation311_spill] sm:$0xff]  ;;  %v5253_v33 = vld [vmem:[#allocation96_spill] sm:$0xff]  ;;  %v5254_v48 = vld [vmem:[#allocation134_spill] sm:$0xff] }
 0x1a7   : > { %v1396_v37 = vadd.f32 %v1395_v56, %v5250_v2  ;;  %v1450_v23 = vadd.f32 %v1449_v35, %v5251_v11  ;;  %v5252_v9 = vld [vmem:[#allocation339_spill] sm:$0xff]  ;;  %v1127_v22 = vadd.f32 %v1126_v3, %v5253_v33  ;;  %v1181_v16 = vadd.f32 %v1180_v58, %v5254_v48  ;;  %v5255_v21 = vld [vmem:[#allocation177_spill] sm:$0xff]  ;;  %v5256_v43 = vld [vmem:[#allocation220_spill] sm:$0xff] }
 0x1a8   : > { %v1504_v42 = vadd.f32 %v1503_v50, %v5252_v9  ;;  %v1235_v25 = vadd.f32 %v1234_v12, %v5255_v21  ;;  %v1289_v27 = vadd.f32 %v1288_v31, %v5256_v43  ;;  %v5257_v29 = vld [vmem:[#allocation86_spill] sm:$0xff]  ;;  %v5258_v52 = vld [vmem:[#allocation312_spill] sm:$0xff]  ;;  %v5260_v17 = vld [vmem:[#allocation341_spill] sm:$0xff] }
 0x1a9   : > { %v1343_v57 = vadd.f32 %v1342_v62, %v5257_v29  ;;  %v1397_v36 = vadd.f32 %v1396_v37, %v5258_v52  ;;  %v5259_v26 = vld [vmem:[#allocation354_spill] sm:$0xff]  ;;  %v5261_v61 = vld [vmem:[#allocation97_spill] sm:$0xff]  ;;  %v5262_v20 = vld [vmem:[#allocation135_spill] sm:$0xff] }
 0x1aa   : > { %v1451_v59 = vadd.f32 %v1450_v23, %v5259_v26  ;;  %v1505_v46 = vadd.f32 %v1504_v42, %v5260_v17  ;;  %v1128_v40 = vadd.f32 %v1127_v22, %v5261_v61  ;;  %v1182_v0 = vadd.f32 %v1181_v16, %v5262_v20  ;;  %v5263_v5 = vld [vmem:[#allocation178_spill] sm:$0xff]  ;;  %v5264_v8 = vld [vmem:[#allocation221_spill] sm:$0xff]  ;;  %v5265_v13 = vld [vmem:[#allocation87_spill] sm:$0xff] }
 0x1ab   : > { %v1236_v19 = vadd.f32 %v1235_v25, %v5263_v5  ;;  %v1290_v1 = vadd.f32 %v1289_v27, %v5264_v8  ;;  %v1344_v60 = vadd.f32 %v1343_v57, %v5265_v13  ;;  %v5266_v54 = vld [vmem:[#allocation313_spill] sm:$0xff]  ;;  %v5267_v4 = vld [vmem:[#allocation356_spill] sm:$0xff]  ;;  %v5268_v14 = vld [vmem:[#allocation343_spill] sm:$0xff] }
 0x1ac   : > { %v1398_v47 = vadd.f32 %v1397_v36, %v5266_v54  ;;  %v1452_v18 = vadd.f32 %v1451_v59, %v5267_v4  ;;  %v1506_v51 = vadd.f32 %v1505_v46, %v5268_v14  ;;  %v5269_v63 = vld [vmem:[#allocation98_spill] sm:$0xff]  ;;  %v5270_v49 = vld [vmem:[#allocation136_spill] sm:$0xff]  ;;  %v5271_v44 = vld [vmem:[#allocation179_spill] sm:$0xff] }
 0x1ad   : > { %v1129_v39 = vadd.f32 %v1128_v40, %v5269_v63  ;;  %v1183_v7 = vadd.f32 %v1182_v0, %v5270_v49  ;;  %v1237_v34 = vadd.f32 %v1236_v19, %v5271_v44  ;;  %v5272_v41 = vld [vmem:[#allocation222_spill] sm:$0xff]  ;;  %v5273_v30 = vld [vmem:[#allocation88_spill] sm:$0xff]  ;;  %v5276_v45 = vld [vmem:[#allocation345_spill] sm:$0xff] }
 0x1ae   : > { %v1291_v53 = vadd.f32 %v1290_v1, %v5272_v41  ;;  %v1345_v32 = vadd.f32 %v1344_v60, %v5273_v30  ;;  %v5274_v28 = vld [vmem:[#allocation314_spill] sm:$0xff]  ;;  %v1507_v50 = vadd.f32 %v1506_v51, %v5276_v45  ;;  %v5277_v24 = vld [vmem:[#allocation103_spill] sm:$0xff]  ;;  %v5278_v10 = vld [vmem:[#allocation137_spill] sm:$0xff] }
 0x1af   : > { %v1399_v56 = vadd.f32 %v1398_v47, %v5274_v28  ;;  %v5275_v55 = vld [vmem:[#allocation358_spill] sm:$0xff]  ;;  %v1130_v3 = vadd.f32 %v1129_v39, %v5277_v24  ;;  %v1184_v58 = vadd.f32 %v1183_v7, %v5278_v10  ;;  %v5279_v15 = vld [vmem:[#allocation180_spill] sm:$0xff]  ;;  %v5280_v38 = vld [vmem:[#allocation223_spill] sm:$0xff] }
 0x1b0   : > { %v1453_v35 = vadd.f32 %v1452_v18, %v5275_v55  ;;  %v1238_v12 = vadd.f32 %v1237_v34, %v5279_v15  ;;  %v1292_v31 = vadd.f32 %v1291_v53, %v5280_v38  ;;  %v5281_v6 = vld [vmem:[#allocation93_spill] sm:$0xff]  ;;  %v5282_v2 = vld [vmem:[#allocation315_spill] sm:$0xff]  ;;  %v5283_v11 = vld [vmem:[#allocation360_spill] sm:$0xff] }
 0x1b1   : > { %v1346_v62 = vadd.f32 %v1345_v32, %v5281_v6  ;;  %v1400_v37 = vadd.f32 %v1399_v56, %v5282_v2  ;;  %v5284_v9 = vld [vmem:[#allocation347_spill] sm:$0xff]  ;;  %v5285_v33 = vld [vmem:[#allocation104_spill] sm:$0xff]  ;;  %v5286_v48 = vld [vmem:[#allocation138_spill] sm:$0xff] }
 0x1b2   : > { %v1454_v23 = vadd.f32 %v1453_v35, %v5283_v11  ;;  %v1508_v42 = vadd.f32 %v1507_v50, %v5284_v9  ;;  %v1131_v22 = vadd.f32 %v1130_v3, %v5285_v33  ;;  %v1185_v16 = vadd.f32 %v1184_v58, %v5286_v48  ;;  %v5287_v21 = vld [vmem:[#allocation181_spill] sm:$0xff]  ;;  %v5288_v43 = vld [vmem:[#allocation224_spill] sm:$0xff]  ;;  %v5289_v29 = vld [vmem:[#allocation94_spill] sm:$0xff] }
 0x1b3   : > { %v1239_v25 = vadd.f32 %v1238_v12, %v5287_v21  ;;  %v1293_v27 = vadd.f32 %v1292_v31, %v5288_v43  ;;  %v1347_v57 = vadd.f32 %v1346_v62, %v5289_v29  ;;  %v5290_v52 = vld [vmem:[#allocation316_spill] sm:$0xff]  ;;  %v5291_v26 = vld [vmem:[#allocation362_spill] sm:$0xff]  ;;  %v5292_v17 = vld [vmem:[#allocation349_spill] sm:$0xff] }
 0x1b4   : > { %v1401_v36 = vadd.f32 %v1400_v37, %v5290_v52  ;;  %v1455_v59 = vadd.f32 %v1454_v23, %v5291_v26  ;;  %v1509_v46 = vadd.f32 %v1508_v42, %v5292_v17  ;;  %v5293_v61 = vld [vmem:[#allocation105_spill] sm:$0xff]  ;;  %v5294_v20 = vld [vmem:[#allocation139_spill] sm:$0xff]  ;;  %v5295_v5 = vld [vmem:[#allocation182_spill] sm:$0xff] }
 0x1b5   : > { %v1132_v40 = vadd.f32 %v1131_v22, %v5293_v61  ;;  %v1186_v0 = vadd.f32 %v1185_v16, %v5294_v20  ;;  %v1240_v19 = vadd.f32 %v1239_v25, %v5295_v5  ;;  %v5296_v8 = vld [vmem:[#allocation95_spill] sm:$0xff]  ;;  %v5298_v54 = vld [vmem:[#allocation317_spill] sm:$0xff]  ;;  %v5299_v4 = vld [vmem:[#allocation364_spill] sm:$0xff] }
 0x1b6   : > { %v1294_v1 = vadd.f32 %v1293_v27, %v5296_v8  ;;  %v5297_v13 = vld [vmem:[#allocation255_spill] sm:$0xff]  ;;  %v1402_v47 = vadd.f32 %v1401_v36, %v5298_v54  ;;  %v1456_v18 = vadd.f32 %v1455_v59, %v5299_v4  ;;  %v5302_v49 = vld [vmem:[#allocation140_spill] sm:$0xff]  ;;  %v5304_v41 = vld [vmem:[#allocation225_spill] sm:$0xff] }
 0x1b7   : > { %v1348_v60 = vadd.f32 %v1347_v57, %v5297_v13  ;;  %v5300_v14 = vld [vmem:[#allocation351_spill] sm:$0xff]  ;;  %v1187_v7 = vadd.f32 %v1186_v0, %v5302_v49  ;;  %v5305_v30 = vld [vmem:[#allocation100_spill] sm:$0xff]  ;;  %v5306_v28 = vld [vmem:[#allocation318_spill] sm:$0xff] }
 0x1b8   : > { %v1510_v51 = vadd.f32 %v1509_v46, %v5300_v14  ;;  %v5301_v63 = vld [vmem:[#allocation107_spill] sm:$0xff]  ;;  %v1295_v53 = vadd.f32 %v1294_v1, %v5304_v41  ;;  %v1403_v56 = vadd.f32 %v1402_v47, %v5306_v28  ;;  %v5307_v55 = vld [vmem:[#allocation366_spill] sm:$0xff]  ;;  %v5308_v45 = vld [vmem:[#allocation353_spill] sm:$0xff] }
 0x1b9   : > { %v1133_v39 = vadd.f32 %v1132_v40, %v5301_v63  ;;  %v5303_v44 = vld [vmem:[#allocation183_spill] sm:$0xff]  ;;  %v1349_v32 = vadd.f32 %v1348_v60, %v5305_v30  ;;  %v1457_v35 = vadd.f32 %v1456_v18, %v5307_v55  ;;  %v5309_v24 = vld [vmem:[#allocation108_spill] sm:$0xff]  ;;  %v5310_v10 = vld [vmem:[#allocation141_spill] sm:$0xff] }
 0x1ba   : > { %v1241_v34 = vadd.f32 %v1240_v19, %v5303_v44  ;;  %v1511_v50 = vadd.f32 %v1510_v51, %v5308_v45  ;;  %v1188_v58 = vadd.f32 %v1187_v7, %v5310_v10  ;;  %v5311_v15 = vld [vmem:[#allocation184_spill] sm:$0xff]  ;;  %v5312_v38 = vld [vmem:[#allocation226_spill] sm:$0xff]  ;;  %v5313_v6 = vld [vmem:[#allocation101_spill] sm:$0xff] }
 0x1bb   : > { %v1134_v3 = vadd.f32 %v1133_v39, %v5309_v24  ;;  %v1296_v31 = vadd.f32 %v1295_v53, %v5312_v38  ;;  %v1350_v62 = vadd.f32 %v1349_v32, %v5313_v6  ;;  %v5314_v2 = vld [vmem:[#allocation319_spill] sm:$0xff]  ;;  %v5317_v33 = vld [vmem:[#allocation109_spill] sm:$0xff]  ;;  %v5318_v48 = vld [vmem:[#allocation142_spill] sm:$0xff] }
 0x1bc   : > { %v1242_v12 = vadd.f32 %v1241_v34, %v5311_v15  ;;  %v1404_v37 = vadd.f32 %v1403_v56, %v5314_v2  ;;  %v5315_v11 = vld [vmem:[#allocation367_spill] sm:$0xff]  ;;  %v1189_v16 = vadd.f32 %v1188_v58, %v5318_v48  ;;  %v5319_v21 = vld [vmem:[#allocation185_spill] sm:$0xff]  ;;  %v5321_v29 = vld [vmem:[#allocation102_spill] sm:$0xff] }
 0x1bd   : > { %v1458_v23 = vadd.f32 %v1457_v35, %v5315_v11  ;;  %v5316_v9 = vld [vmem:[#allocation355_spill] sm:$0xff]  ;;  %v1135_v22 = vadd.f32 %v1134_v3, %v5317_v33  ;;  %v1351_v57 = vadd.f32 %v1350_v62, %v5321_v29  ;;  %v5322_v52 = vld [vmem:[#allocation320_spill] sm:$0xff]  ;;  %v5324_v17 = vld [vmem:[#allocation357_spill] sm:$0xff] }
 0x1be   : > { %v1512_v42 = vadd.f32 %v1511_v50, %v5316_v9  ;;  %v1243_v25 = vadd.f32 %v1242_v12, %v5319_v21  ;;  %v5320_v43 = vld [vmem:[#allocation227_spill] sm:$0xff]  ;;  %v1405_v36 = vadd.f32 %v1404_v37, %v5322_v52  ;;  %v5323_v26 = vld [vmem:[#allocation368_spill] sm:$0xff]  ;;  %v1190_v40 = vrot.slane %v1189_v16, 4 }
 0x1bf   : > { %v1297_v27 = vadd.f32 %v1296_v31, %v5320_v43  ;;  %v1459_v59 = vadd.f32 %v1458_v23, %v5323_v26  ;;  %v1136_v61 = vrot.slane %v1135_v22, 4  ;;  %v1352_v5 = vrot.slane %v1351_v57, 4 }
 0x1c0   : > { %v1513_v46 = vadd.f32 %v1512_v42, %v5324_v17  ;;  %v1244_v20 = vrot.slane %v1243_v25, 4  ;;  %v1406_v19 = vrot.slane %v1405_v36, 4  ;;  %v1191_v60 = vadd.f32 %v1190_v40, %v1189_v16 }
 0x1c1   : > { %v1298_v0 = vrot.slane %v1297_v27, 4  ;;  %v1460_v8 = vrot.slane %v1459_v59, 4  ;;  %v1137_v13 = vadd.f32 %v1136_v61, %v1135_v22  ;;  %v1353_v4 = vadd.f32 %v1352_v5, %v1351_v57 }
 0x1c2   : > { %v1514_v1 = vrot.slane %v1513_v46, 4  ;;  %v1245_v54 = vadd.f32 %v1244_v20, %v1243_v25  ;;  %v1407_v18 = vadd.f32 %v1406_v19, %v1405_v36  ;;  %v1192_v39 = vrot.slane %v1191_v60, 2 }
 0x1c3   : > { %v1299_v47 = vadd.f32 %v1298_v0, %v1297_v27  ;;  %v1461_v14 = vadd.f32 %v1460_v8, %v1459_v59  ;;  %v1138_v63 = vrot.slane %v1137_v13, 2  ;;  %v1354_v44 = vrot.slane %v1353_v4, 2 }
 0x1c4   : > { %v1515_v51 = vadd.f32 %v1514_v1, %v1513_v46  ;;  %v1246_v49 = vrot.slane %v1245_v54, 2  ;;  %v1408_v34 = vrot.slane %v1407_v18, 2  ;;  %v1193_v32 = vadd.f32 %v1192_v39, %v1191_v60 }
 0x1c5   : > { %v1300_v7 = vrot.slane %v1299_v47, 2  ;;  %v1462_v41 = vrot.slane %v1461_v14, 2  ;;  %v1139_v30 = vadd.f32 %v1138_v63, %v1137_v13  ;;  %v1355_v55 = vadd.f32 %v1354_v44, %v1353_v4 }
 0x1c6   : > { %v1516_v53 = vrot.slane %v1515_v51, 2  ;;  %v1247_v28 = vadd.f32 %v1246_v49, %v1245_v54  ;;  %v1409_v35 = vadd.f32 %v1408_v34, %v1407_v18  ;;  %v1194_v3 = vrot.slane %v1193_v32, 1 }
 0x1c7   : > { %v1301_v56 = vadd.f32 %v1300_v7, %v1299_v47  ;;  %v1463_v45 = vadd.f32 %v1462_v41, %v1461_v14  ;;  %v1140_v24 = vrot.slane %v1139_v30, 1  ;;  %v1356_v15 = vrot.slane %v1355_v55, 1 }
 0x1c8   : > { %v1517_v50 = vadd.f32 %v1516_v53, %v1515_v51  ;;  %v1248_v10 = vrot.slane %v1247_v28, 1  ;;  %v1410_v12 = vrot.slane %v1409_v35, 1  ;;  %v1195_v31 = vadd.f32 %v1194_v3, %v1193_v32 }
 0x1c9   : > { %v1302_v58 = vrot.slane %v1301_v56, 1  ;;  %v1141_v38 = vadd.f32 %v1140_v24, %v1139_v30  ;;  %v1464_v62 = vrot.slane %v1463_v45, 1  ;;  %v1357_v11 = vadd.f32 %v1356_v15, %v1355_v55 }
 0x1ca   : > { %v1249_v6 = vadd.f32 %v1248_v10, %v1247_v28  ;;  %v1518_v37 = vrot.slane %v1517_v50, 1  ;;  %v1411_v23 = vadd.f32 %v1410_v12, %v1409_v35 }
 0x1cb   : > { %v1303_v2 = vadd.f32 %v1302_v58, %v1301_v56  ;;  %v1529_v9 = vsel %vm1528_vm0, %v1195_v31, %v1141_v38  ;;  %v1465_v42 = vadd.f32 %v1464_v62, %v1463_v45 }
 0x1cc   : > { %v1531_v33 = vsel %vm1530_vm1, %v1249_v6, %v1529_v9  ;;  %v1519_v22 = vadd.f32 %v1518_v37, %v1517_v50 }
 0x1cd   : > { %v1533_v48 = vsel %vm1532_vm2, %v1303_v2, %v1531_v33 }
 0x1ce   : > { %v1535_v16 = vsel %vm1534_vm3, %v1357_v11, %v1533_v48 }
 0x1cf   : > { %v1537_v21 = vsel %vm1536_vm4, %v1411_v23, %v1535_v16 }
 0x1d0   : > { %v1539_v25 = vsel %vm1538_vm5, %v1465_v42, %v1537_v21 }
 0x1d1   : > { %v1541_v43 = vsel %vm1540_vm6, %v1519_v22, %v1539_v25 }
 0x1d2   : > { %1543 = vadd.xlane.f32.xlu0 %v1541_v43 }
 0x25b   : > { %v1544_v27 = vpop.xlane.xlu0 %1543 }
 0x25c   : > { %1546 = vst.msk [vmem:[%s254_s26] sm:$0xff] %vm1545_vm7, %v1544_v27 }
 0x25d PF: > { %s18_s14 = sadd.s32 1, %s1870_s14   ;;  %s5325_s9 = smov %s1854_s10 }
 0x25e   : > { %p15_p6 = scmp.ge.s32.totalorder %s18_s14, 5   ;;  %s5326_s10 = smov %s1858_s11 }
 0x25f   : > { %s5327_s11 = smov %s1944_s21  ;;  %s5328_s12 = smov %s1866_s13 }
 0x260   : > { %s5329_s13 = smov %s5331_s16  ;;  %17 = sbr.rel (!%p15_p6) target bundleno = 6 (0x6), region = 86 }
 0x265   :  { %1572 = vsyncpa [#allocation3], 1 }
 0x266   :  { %1574 = vsyncpa [#allocation3 + $0x1], 1 }
 0x267   :  { %1575 = vsyncpa [#allocation5], 1 }
 0x268   :  { %1577 = vsyncpa [#allocation5 + $0x1], 1 }

</bundles_post_ra>
